<compile_context>
chip_gen: v7x
topology: tpu7x:2x2x1
jax: 0.10.0
libtpu: 0.0.40
codegen_flags: <defaults>
</compile_context>

<pallas_src>
import jax
import jax.numpy as jnp
from jax.experimental import pallas as pl
from jax.experimental.pallas import tpu as pltpu

LANE = 128     # pad every feature axis to a multiple of the 128-lane vreg width
SUBLANE = 8    # batch tiles are multiples of the 8-sublane vreg height


def _relu(x):
    return jnp.maximum(x, 0.0)


def v1_semi_kernel(
    # activations (one batch tile each)
    th_ref, ah_ref, vh_ref,
    # post-text head
    wt1_ref, bt1_ref, wt2_ref, bt2_ref, wt3_ref, bt3_ref,
    # post-audio head
    wa1_ref, ba1_ref, wa2_ref, ba2_ref, wa3_ref, ba3_ref,
    # post-video head
    wv1_ref, bv1_ref, wv2_ref, bv2_ref, wv3_ref, bv3_ref,
    # fusion head (layer_1 split per branch so no in-kernel concat is needed)
    wf1t_ref, wf1a_ref, wf1v_ref, bf1_ref, wf2_ref, bf2_ref, wf3_ref, bf3_ref,
    # reconstitution branches
    wtr1_ref, btr1_ref, wtr2_ref, btr2_ref,
    war1_ref, bar1_ref, war2_ref, bar2_ref,
    wvr1_ref, bvr1_ref, wvr2_ref, bvr2_ref,
    # outputs
    t_out_ref, a_out_ref, v_out_ref, m_out_ref,
    trec_ref, arec_ref, vrec_ref,
):
    def dense(x, w_ref, b_ref):
        return jnp.dot(x, w_ref[...], preferred_element_type=jnp.float32) + b_ref[...]

    th = th_ref[...]
    ah = ah_ref[...]
    vh = vh_ref[...]

    # ---- text head (post_text_dropout = identity, eval semantics) ----
    x_t2 = _relu(dense(th, wt1_ref, bt1_ref))
    x_t3 = _relu(dense(x_t2, wt2_ref, bt2_ref))
    t_out_ref[...] = dense(x_t3, wt3_ref, bt3_ref).astype(t_out_ref.dtype)

    # ---- audio head ----
    x_a2 = _relu(dense(ah, wa1_ref, ba1_ref))
    x_a3 = _relu(dense(x_a2, wa2_ref, ba2_ref))
    a_out_ref[...] = dense(x_a3, wa3_ref, ba3_ref).astype(a_out_ref.dtype)

    # ---- video head ----
    x_v2 = _relu(dense(vh, wv1_ref, bv1_ref))
    x_v3 = _relu(dense(x_v2, wv2_ref, bv2_ref))
    v_out_ref[...] = dense(x_v3, wv3_ref, bv3_ref).astype(v_out_ref.dtype)

    # ---- fusion: cat([x_t2, x_a2, x_v2]) @ Wf1 == sum of three matmuls ----
    f1 = (jnp.dot(x_t2, wf1t_ref[...], preferred_element_type=jnp.float32)
          + jnp.dot(x_a2, wf1a_ref[...], preferred_element_type=jnp.float32)
          + jnp.dot(x_v2, wf1v_ref[...], preferred_element_type=jnp.float32)
          + bf1_ref[...])                       # NOTE: no ReLU in fusion (matches spec)
    f2 = dense(f1, wf2_ref, bf2_ref)
    f3 = dense(f2, wf3_ref, bf3_ref)
    sig = 1.0 / (1.0 + jnp.exp(-f3))            # sigmoid (EUP)
    m_out_ref[...] = (sig * 6.0 - 3.0).astype(m_out_ref.dtype)   # * range + shift

    # ---- reconstitution branches (rec_dropout = identity) ----
    trec_ref[...] = dense(_relu(dense(x_t2, wtr1_ref, btr1_ref)),
                          wtr2_ref, btr2_ref).astype(trec_ref.dtype)
    arec_ref[...] = dense(_relu(dense(x_a2, war1_ref, bar1_ref)),
                          war2_ref, bar2_ref).astype(arec_ref.dtype)
    vrec_ref[...] = dense(_relu(dense(x_v2, wvr1_ref, bvr1_ref)),
                          wvr2_ref, bvr2_ref).astype(vrec_ref.dtype)


def _rup(n, m):
    return ((n + m - 1) // m) * m


def _pad2(a, rows, cols):
    pr, pc = rows - a.shape[0], cols - a.shape[1]
    if pr == 0 and pc == 0:
        return a
    return jnp.pad(a, ((0, pr), (0, pc)))


def v1_semi_forward(text_h, audio_h, video_h, params, *, block_batch=256):
    """V1_Semi forward ('mix_train' branch, eval-mode dropout) via one pallas_call.

    text_h:  (B, text_hidden)       audio_h: (B, 4*audio_hidden)
    video_h: (B, 4*video_hidden)    params:  dict from init_params (weights (in,out))
    """
    p = params
    B = text_h.shape[0]

    # original (unpadded) dims
    th_d, ah_d, vh_d = text_h.shape[1], audio_h.shape[1], video_h.shape[1]
    pt, pa, pv = p["wt1"].shape[1], p["wa1"].shape[1], p["wv1"].shape[1]
    pf = p["wf2"].shape[1]
    ti, ai, vi = p["wtr2"].shape[1], p["war2"].shape[1], p["wvr2"].shape[1]

    # lane-dense padded dims (multiples of 128)
    ThP, AhP, VhP = _rup(th_d, LANE), _rup(ah_d, LANE), _rup(vh_d, LANE)
    PtP, PaP, PvP, PfP = _rup(pt, LANE), _rup(pa, LANE), _rup(pv, LANE), _rup(pf, LANE)
    TiP, AiP, ViP = _rup(ti, LANE), _rup(ai, LANE), _rup(vi, LANE)
    ScP = LANE                                   # scalar heads: 1 -> 128

    # batch tiling: biggest tile up to block_batch, multiple of 8 sublanes
    TB = min(block_batch, _rup(B, SUBLANE))
    Bp = _rup(B, TB)
    n_blocks = Bp // TB

    f32 = jnp.float32
    th_p = _pad2(text_h.astype(f32), Bp, ThP)
    ah_p = _pad2(audio_h.astype(f32), Bp, AhP)
    vh_p = _pad2(video_h.astype(f32), Bp, VhP)

    wf1 = p["wf1"]                               # (pt+pa+pv, pf) -> split per branch
    weights = [
        _pad2(p["wt1"], ThP, PtP), _pad2(p["bt1"], 1, PtP),
        _pad2(p["wt2"], PtP, PtP), _pad2(p["bt2"], 1, PtP),
        _pad2(p["wt3"], PtP, ScP), _pad2(p["bt3"], 1, ScP),
        _pad2(p["wa1"], AhP, PaP), _pad2(p["ba1"], 1, PaP),
        _pad2(p["wa2"], PaP, PaP), _pad2(p["ba2"], 1, PaP),
        _pad2(p["wa3"], PaP, ScP), _pad2(p["ba3"], 1, ScP),
        _pad2(p["wv1"], VhP, PvP), _pad2(p["bv1"], 1, PvP),
        _pad2(p["wv2"], PvP, PvP), _pad2(p["bv2"], 1, PvP),
        _pad2(p["wv3"], PvP, ScP), _pad2(p["bv3"], 1, ScP),
        _pad2(wf1[:pt], PtP, PfP), _pad2(wf1[pt:pt + pa], PaP, PfP),
        _pad2(wf1[pt + pa:], PvP, PfP), _pad2(p["bf1"], 1, PfP),
        _pad2(p["wf2"], PfP, PfP), _pad2(p["bf2"], 1, PfP),
        _pad2(p["wf3"], PfP, ScP), _pad2(p["bf3"], 1, ScP),
        _pad2(p["wtr1"], PtP, PtP), _pad2(p["btr1"], 1, PtP),
        _pad2(p["wtr2"], PtP, TiP), _pad2(p["btr2"], 1, TiP),
        _pad2(p["war1"], PaP, PaP), _pad2(p["bar1"], 1, PaP),
        _pad2(p["war2"], PaP, AiP), _pad2(p["bar2"], 1, AiP),
        _pad2(p["wvr1"], PvP, PvP), _pad2(p["bvr1"], 1, PvP),
        _pad2(p["wvr2"], PvP, ViP), _pad2(p["bvr2"], 1, ViP),
    ]

    def batch_spec(d):                           # batch-tiled (pipelined) arrays
        return pl.BlockSpec((TB, d), lambda i: (i, 0))

    def resident_spec(shape):                    # weights: same block every step
        return pl.BlockSpec(shape, lambda i: (0, 0))

    in_specs = ([batch_spec(ThP), batch_spec(AhP), batch_spec(VhP)]
                + [resident_spec(w.shape) for w in weights])

    out_shape = (
        jax.ShapeDtypeStruct((Bp, ScP), f32),    # T
        jax.ShapeDtypeStruct((Bp, ScP), f32),    # A
        jax.ShapeDtypeStruct((Bp, ScP), f32),    # V
        jax.ShapeDtypeStruct((Bp, ScP), f32),    # M
        jax.ShapeDtypeStruct((Bp, TiP), f32),    # text reconstruction
        jax.ShapeDtypeStruct((Bp, AiP), f32),    # audio reconstruction
        jax.ShapeDtypeStruct((Bp, ViP), f32),    # video reconstruction
    )
    out_specs = (batch_spec(ScP), batch_spec(ScP), batch_spec(ScP), batch_spec(ScP),
                 batch_spec(TiP), batch_spec(AiP), batch_spec(ViP))

    # advisory cost estimate (padded shapes)
    mm = (ThP * PtP + PtP * PtP + PtP * ScP
          + AhP * PaP + PaP * PaP + PaP * ScP
          + VhP * PvP + PvP * PvP + PvP * ScP
          + (PtP + PaP + PvP) * PfP + PfP * PfP + PfP * ScP
          + PtP * PtP + PtP * TiP
          + PaP * PaP + PaP * AiP
          + PvP * PvP + PvP * ViP)
    weight_bytes = 4 * sum(int(w.size) for w in weights)
    io_bytes = 4 * (int(th_p.size) + int(ah_p.size) + int(vh_p.size)
                    + Bp * (4 * ScP + TiP + AiP + ViP))
    cost = pl.CostEstimate(flops=2 * Bp * mm,
                           transcendentals=Bp * ScP,
                           bytes_accessed=weight_bytes + io_bytes)

    t_p, a_p, v_p, m_p, tr_p, ar_p, vr_p = pl.pallas_call(
        v1_semi_kernel,
        out_shape=out_shape,
        grid_spec=pltpu.PrefetchScalarGridSpec(
            num_scalar_prefetch=0,
            grid=(n_blocks,),
            in_specs=in_specs,
            out_specs=out_specs,
        ),
        compiler_params=pltpu.CompilerParams(
            dimension_semantics=("parallel",),   # batch tiles are independent
            vmem_limit_bytes=32 * 1024 * 1024,   # safe on v5e/v6e/v7x
        ),
        cost_estimate=cost,
    )(th_p, ah_p, vh_p, *weights)

    return {
        # 'mix_train' branch: the modality features pass through unchanged
        "Feature_t": text_h,
        "Feature_a": audio_h,
        "Feature_v": video_h,
        "M": m_p[:B, :1],
        "T": t_p[:B, :1],
        "A": a_p[:B, :1],
        "V": v_p[:B, :1],
        # computed (then discarded) by the PyTorch forward; exposed for testing
        "T_rec": tr_p[:B, :ti],
        "A_rec": ar_p[:B, :ai],
        "V_rec": vr_p[:B, :vi],
    }


def init_params(key, *, text_in, audio_in, video_in,
                text_hidden, audio_hidden, video_hidden,
                post_text_dim, post_audio_dim, post_video_dim, post_fusion_dim):
    """PyTorch-Linear-style uniform init; weights stored pre-transposed (in, out)."""
    ks = jax.random.split(key, 18)

    def lin(k, fan_in, fan_out):
        kw, kb = jax.random.split(k)
        bound = 1.0 / (fan_in ** 0.5)
        w = jax.random.uniform(kw, (fan_in, fan_out), jnp.float32, -bound, bound)
        b = jax.random.uniform(kb, (1, fan_out), jnp.float32, -bound, bound)
        return w, b

    p = {}
    p["wt1"], p["bt1"] = lin(ks[0], text_hidden, post_text_dim)
    p["wt2"], p["bt2"] = lin(ks[1], post_text_dim, post_text_dim)
    p["wt3"], p["bt3"] = lin(ks[2], post_text_dim, 1)
    p["wa1"], p["ba1"] = lin(ks[3], 4 * audio_hidden, post_audio_dim)
    p["wa2"], p["ba2"] = lin(ks[4], post_audio_dim, post_audio_dim)
    p["wa3"], p["ba3"] = lin(ks[5], post_audio_dim, 1)
    p["wv1"], p["bv1"] = lin(ks[6], 4 * video_hidden, post_video_dim)
    p["wv2"], p["bv2"] = lin(ks[7], post_video_dim, post_video_dim)
    p["wv3"], p["bv3"] = lin(ks[8], post_video_dim, 1)
    fusion_in = post_text_dim + post_audio_dim + post_video_dim
    p["wf1"], p["bf1"] = lin(ks[9], fusion_in, post_fusion_dim)
    p["wf2"], p["bf2"] = lin(ks[10], post_fusion_dim, post_fusion_dim)
    p["wf3"], p["bf3"] = lin(ks[11], post_fusion_dim, 1)
    p["wtr1"], p["btr1"] = lin(ks[12], post_text_dim, post_text_dim)
    p["wtr2"], p["btr2"] = lin(ks[13], post_text_dim, text_in)
    p["war1"], p["bar1"] = lin(ks[14], post_audio_dim, post_audio_dim)
    p["war2"], p["bar2"] = lin(ks[15], post_audio_dim, audio_in)
    p["wvr1"], p["bvr1"] = lin(ks[16], post_video_dim, post_video_dim)
    p["wvr2"], p["bvr2"] = lin(ks[17], post_video_dim, video_in)
    return p


def v1_semi_reference(text_h, audio_h, video_h, p):
    """Pure-JAX reference mirroring V1_Semi.forward ('mix_train', eval dropout)."""
    relu = jax.nn.relu
    x_t2 = relu(text_h @ p["wt1"] + p["bt1"])
    x_t3 = relu(x_t2 @ p["wt2"] + p["bt2"])
    T = x_t3 @ p["wt3"] + p["bt3"]
    x_a2 = relu(audio_h @ p["wa1"] + p["ba1"])
    x_a3 = relu(x_a2 @ p["wa2"] + p["ba2"])
    A = x_a3 @ p["wa3"] + p["ba3"]
    x_v2 = relu(video_h @ p["wv1"] + p["bv1"])
    x_v3 = relu(x_v2 @ p["wv2"] + p["bv2"])
    V = x_v3 @ p["wv3"] + p["bv3"]
    fusion = jnp.concatenate([x_t2, x_a2, x_v2], axis=1)
    f = fusion @ p["wf1"] + p["bf1"]
    f = f @ p["wf2"] + p["bf2"]
    f = f @ p["wf3"] + p["bf3"]
    M = jax.nn.sigmoid(f) * 6.0 - 3.0
    t_rec = relu(x_t2 @ p["wtr1"] + p["btr1"]) @ p["wtr2"] + p["btr2"]
    a_rec = relu(x_a2 @ p["war1"] + p["bar1"]) @ p["war2"] + p["bar2"]
    v_rec = relu(x_v2 @ p["wvr1"] + p["bvr1"]) @ p["wvr2"] + p["bvr2"]
    return {"Feature_t": text_h, "Feature_a": audio_h, "Feature_v": video_h,
            "M": M, "T": T, "A": A, "V": V,
            "T_rec": t_rec, "A_rec": a_rec, "V_rec": v_rec}


if __name__ == "__main__":
    # small config consistent with the module ('mix_train' branch inputs)
    batch = 8
    text_in, audio_in, video_in = 40, 16, 24                 # args.feature_dims
    text_hidden, audio_hidden, video_hidden = 32, 16, 16     # args.hidden_dims
    post_text_dim, post_audio_dim, post_video_dim = 32, 16, 32
    post_fusion_dim = 64

    key = jax.random.PRNGKey(0)
    kt, ka, kv, kp = jax.random.split(key, 4)
    text_h = jax.random.normal(kt, (batch, text_hidden), jnp.float32)
    audio_h = jax.random.normal(ka, (batch, 4 * audio_hidden), jnp.float32)
    video_h = jax.random.normal(kv, (batch, 4 * video_hidden), jnp.float32)

    params = init_params(
        kp, text_in=text_in, audio_in=audio_in, video_in=video_in,
        text_hidden=text_hidden, audio_hidden=audio_hidden,
        video_hidden=video_hidden, post_text_dim=post_text_dim,
        post_audio_dim=post_audio_dim, post_video_dim=post_video_dim,
        post_fusion_dim=post_fusion_dim)

    out = v1_semi_forward(text_h, audio_h, video_h, params)
    out = jax.block_until_ready(out)

    ref = v1_semi_reference(text_h, audio_h, video_h, params)
    for name in ("M", "T", "A", "V", "T_rec", "A_rec", "V_rec"):
        assert out[name].shape == ref[name].shape, f"shape mismatch for {name}"
        assert jnp.allclose(out[name], ref[name], atol=1e-3, rtol=1e-3), \
            f"value mismatch vs reference for {name}"
    assert jnp.array_equal(out["Feature_t"], text_h)
    assert jnp.array_equal(out["Feature_a"], audio_h)
    assert jnp.array_equal(out["Feature_v"], video_h)

    print("KERNEL_OK")
</pallas_src>

<mosaic_0001>
module attributes {stable_mosaic.version = 11 : i64} {
  func.func @v1_semi_kernel(%arg0: i32, %arg1: memref<8x128xf32, #tpu.memory_space<vmem>>, %arg2: memref<8x128xf32, #tpu.memory_space<vmem>>, %arg3: memref<8x128xf32, #tpu.memory_space<vmem>>, %arg4: memref<128x128xf32, #tpu.memory_space<vmem>>, %arg5: memref<1x128xf32, #tpu.memory_space<vmem>>, %arg6: memref<128x128xf32, #tpu.memory_space<vmem>>, %arg7: memref<1x128xf32, #tpu.memory_space<vmem>>, %arg8: memref<128x128xf32, #tpu.memory_space<vmem>>, %arg9: memref<1x128xf32, #tpu.memory_space<vmem>>, %arg10: memref<128x128xf32, #tpu.memory_space<vmem>>, %arg11: memref<1x128xf32, #tpu.memory_space<vmem>>, %arg12: memref<128x128xf32, #tpu.memory_space<vmem>>, %arg13: memref<1x128xf32, #tpu.memory_space<vmem>>, %arg14: memref<128x128xf32, #tpu.memory_space<vmem>>, %arg15: memref<1x128xf32, #tpu.memory_space<vmem>>, %arg16: memref<128x128xf32, #tpu.memory_space<vmem>>, %arg17: memref<1x128xf32, #tpu.memory_space<vmem>>, %arg18: memref<128x128xf32, #tpu.memory_space<vmem>>, %arg19: memref<1x128xf32, #tpu.memory_space<vmem>>, %arg20: memref<128x128xf32, #tpu.memory_space<vmem>>, %arg21: memref<1x128xf32, #tpu.memory_space<vmem>>, %arg22: memref<128x128xf32, #tpu.memory_space<vmem>>, %arg23: memref<128x128xf32, #tpu.memory_space<vmem>>, %arg24: memref<128x128xf32, #tpu.memory_space<vmem>>, %arg25: memref<1x128xf32, #tpu.memory_space<vmem>>, %arg26: memref<128x128xf32, #tpu.memory_space<vmem>>, %arg27: memref<1x128xf32, #tpu.memory_space<vmem>>, %arg28: memref<128x128xf32, #tpu.memory_space<vmem>>, %arg29: memref<1x128xf32, #tpu.memory_space<vmem>>, %arg30: memref<128x128xf32, #tpu.memory_space<vmem>>, %arg31: memref<1x128xf32, #tpu.memory_space<vmem>>, %arg32: memref<128x128xf32, #tpu.memory_space<vmem>>, %arg33: memref<1x128xf32, #tpu.memory_space<vmem>>, %arg34: memref<128x128xf32, #tpu.memory_space<vmem>>, %arg35: memref<1x128xf32, #tpu.memory_space<vmem>>, %arg36: memref<128x128xf32, #tpu.memory_space<vmem>>, %arg37: memref<1x128xf32, #tpu.memory_space<vmem>>, %arg38: memref<128x128xf32, #tpu.memory_space<vmem>>, %arg39: memref<1x128xf32, #tpu.memory_space<vmem>>, %arg40: memref<128x128xf32, #tpu.memory_space<vmem>>, %arg41: memref<1x128xf32, #tpu.memory_space<vmem>>, %arg42: memref<8x128xf32, #tpu.memory_space<vmem>>, %arg43: memref<8x128xf32, #tpu.memory_space<vmem>>, %arg44: memref<8x128xf32, #tpu.memory_space<vmem>>, %arg45: memref<8x128xf32, #tpu.memory_space<vmem>>, %arg46: memref<8x128xf32, #tpu.memory_space<vmem>>, %arg47: memref<8x128xf32, #tpu.memory_space<vmem>>, %arg48: memref<8x128xf32, #tpu.memory_space<vmem>>) attributes {dimension_semantics = [#tpu.dimension_semantics<parallel>], iteration_bounds = array<i64: 1>, scalar_prefetch = 0 : i64, scratch_operands = 0 : i64, tpu.core_type = #tpu.core_type<tc>, window_params = [{transform_indices = @transform_0, window_bounds = array<i64: 8, 128>}, {transform_indices = @transform_1, window_bounds = array<i64: 8, 128>}, {transform_indices = @transform_2, window_bounds = array<i64: 8, 128>}, {pipeline_mode = #tpu.pipeline_mode<synchronous>, transform_indices = @transform_3, window_bounds = array<i64: 128, 128>}, {pipeline_mode = #tpu.pipeline_mode<synchronous>, transform_indices = @transform_4, window_bounds = array<i64: 1, 128>}, {pipeline_mode = #tpu.pipeline_mode<synchronous>, transform_indices = @transform_5, window_bounds = array<i64: 128, 128>}, {pipeline_mode = #tpu.pipeline_mode<synchronous>, transform_indices = @transform_6, window_bounds = array<i64: 1, 128>}, {pipeline_mode = #tpu.pipeline_mode<synchronous>, transform_indices = @transform_7, window_bounds = array<i64: 128, 128>}, {pipeline_mode = #tpu.pipeline_mode<synchronous>, transform_indices = @transform_8, window_bounds = array<i64: 1, 128>}, {pipeline_mode = #tpu.pipeline_mode<synchronous>, transform_indices = @transform_9, window_bounds = array<i64: 128, 128>}, {pipeline_mode = #tpu.pipeline_mode<synchronous>, transform_indices = @transform_10, window_bounds = array<i64: 1, 128>}, {pipeline_mode = #tpu.pipeline_mode<synchronous>, transform_indices = @transform_11, window_bounds = array<i64: 128, 128>}, {pipeline_mode = #tpu.pipeline_mode<synchronous>, transform_indices = @transform_12, window_bounds = array<i64: 1, 128>}, {pipeline_mode = #tpu.pipeline_mode<synchronous>, transform_indices = @transform_13, window_bounds = array<i64: 128, 128>}, {pipeline_mode = #tpu.pipeline_mode<synchronous>, transform_indices = @transform_14, window_bounds = array<i64: 1, 128>}, {pipeline_mode = #tpu.pipeline_mode<synchronous>, transform_indices = @transform_15, window_bounds = array<i64: 128, 128>}, {pipeline_mode = #tpu.pipeline_mode<synchronous>, transform_indices = @transform_16, window_bounds = array<i64: 1, 128>}, {pipeline_mode = #tpu.pipeline_mode<synchronous>, transform_indices = @transform_17, window_bounds = array<i64: 128, 128>}, {pipeline_mode = #tpu.pipeline_mode<synchronous>, transform_indices = @transform_18, window_bounds = array<i64: 1, 128>}, {pipeline_mode = #tpu.pipeline_mode<synchronous>, transform_indices = @transform_19, window_bounds = array<i64: 128, 128>}, {pipeline_mode = #tpu.pipeline_mode<synchronous>, transform_indices = @transform_20, window_bounds = array<i64: 1, 128>}, {pipeline_mode = #tpu.pipeline_mode<synchronous>, transform_indices = @transform_21, window_bounds = array<i64: 128, 128>}, {pipeline_mode = #tpu.pipeline_mode<synchronous>, transform_indices = @transform_22, window_bounds = array<i64: 128, 128>}, {pipeline_mode = #tpu.pipeline_mode<synchronous>, transform_indices = @transform_23, window_bounds = array<i64: 128, 128>}, {pipeline_mode = #tpu.pipeline_mode<synchronous>, transform_indices = @transform_24, window_bounds = array<i64: 1, 128>}, {pipeline_mode = #tpu.pipeline_mode<synchronous>, transform_indices = @transform_25, window_bounds = array<i64: 128, 128>}, {pipeline_mode = #tpu.pipeline_mode<synchronous>, transform_indices = @transform_26, window_bounds = array<i64: 1, 128>}, {pipeline_mode = #tpu.pipeline_mode<synchronous>, transform_indices = @transform_27, window_bounds = array<i64: 128, 128>}, {pipeline_mode = #tpu.pipeline_mode<synchronous>, transform_indices = @transform_28, window_bounds = array<i64: 1, 128>}, {pipeline_mode = #tpu.pipeline_mode<synchronous>, transform_indices = @transform_29, window_bounds = array<i64: 128, 128>}, {pipeline_mode = #tpu.pipeline_mode<synchronous>, transform_indices = @transform_30, window_bounds = array<i64: 1, 128>}, {pipeline_mode = #tpu.pipeline_mode<synchronous>, transform_indices = @transform_31, window_bounds = array<i64: 128, 128>}, {pipeline_mode = #tpu.pipeline_mode<synchronous>, transform_indices = @transform_32, window_bounds = array<i64: 1, 128>}, {pipeline_mode = #tpu.pipeline_mode<synchronous>, transform_indices = @transform_33, window_bounds = array<i64: 128, 128>}, {pipeline_mode = #tpu.pipeline_mode<synchronous>, transform_indices = @transform_34, window_bounds = array<i64: 1, 128>}, {pipeline_mode = #tpu.pipeline_mode<synchronous>, transform_indices = @transform_35, window_bounds = array<i64: 128, 128>}, {pipeline_mode = #tpu.pipeline_mode<synchronous>, transform_indices = @transform_36, window_bounds = array<i64: 1, 128>}, {pipeline_mode = #tpu.pipeline_mode<synchronous>, transform_indices = @transform_37, window_bounds = array<i64: 128, 128>}, {pipeline_mode = #tpu.pipeline_mode<synchronous>, transform_indices = @transform_38, window_bounds = array<i64: 1, 128>}, {pipeline_mode = #tpu.pipeline_mode<synchronous>, transform_indices = @transform_39, window_bounds = array<i64: 128, 128>}, {pipeline_mode = #tpu.pipeline_mode<synchronous>, transform_indices = @transform_40, window_bounds = array<i64: 1, 128>}, {transform_indices = @transform_41, window_bounds = array<i64: 8, 128>}, {transform_indices = @transform_42, window_bounds = array<i64: 8, 128>}, {transform_indices = @transform_43, window_bounds = array<i64: 8, 128>}, {transform_indices = @transform_44, window_bounds = array<i64: 8, 128>}, {transform_indices = @transform_45, window_bounds = array<i64: 8, 128>}, {transform_indices = @transform_46, window_bounds = array<i64: 8, 128>}, {transform_indices = @transform_47, window_bounds = array<i64: 8, 128>}]} {
    %c0 = arith.constant 0 : index
    %c0_0 = arith.constant 0 : index
    %0 = vector.load %arg1[%c0, %c0_0] : memref<8x128xf32, #tpu.memory_space<vmem>>, vector<8x128xf32>
    %c0_1 = arith.constant 0 : index
    %c0_2 = arith.constant 0 : index
    %1 = vector.load %arg2[%c0_1, %c0_2] : memref<8x128xf32, #tpu.memory_space<vmem>>, vector<8x128xf32>
    %c0_3 = arith.constant 0 : index
    %c0_4 = arith.constant 0 : index
    %2 = vector.load %arg3[%c0_3, %c0_4] : memref<8x128xf32, #tpu.memory_space<vmem>>, vector<8x128xf32>
    %c0_5 = arith.constant 0 : index
    %c0_6 = arith.constant 0 : index
    %3 = vector.load %arg4[%c0_5, %c0_6] : memref<128x128xf32, #tpu.memory_space<vmem>>, vector<128x128xf32>
    %cst = arith.constant dense<0.000000e+00> : vector<8x128xf32>
    %4 = tpu.matmul %0, %3, %cst {dimension_numbers = #tpu.dot_dimension_numbers<[1], [0], [0], [1], [0, 0, 1, 1], [], []>} : vector<8x128xf32>, vector<128x128xf32>, vector<8x128xf32> -> vector<8x128xf32>
    %c0_7 = arith.constant 0 : index
    %c0_8 = arith.constant 0 : index
    %5 = vector.load %arg5[%c0_7, %c0_8] : memref<1x128xf32, #tpu.memory_space<vmem>>, vector<1x128xf32>
    %6 = vector.broadcast %5 : vector<1x128xf32> to vector<8x128xf32>
    %7 = arith.addf %4, %6 : vector<8x128xf32>
    %cst_9 = arith.constant 0.000000e+00 : f32
    %8 = vector.broadcast %cst_9 : f32 to vector<8x128xf32>
    %9 = arith.maximumf %7, %8 : vector<8x128xf32>
    %c0_10 = arith.constant 0 : index
    %c0_11 = arith.constant 0 : index
    %10 = vector.load %arg6[%c0_10, %c0_11] : memref<128x128xf32, #tpu.memory_space<vmem>>, vector<128x128xf32>
    %cst_12 = arith.constant dense<0.000000e+00> : vector<8x128xf32>
    %11 = tpu.matmul %9, %10, %cst_12 {dimension_numbers = #tpu.dot_dimension_numbers<[1], [0], [0], [1], [0, 0, 1, 1], [], []>} : vector<8x128xf32>, vector<128x128xf32>, vector<8x128xf32> -> vector<8x128xf32>
    %c0_13 = arith.constant 0 : index
    %c0_14 = arith.constant 0 : index
    %12 = vector.load %arg7[%c0_13, %c0_14] : memref<1x128xf32, #tpu.memory_space<vmem>>, vector<1x128xf32>
    %13 = vector.broadcast %12 : vector<1x128xf32> to vector<8x128xf32>
    %14 = arith.addf %11, %13 : vector<8x128xf32>
    %cst_15 = arith.constant 0.000000e+00 : f32
    %15 = vector.broadcast %cst_15 : f32 to vector<8x128xf32>
    %16 = arith.maximumf %14, %15 : vector<8x128xf32>
    %c0_16 = arith.constant 0 : index
    %c0_17 = arith.constant 0 : index
    %17 = vector.load %arg8[%c0_16, %c0_17] : memref<128x128xf32, #tpu.memory_space<vmem>>, vector<128x128xf32>
    %cst_18 = arith.constant dense<0.000000e+00> : vector<8x128xf32>
    %18 = tpu.matmul %16, %17, %cst_18 {dimension_numbers = #tpu.dot_dimension_numbers<[1], [0], [0], [1], [0, 0, 1, 1], [], []>} : vector<8x128xf32>, vector<128x128xf32>, vector<8x128xf32> -> vector<8x128xf32>
    %c0_19 = arith.constant 0 : index
    %c0_20 = arith.constant 0 : index
    %19 = vector.load %arg9[%c0_19, %c0_20] : memref<1x128xf32, #tpu.memory_space<vmem>>, vector<1x128xf32>
    %20 = vector.broadcast %19 : vector<1x128xf32> to vector<8x128xf32>
    %21 = arith.addf %18, %20 : vector<8x128xf32>
    %c0_21 = arith.constant 0 : index
    %c0_22 = arith.constant 0 : index
    %22 = vector.load %arg42[%c0_21, %c0_22] : memref<8x128xf32, #tpu.memory_space<vmem>>, vector<8x128xf32>
    tpu.vector_store %arg42[%c0_21, %c0_22], %21 {strides = array<i32>} : memref<8x128xf32, #tpu.memory_space<vmem>>, vector<8x128xf32>,
    %c0_23 = arith.constant 0 : index
    %c0_24 = arith.constant 0 : index
    %23 = vector.load %arg10[%c0_23, %c0_24] : memref<128x128xf32, #tpu.memory_space<vmem>>, vector<128x128xf32>
    %cst_25 = arith.constant dense<0.000000e+00> : vector<8x128xf32>
    %24 = tpu.matmul %1, %23, %cst_25 {dimension_numbers = #tpu.dot_dimension_numbers<[1], [0], [0], [1], [0, 0, 1, 1], [], []>} : vector<8x128xf32>, vector<128x128xf32>, vector<8x128xf32> -> vector<8x128xf32>
    %c0_26 = arith.constant 0 : index
    %c0_27 = arith.constant 0 : index
    %25 = vector.load %arg11[%c0_26, %c0_27] : memref<1x128xf32, #tpu.memory_space<vmem>>, vector<1x128xf32>
    %26 = vector.broadcast %25 : vector<1x128xf32> to vector<8x128xf32>
    %27 = arith.addf %24, %26 : vector<8x128xf32>
    %cst_28 = arith.constant 0.000000e+00 : f32
    %28 = vector.broadcast %cst_28 : f32 to vector<8x128xf32>
    %29 = arith.maximumf %27, %28 : vector<8x128xf32>
    %c0_29 = arith.constant 0 : index
    %c0_30 = arith.constant 0 : index
    %30 = vector.load %arg12[%c0_29, %c0_30] : memref<128x128xf32, #tpu.memory_space<vmem>>, vector<128x128xf32>
    %cst_31 = arith.constant dense<0.000000e+00> : vector<8x128xf32>
    %31 = tpu.matmul %29, %30, %cst_31 {dimension_numbers = #tpu.dot_dimension_numbers<[1], [0], [0], [1], [0, 0, 1, 1], [], []>} : vector<8x128xf32>, vector<128x128xf32>, vector<8x128xf32> -> vector<8x128xf32>
    %c0_32 = arith.constant 0 : index
    %c0_33 = arith.constant 0 : index
    %32 = vector.load %arg13[%c0_32, %c0_33] : memref<1x128xf32, #tpu.memory_space<vmem>>, vector<1x128xf32>
    %33 = vector.broadcast %32 : vector<1x128xf32> to vector<8x128xf32>
    %34 = arith.addf %31, %33 : vector<8x128xf32>
    %cst_34 = arith.constant 0.000000e+00 : f32
    %35 = vector.broadcast %cst_34 : f32 to vector<8x128xf32>
    %36 = arith.maximumf %34, %35 : vector<8x128xf32>
    %c0_35 = arith.constant 0 : index
    %c0_36 = arith.constant 0 : index
    %37 = vector.load %arg14[%c0_35, %c0_36] : memref<128x128xf32, #tpu.memory_space<vmem>>, vector<128x128xf32>
    %cst_37 = arith.constant dense<0.000000e+00> : vector<8x128xf32>
    %38 = tpu.matmul %36, %37, %cst_37 {dimension_numbers = #tpu.dot_dimension_numbers<[1], [0], [0], [1], [0, 0, 1, 1], [], []>} : vector<8x128xf32>, vector<128x128xf32>, vector<8x128xf32> -> vector<8x128xf32>
    %c0_38 = arith.constant 0 : index
    %c0_39 = arith.constant 0 : index
    %39 = vector.load %arg15[%c0_38, %c0_39] : memref<1x128xf32, #tpu.memory_space<vmem>>, vector<1x128xf32>
    %40 = vector.broadcast %39 : vector<1x128xf32> to vector<8x128xf32>
    %41 = arith.addf %38, %40 : vector<8x128xf32>
    %c0_40 = arith.constant 0 : index
    %c0_41 = arith.constant 0 : index
    %42 = vector.load %arg43[%c0_40, %c0_41] : memref<8x128xf32, #tpu.memory_space<vmem>>, vector<8x128xf32>
    tpu.vector_store %arg43[%c0_40, %c0_41], %41 {strides = array<i32>} : memref<8x128xf32, #tpu.memory_space<vmem>>, vector<8x128xf32>,
    %c0_42 = arith.constant 0 : index
    %c0_43 = arith.constant 0 : index
    %43 = vector.load %arg16[%c0_42, %c0_43] : memref<128x128xf32, #tpu.memory_space<vmem>>, vector<128x128xf32>
    %cst_44 = arith.constant dense<0.000000e+00> : vector<8x128xf32>
    %44 = tpu.matmul %2, %43, %cst_44 {dimension_numbers = #tpu.dot_dimension_numbers<[1], [0], [0], [1], [0, 0, 1, 1], [], []>} : vector<8x128xf32>, vector<128x128xf32>, vector<8x128xf32> -> vector<8x128xf32>
    %c0_45 = arith.constant 0 : index
    %c0_46 = arith.constant 0 : index
    %45 = vector.load %arg17[%c0_45, %c0_46] : memref<1x128xf32, #tpu.memory_space<vmem>>, vector<1x128xf32>
    %46 = vector.broadcast %45 : vector<1x128xf32> to vector<8x128xf32>
    %47 = arith.addf %44, %46 : vector<8x128xf32>
    %cst_47 = arith.constant 0.000000e+00 : f32
    %48 = vector.broadcast %cst_47 : f32 to vector<8x128xf32>
    %49 = arith.maximumf %47, %48 : vector<8x128xf32>
    %c0_48 = arith.constant 0 : index
    %c0_49 = arith.constant 0 : index
    %50 = vector.load %arg18[%c0_48, %c0_49] : memref<128x128xf32, #tpu.memory_space<vmem>>, vector<128x128xf32>
    %cst_50 = arith.constant dense<0.000000e+00> : vector<8x128xf32>
    %51 = tpu.matmul %49, %50, %cst_50 {dimension_numbers = #tpu.dot_dimension_numbers<[1], [0], [0], [1], [0, 0, 1, 1], [], []>} : vector<8x128xf32>, vector<128x128xf32>, vector<8x128xf32> -> vector<8x128xf32>
    %c0_51 = arith.constant 0 : index
    %c0_52 = arith.constant 0 : index
    %52 = vector.load %arg19[%c0_51, %c0_52] : memref<1x128xf32, #tpu.memory_space<vmem>>, vector<1x128xf32>
    %53 = vector.broadcast %52 : vector<1x128xf32> to vector<8x128xf32>
    %54 = arith.addf %51, %53 : vector<8x128xf32>
    %cst_53 = arith.constant 0.000000e+00 : f32
    %55 = vector.broadcast %cst_53 : f32 to vector<8x128xf32>
    %56 = arith.maximumf %54, %55 : vector<8x128xf32>
    %c0_54 = arith.constant 0 : index
    %c0_55 = arith.constant 0 : index
    %57 = vector.load %arg20[%c0_54, %c0_55] : memref<128x128xf32, #tpu.memory_space<vmem>>, vector<128x128xf32>
    %cst_56 = arith.constant dense<0.000000e+00> : vector<8x128xf32>
    %58 = tpu.matmul %56, %57, %cst_56 {dimension_numbers = #tpu.dot_dimension_numbers<[1], [0], [0], [1], [0, 0, 1, 1], [], []>} : vector<8x128xf32>, vector<128x128xf32>, vector<8x128xf32> -> vector<8x128xf32>
    %c0_57 = arith.constant 0 : index
    %c0_58 = arith.constant 0 : index
    %59 = vector.load %arg21[%c0_57, %c0_58] : memref<1x128xf32, #tpu.memory_space<vmem>>, vector<1x128xf32>
    %60 = vector.broadcast %59 : vector<1x128xf32> to vector<8x128xf32>
    %61 = arith.addf %58, %60 : vector<8x128xf32>
    %c0_59 = arith.constant 0 : index
    %c0_60 = arith.constant 0 : index
    %62 = vector.load %arg44[%c0_59, %c0_60] : memref<8x128xf32, #tpu.memory_space<vmem>>, vector<8x128xf32>
    tpu.vector_store %arg44[%c0_59, %c0_60], %61 {strides = array<i32>} : memref<8x128xf32, #tpu.memory_space<vmem>>, vector<8x128xf32>,
    %c0_61 = arith.constant 0 : index
    %c0_62 = arith.constant 0 : index
    %63 = vector.load %arg22[%c0_61, %c0_62] : memref<128x128xf32, #tpu.memory_space<vmem>>, vector<128x128xf32>
    %cst_63 = arith.constant dense<0.000000e+00> : vector<8x128xf32>
    %64 = tpu.matmul %9, %63, %cst_63 {dimension_numbers = #tpu.dot_dimension_numbers<[1], [0], [0], [1], [0, 0, 1, 1], [], []>} : vector<8x128xf32>, vector<128x128xf32>, vector<8x128xf32> -> vector<8x128xf32>
    %c0_64 = arith.constant 0 : index
    %c0_65 = arith.constant 0 : index
    %65 = vector.load %arg23[%c0_64, %c0_65] : memref<128x128xf32, #tpu.memory_space<vmem>>, vector<128x128xf32>
    %cst_66 = arith.constant dense<0.000000e+00> : vector<8x128xf32>
    %66 = tpu.matmul %29, %65, %cst_66 {dimension_numbers = #tpu.dot_dimension_numbers<[1], [0], [0], [1], [0, 0, 1, 1], [], []>} : vector<8x128xf32>, vector<128x128xf32>, vector<8x128xf32> -> vector<8x128xf32>
    %67 = arith.addf %64, %66 : vector<8x128xf32>
    %c0_67 = arith.constant 0 : index
    %c0_68 = arith.constant 0 : index
    %68 = vector.load %arg24[%c0_67, %c0_68] : memref<128x128xf32, #tpu.memory_space<vmem>>, vector<128x128xf32>
    %cst_69 = arith.constant dense<0.000000e+00> : vector<8x128xf32>
    %69 = tpu.matmul %49, %68, %cst_69 {dimension_numbers = #tpu.dot_dimension_numbers<[1], [0], [0], [1], [0, 0, 1, 1], [], []>} : vector<8x128xf32>, vector<128x128xf32>, vector<8x128xf32> -> vector<8x128xf32>
    %70 = arith.addf %67, %69 : vector<8x128xf32>
    %c0_70 = arith.constant 0 : index
    %c0_71 = arith.constant 0 : index
    %71 = vector.load %arg25[%c0_70, %c0_71] : memref<1x128xf32, #tpu.memory_space<vmem>>, vector<1x128xf32>
    %72 = vector.broadcast %71 : vector<1x128xf32> to vector<8x128xf32>
    %73 = arith.addf %70, %72 : vector<8x128xf32>
    %c0_72 = arith.constant 0 : index
    %c0_73 = arith.constant 0 : index
    %74 = vector.load %arg26[%c0_72, %c0_73] : memref<128x128xf32, #tpu.memory_space<vmem>>, vector<128x128xf32>
    %cst_74 = arith.constant dense<0.000000e+00> : vector<8x128xf32>
    %75 = tpu.matmul %73, %74, %cst_74 {dimension_numbers = #tpu.dot_dimension_numbers<[1], [0], [0], [1], [0, 0, 1, 1], [], []>} : vector<8x128xf32>, vector<128x128xf32>, vector<8x128xf32> -> vector<8x128xf32>
    %c0_75 = arith.constant 0 : index
    %c0_76 = arith.constant 0 : index
    %76 = vector.load %arg27[%c0_75, %c0_76] : memref<1x128xf32, #tpu.memory_space<vmem>>, vector<1x128xf32>
    %77 = vector.broadcast %76 : vector<1x128xf32> to vector<8x128xf32>
    %78 = arith.addf %75, %77 : vector<8x128xf32>
    %c0_77 = arith.constant 0 : index
    %c0_78 = arith.constant 0 : index
    %79 = vector.load %arg28[%c0_77, %c0_78] : memref<128x128xf32, #tpu.memory_space<vmem>>, vector<128x128xf32>
    %cst_79 = arith.constant dense<0.000000e+00> : vector<8x128xf32>
    %80 = tpu.matmul %78, %79, %cst_79 {dimension_numbers = #tpu.dot_dimension_numbers<[1], [0], [0], [1], [0, 0, 1, 1], [], []>} : vector<8x128xf32>, vector<128x128xf32>, vector<8x128xf32> -> vector<8x128xf32>
    %c0_80 = arith.constant 0 : index
    %c0_81 = arith.constant 0 : index
    %81 = vector.load %arg29[%c0_80, %c0_81] : memref<1x128xf32, #tpu.memory_space<vmem>>, vector<1x128xf32>
    %82 = vector.broadcast %81 : vector<1x128xf32> to vector<8x128xf32>
    %83 = arith.addf %80, %82 : vector<8x128xf32>
    %cst_82 = arith.constant 0.000000e+00 : f32
    %84 = vector.broadcast %cst_82 : f32 to vector<8x128xf32>
    %85 = arith.subf %84, %83 : vector<8x128xf32>
    %86 = math.exp %85 : vector<8x128xf32>
    %cst_83 = arith.constant 1.000000e+00 : f32
    %87 = vector.broadcast %cst_83 : f32 to vector<8x128xf32>
    %88 = arith.addf %87, %86 : vector<8x128xf32>
    %cst_84 = arith.constant 1.000000e+00 : f32
    %89 = vector.broadcast %cst_84 : f32 to vector<8x128xf32>
    %90 = arith.divf %89, %88 : vector<8x128xf32>
    %cst_85 = arith.constant 6.000000e+00 : f32
    %91 = vector.broadcast %cst_85 : f32 to vector<8x128xf32>
    %92 = arith.mulf %90, %91 : vector<8x128xf32>
    %cst_86 = arith.constant 3.000000e+00 : f32
    %93 = vector.broadcast %cst_86 : f32 to vector<8x128xf32>
    %94 = arith.subf %92, %93 : vector<8x128xf32>
    %c0_87 = arith.constant 0 : index
    %c0_88 = arith.constant 0 : index
    %95 = vector.load %arg45[%c0_87, %c0_88] : memref<8x128xf32, #tpu.memory_space<vmem>>, vector<8x128xf32>
    tpu.vector_store %arg45[%c0_87, %c0_88], %94 {strides = array<i32>} : memref<8x128xf32, #tpu.memory_space<vmem>>, vector<8x128xf32>,
    %c0_89 = arith.constant 0 : index
    %c0_90 = arith.constant 0 : index
    %96 = vector.load %arg30[%c0_89, %c0_90] : memref<128x128xf32, #tpu.memory_space<vmem>>, vector<128x128xf32>
    %cst_91 = arith.constant dense<0.000000e+00> : vector<8x128xf32>
    %97 = tpu.matmul %9, %96, %cst_91 {dimension_numbers = #tpu.dot_dimension_numbers<[1], [0], [0], [1], [0, 0, 1, 1], [], []>} : vector<8x128xf32>, vector<128x128xf32>, vector<8x128xf32> -> vector<8x128xf32>
    %c0_92 = arith.constant 0 : index
    %c0_93 = arith.constant 0 : index
    %98 = vector.load %arg31[%c0_92, %c0_93] : memref<1x128xf32, #tpu.memory_space<vmem>>, vector<1x128xf32>
    %99 = vector.broadcast %98 : vector<1x128xf32> to vector<8x128xf32>
    %100 = arith.addf %97, %99 : vector<8x128xf32>
    %cst_94 = arith.constant 0.000000e+00 : f32
    %101 = vector.broadcast %cst_94 : f32 to vector<8x128xf32>
    %102 = arith.maximumf %100, %101 : vector<8x128xf32>
    %c0_95 = arith.constant 0 : index
    %c0_96 = arith.constant 0 : index
    %103 = vector.load %arg32[%c0_95, %c0_96] : memref<128x128xf32, #tpu.memory_space<vmem>>, vector<128x128xf32>
    %cst_97 = arith.constant dense<0.000000e+00> : vector<8x128xf32>
    %104 = tpu.matmul %102, %103, %cst_97 {dimension_numbers = #tpu.dot_dimension_numbers<[1], [0], [0], [1], [0, 0, 1, 1], [], []>} : vector<8x128xf32>, vector<128x128xf32>, vector<8x128xf32> -> vector<8x128xf32>
    %c0_98 = arith.constant 0 : index
    %c0_99 = arith.constant 0 : index
    %105 = vector.load %arg33[%c0_98, %c0_99] : memref<1x128xf32, #tpu.memory_space<vmem>>, vector<1x128xf32>
    %106 = vector.broadcast %105 : vector<1x128xf32> to vector<8x128xf32>
    %107 = arith.addf %104, %106 : vector<8x128xf32>
    %c0_100 = arith.constant 0 : index
    %c0_101 = arith.constant 0 : index
    %108 = vector.load %arg46[%c0_100, %c0_101] : memref<8x128xf32, #tpu.memory_space<vmem>>, vector<8x128xf32>
    tpu.vector_store %arg46[%c0_100, %c0_101], %107 {strides = array<i32>} : memref<8x128xf32, #tpu.memory_space<vmem>>, vector<8x128xf32>,
    %c0_102 = arith.constant 0 : index
    %c0_103 = arith.constant 0 : index
    %109 = vector.load %arg34[%c0_102, %c0_103] : memref<128x128xf32, #tpu.memory_space<vmem>>, vector<128x128xf32>
    %cst_104 = arith.constant dense<0.000000e+00> : vector<8x128xf32>
    %110 = tpu.matmul %29, %109, %cst_104 {dimension_numbers = #tpu.dot_dimension_numbers<[1], [0], [0], [1], [0, 0, 1, 1], [], []>} : vector<8x128xf32>, vector<128x128xf32>, vector<8x128xf32> -> vector<8x128xf32>
    %c0_105 = arith.constant 0 : index
    %c0_106 = arith.constant 0 : index
    %111 = vector.load %arg35[%c0_105, %c0_106] : memref<1x128xf32, #tpu.memory_space<vmem>>, vector<1x128xf32>
    %112 = vector.broadcast %111 : vector<1x128xf32> to vector<8x128xf32>
    %113 = arith.addf %110, %112 : vector<8x128xf32>
    %cst_107 = arith.constant 0.000000e+00 : f32
    %114 = vector.broadcast %cst_107 : f32 to vector<8x128xf32>
    %115 = arith.maximumf %113, %114 : vector<8x128xf32>
    %c0_108 = arith.constant 0 : index
    %c0_109 = arith.constant 0 : index
    %116 = vector.load %arg36[%c0_108, %c0_109] : memref<128x128xf32, #tpu.memory_space<vmem>>, vector<128x128xf32>
    %cst_110 = arith.constant dense<0.000000e+00> : vector<8x128xf32>
    %117 = tpu.matmul %115, %116, %cst_110 {dimension_numbers = #tpu.dot_dimension_numbers<[1], [0], [0], [1], [0, 0, 1, 1], [], []>} : vector<8x128xf32>, vector<128x128xf32>, vector<8x128xf32> -> vector<8x128xf32>
    %c0_111 = arith.constant 0 : index
    %c0_112 = arith.constant 0 : index
    %118 = vector.load %arg37[%c0_111, %c0_112] : memref<1x128xf32, #tpu.memory_space<vmem>>, vector<1x128xf32>
    %119 = vector.broadcast %118 : vector<1x128xf32> to vector<8x128xf32>
    %120 = arith.addf %117, %119 : vector<8x128xf32>
    %c0_113 = arith.constant 0 : index
    %c0_114 = arith.constant 0 : index
    %121 = vector.load %arg47[%c0_113, %c0_114] : memref<8x128xf32, #tpu.memory_space<vmem>>, vector<8x128xf32>
    tpu.vector_store %arg47[%c0_113, %c0_114], %120 {strides = array<i32>} : memref<8x128xf32, #tpu.memory_space<vmem>>, vector<8x128xf32>,
    %c0_115 = arith.constant 0 : index
    %c0_116 = arith.constant 0 : index
    %122 = vector.load %arg38[%c0_115, %c0_116] : memref<128x128xf32, #tpu.memory_space<vmem>>, vector<128x128xf32>
    %cst_117 = arith.constant dense<0.000000e+00> : vector<8x128xf32>
    %123 = tpu.matmul %49, %122, %cst_117 {dimension_numbers = #tpu.dot_dimension_numbers<[1], [0], [0], [1], [0, 0, 1, 1], [], []>} : vector<8x128xf32>, vector<128x128xf32>, vector<8x128xf32> -> vector<8x128xf32>
    %c0_118 = arith.constant 0 : index
    %c0_119 = arith.constant 0 : index
    %124 = vector.load %arg39[%c0_118, %c0_119] : memref<1x128xf32, #tpu.memory_space<vmem>>, vector<1x128xf32>
    %125 = vector.broadcast %124 : vector<1x128xf32> to vector<8x128xf32>
    %126 = arith.addf %123, %125 : vector<8x128xf32>
    %cst_120 = arith.constant 0.000000e+00 : f32
    %127 = vector.broadcast %cst_120 : f32 to vector<8x128xf32>
    %128 = arith.maximumf %126, %127 : vector<8x128xf32>
    %c0_121 = arith.constant 0 : index
    %c0_122 = arith.constant 0 : index
    %129 = vector.load %arg40[%c0_121, %c0_122] : memref<128x128xf32, #tpu.memory_space<vmem>>, vector<128x128xf32>
    %cst_123 = arith.constant dense<0.000000e+00> : vector<8x128xf32>
    %130 = tpu.matmul %128, %129, %cst_123 {dimension_numbers = #tpu.dot_dimension_numbers<[1], [0], [0], [1], [0, 0, 1, 1], [], []>} : vector<8x128xf32>, vector<128x128xf32>, vector<8x128xf32> -> vector<8x128xf32>
    %c0_124 = arith.constant 0 : index
    %c0_125 = arith.constant 0 : index
    %131 = vector.load %arg41[%c0_124, %c0_125] : memref<1x128xf32, #tpu.memory_space<vmem>>, vector<1x128xf32>
    %132 = vector.broadcast %131 : vector<1x128xf32> to vector<8x128xf32>
    %133 = arith.addf %130, %132 : vector<8x128xf32>
    %c0_126 = arith.constant 0 : index
    %c0_127 = arith.constant 0 : index
    %134 = vector.load %arg48[%c0_126, %c0_127] : memref<8x128xf32, #tpu.memory_space<vmem>>, vector<8x128xf32>
    tpu.vector_store %arg48[%c0_126, %c0_127], %133 {strides = array<i32>} : memref<8x128xf32, #tpu.memory_space<vmem>>, vector<8x128xf32>,
    return
  }
  func.func @transform_0(%arg0: i32) -> (i32, i32) {
    %c0_i32 = arith.constant 0 : i32
    %c0_i32_0 = arith.constant 0 : i32
    return %arg0, %c0_i32 : i32, i32
  }
  func.func @transform_1(%arg0: i32) -> (i32, i32) {
    %c0_i32 = arith.constant 0 : i32
    %c0_i32_0 = arith.constant 0 : i32
    return %arg0, %c0_i32 : i32, i32
  }
  func.func @transform_2(%arg0: i32) -> (i32, i32) {
    %c0_i32 = arith.constant 0 : i32
    %c0_i32_0 = arith.constant 0 : i32
    return %arg0, %c0_i32 : i32, i32
  }
  func.func @transform_3(%arg0: i32) -> (i32, i32) {
    %c0_i32 = arith.constant 0 : i32
    %c0_i32_0 = arith.constant 0 : i32
    %c0_i32_1 = arith.constant 0 : i32
    return %c0_i32, %c0_i32_0 : i32, i32
  }
  func.func @transform_4(%arg0: i32) -> (i32, i32) {
    %c0_i32 = arith.constant 0 : i32
    %c0_i32_0 = arith.constant 0 : i32
    %c0_i32_1 = arith.constant 0 : i32
    return %c0_i32, %c0_i32_0 : i32, i32
  }
  func.func @transform_5(%arg0: i32) -> (i32, i32) {
    %c0_i32 = arith.constant 0 : i32
    %c0_i32_0 = arith.constant 0 : i32
    %c0_i32_1 = arith.constant 0 : i32
    return %c0_i32, %c0_i32_0 : i32, i32
  }
  func.func @transform_6(%arg0: i32) -> (i32, i32) {
    %c0_i32 = arith.constant 0 : i32
    %c0_i32_0 = arith.constant 0 : i32
    %c0_i32_1 = arith.constant 0 : i32
    return %c0_i32, %c0_i32_0 : i32, i32
  }
  func.func @transform_7(%arg0: i32) -> (i32, i32) {
    %c0_i32 = arith.constant 0 : i32
    %c0_i32_0 = arith.constant 0 : i32
    %c0_i32_1 = arith.constant 0 : i32
    return %c0_i32, %c0_i32_0 : i32, i32
  }
  func.func @transform_8(%arg0: i32) -> (i32, i32) {
    %c0_i32 = arith.constant 0 : i32
    %c0_i32_0 = arith.constant 0 : i32
    %c0_i32_1 = arith.constant 0 : i32
    return %c0_i32, %c0_i32_0 : i32, i32
  }
  func.func @transform_9(%arg0: i32) -> (i32, i32) {
    %c0_i32 = arith.constant 0 : i32
    %c0_i32_0 = arith.constant 0 : i32
    %c0_i32_1 = arith.constant 0 : i32
    return %c0_i32, %c0_i32_0 : i32, i32
  }
  func.func @transform_10(%arg0: i32) -> (i32, i32) {
    %c0_i32 = arith.constant 0 : i32
    %c0_i32_0 = arith.constant 0 : i32
    %c0_i32_1 = arith.constant 0 : i32
    return %c0_i32, %c0_i32_0 : i32, i32
  }
  func.func @transform_11(%arg0: i32) -> (i32, i32) {
    %c0_i32 = arith.constant 0 : i32
    %c0_i32_0 = arith.constant 0 : i32
    %c0_i32_1 = arith.constant 0 : i32
    return %c0_i32, %c0_i32_0 : i32, i32
  }
  func.func @transform_12(%arg0: i32) -> (i32, i32) {
    %c0_i32 = arith.constant 0 : i32
    %c0_i32_0 = arith.constant 0 : i32
    %c0_i32_1 = arith.constant 0 : i32
    return %c0_i32, %c0_i32_0 : i32, i32
  }
  func.func @transform_13(%arg0: i32) -> (i32, i32) {
    %c0_i32 = arith.constant 0 : i32
    %c0_i32_0 = arith.constant 0 : i32
    %c0_i32_1 = arith.constant 0 : i32
    return %c0_i32, %c0_i32_0 : i32, i32
  }
  func.func @transform_14(%arg0: i32) -> (i32, i32) {
    %c0_i32 = arith.constant 0 : i32
    %c0_i32_0 = arith.constant 0 : i32
    %c0_i32_1 = arith.constant 0 : i32
    return %c0_i32, %c0_i32_0 : i32, i32
  }
  func.func @transform_15(%arg0: i32) -> (i32, i32) {
    %c0_i32 = arith.constant 0 : i32
    %c0_i32_0 = arith.constant 0 : i32
    %c0_i32_1 = arith.constant 0 : i32
    return %c0_i32, %c0_i32_0 : i32, i32
  }
  func.func @transform_16(%arg0: i32) -> (i32, i32) {
    %c0_i32 = arith.constant 0 : i32
    %c0_i32_0 = arith.constant 0 : i32
    %c0_i32_1 = arith.constant 0 : i32
    return %c0_i32, %c0_i32_0 : i32, i32
  }
  func.func @transform_17(%arg0: i32) -> (i32, i32) {
    %c0_i32 = arith.constant 0 : i32
    %c0_i32_0 = arith.constant 0 : i32
    %c0_i32_1 = arith.constant 0 : i32
    return %c0_i32, %c0_i32_0 : i32, i32
  }
  func.func @transform_18(%arg0: i32) -> (i32, i32) {
    %c0_i32 = arith.constant 0 : i32
    %c0_i32_0 = arith.constant 0 : i32
    %c0_i32_1 = arith.constant 0 : i32
    return %c0_i32, %c0_i32_0 : i32, i32
  }
  func.func @transform_19(%arg0: i32) -> (i32, i32) {
    %c0_i32 = arith.constant 0 : i32
    %c0_i32_0 = arith.constant 0 : i32
    %c0_i32_1 = arith.constant 0 : i32
    return %c0_i32, %c0_i32_0 : i32, i32
  }
  func.func @transform_20(%arg0: i32) -> (i32, i32) {
    %c0_i32 = arith.constant 0 : i32
    %c0_i32_0 = arith.constant 0 : i32
    %c0_i32_1 = arith.constant 0 : i32
    return %c0_i32, %c0_i32_0 : i32, i32
  }
  func.func @transform_21(%arg0: i32) -> (i32, i32) {
    %c0_i32 = arith.constant 0 : i32
    %c0_i32_0 = arith.constant 0 : i32
    %c0_i32_1 = arith.constant 0 : i32
    return %c0_i32, %c0_i32_0 : i32, i32
  }
  func.func @transform_22(%arg0: i32) -> (i32, i32) {
    %c0_i32 = arith.constant 0 : i32
    %c0_i32_0 = arith.constant 0 : i32
    %c0_i32_1 = arith.constant 0 : i32
    return %c0_i32, %c0_i32_0 : i32, i32
  }
  func.func @transform_23(%arg0: i32) -> (i32, i32) {
    %c0_i32 = arith.constant 0 : i32
    %c0_i32_0 = arith.constant 0 : i32
    %c0_i32_1 = arith.constant 0 : i32
    return %c0_i32, %c0_i32_0 : i32, i32
  }
  func.func @transform_24(%arg0: i32) -> (i32, i32) {
    %c0_i32 = arith.constant 0 : i32
    %c0_i32_0 = arith.constant 0 : i32
    %c0_i32_1 = arith.constant 0 : i32
    return %c0_i32, %c0_i32_0 : i32, i32
  }
  func.func @transform_25(%arg0: i32) -> (i32, i32) {
    %c0_i32 = arith.constant 0 : i32
    %c0_i32_0 = arith.constant 0 : i32
    %c0_i32_1 = arith.constant 0 : i32
    return %c0_i32, %c0_i32_0 : i32, i32
  }
  func.func @transform_26(%arg0: i32) -> (i32, i32) {
    %c0_i32 = arith.constant 0 : i32
    %c0_i32_0 = arith.constant 0 : i32
    %c0_i32_1 = arith.constant 0 : i32
    return %c0_i32, %c0_i32_0 : i32, i32
  }
  func.func @transform_27(%arg0: i32) -> (i32, i32) {
    %c0_i32 = arith.constant 0 : i32
    %c0_i32_0 = arith.constant 0 : i32
    %c0_i32_1 = arith.constant 0 : i32
    return %c0_i32, %c0_i32_0 : i32, i32
  }
  func.func @transform_28(%arg0: i32) -> (i32, i32) {
    %c0_i32 = arith.constant 0 : i32
    %c0_i32_0 = arith.constant 0 : i32
    %c0_i32_1 = arith.constant 0 : i32
    return %c0_i32, %c0_i32_0 : i32, i32
  }
  func.func @transform_29(%arg0: i32) -> (i32, i32) {
    %c0_i32 = arith.constant 0 : i32
    %c0_i32_0 = arith.constant 0 : i32
    %c0_i32_1 = arith.constant 0 : i32
    return %c0_i32, %c0_i32_0 : i32, i32
  }
  func.func @transform_30(%arg0: i32) -> (i32, i32) {
    %c0_i32 = arith.constant 0 : i32
    %c0_i32_0 = arith.constant 0 : i32
    %c0_i32_1 = arith.constant 0 : i32
    return %c0_i32, %c0_i32_0 : i32, i32
  }
  func.func @transform_31(%arg0: i32) -> (i32, i32) {
    %c0_i32 = arith.constant 0 : i32
    %c0_i32_0 = arith.constant 0 : i32
    %c0_i32_1 = arith.constant 0 : i32
    return %c0_i32, %c0_i32_0 : i32, i32
  }
  func.func @transform_32(%arg0: i32) -> (i32, i32) {
    %c0_i32 = arith.constant 0 : i32
    %c0_i32_0 = arith.constant 0 : i32
    %c0_i32_1 = arith.constant 0 : i32
    return %c0_i32, %c0_i32_0 : i32, i32
  }
  func.func @transform_33(%arg0: i32) -> (i32, i32) {
    %c0_i32 = arith.constant 0 : i32
    %c0_i32_0 = arith.constant 0 : i32
    %c0_i32_1 = arith.constant 0 : i32
    return %c0_i32, %c0_i32_0 : i32, i32
  }
  func.func @transform_34(%arg0: i32) -> (i32, i32) {
    %c0_i32 = arith.constant 0 : i32
    %c0_i32_0 = arith.constant 0 : i32
    %c0_i32_1 = arith.constant 0 : i32
    return %c0_i32, %c0_i32_0 : i32, i32
  }
  func.func @transform_35(%arg0: i32) -> (i32, i32) {
    %c0_i32 = arith.constant 0 : i32
    %c0_i32_0 = arith.constant 0 : i32
    %c0_i32_1 = arith.constant 0 : i32
    return %c0_i32, %c0_i32_0 : i32, i32
  }
  func.func @transform_36(%arg0: i32) -> (i32, i32) {
    %c0_i32 = arith.constant 0 : i32
    %c0_i32_0 = arith.constant 0 : i32
    %c0_i32_1 = arith.constant 0 : i32
    return %c0_i32, %c0_i32_0 : i32, i32
  }
  func.func @transform_37(%arg0: i32) -> (i32, i32) {
    %c0_i32 = arith.constant 0 : i32
    %c0_i32_0 = arith.constant 0 : i32
    %c0_i32_1 = arith.constant 0 : i32
    return %c0_i32, %c0_i32_0 : i32, i32
  }
  func.func @transform_38(%arg0: i32) -> (i32, i32) {
    %c0_i32 = arith.constant 0 : i32
    %c0_i32_0 = arith.constant 0 : i32
    %c0_i32_1 = arith.constant 0 : i32
    return %c0_i32, %c0_i32_0 : i32, i32
  }
  func.func @transform_39(%arg0: i32) -> (i32, i32) {
    %c0_i32 = arith.constant 0 : i32
    %c0_i32_0 = arith.constant 0 : i32
    %c0_i32_1 = arith.constant 0 : i32
    return %c0_i32, %c0_i32_0 : i32, i32
  }
  func.func @transform_40(%arg0: i32) -> (i32, i32) {
    %c0_i32 = arith.constant 0 : i32
    %c0_i32_0 = arith.constant 0 : i32
    %c0_i32_1 = arith.constant 0 : i32
    return %c0_i32, %c0_i32_0 : i32, i32
  }
  func.func @transform_41(%arg0: i32) -> (i32, i32) {
    %c0_i32 = arith.constant 0 : i32
    %c0_i32_0 = arith.constant 0 : i32
    return %arg0, %c0_i32 : i32, i32
  }
  func.func @transform_42(%arg0: i32) -> (i32, i32) {
    %c0_i32 = arith.constant 0 : i32
    %c0_i32_0 = arith.constant 0 : i32
    return %arg0, %c0_i32 : i32, i32
  }
  func.func @transform_43(%arg0: i32) -> (i32, i32) {
    %c0_i32 = arith.constant 0 : i32
    %c0_i32_0 = arith.constant 0 : i32
    return %arg0, %c0_i32 : i32, i32
  }
  func.func @transform_44(%arg0: i32) -> (i32, i32) {
    %c0_i32 = arith.constant 0 : i32
    %c0_i32_0 = arith.constant 0 : i32
    return %arg0, %c0_i32 : i32, i32
  }
  func.func @transform_45(%arg0: i32) -> (i32, i32) {
    %c0_i32 = arith.constant 0 : i32
    %c0_i32_0 = arith.constant 0 : i32
    return %arg0, %c0_i32 : i32, i32
  }
  func.func @transform_46(%arg0: i32) -> (i32, i32) {
    %c0_i32 = arith.constant 0 : i32
    %c0_i32_0 = arith.constant 0 : i32
    return %arg0, %c0_i32 : i32, i32
  }
  func.func @transform_47(%arg0: i32) -> (i32, i32) {
    %c0_i32 = arith.constant 0 : i32
    %c0_i32_0 = arith.constant 0 : i32
    return %arg0, %c0_i32 : i32, i32
  }
}

</mosaic_0001>

<bundles_post_ra>
// kernel: tpu_custom_call.1
= control target key start
LH: loop header
LB: loop body
LE: loop exit
PB: predicated region body
PF: predicated region fallthrough
CT: control target
= control target key end

     0   :  { %s5196_s6 = smov 1   ;;  %s5197_s10 = smov 2   ;;  %s6064_s0 = inlined_call_operand.smem [shape: u32[48], index: -1, kind: input, shape index: {}] }
   0x1   :  { %s5296_s5 = sld [smem:[%s6064_s0]]   ;;  %s5198_s14 = smov 3  }
   0x2   :  { %s5301_s9 = sld [smem:[%s6064_s0 + %s5196_s6]]   ;;  %s5199_s18 = smov 4  }
   0x3   :  { %s5306_s13 = sld [smem:[%s6064_s0 + %s5197_s10]]   ;;  %s5200_s22 = smov 5  }
   0x4   :  { %s5311_s17 = sld [smem:[%s6064_s0 + %s5198_s14]]   ;;  %s5201_s26 = smov 6  }
   0x5   :  { %s5316_s21 = sld [smem:[%s6064_s0 + %s5199_s18]]   ;;  %s5202_s30 = smov 7  }
   0x6   :  { %s5321_s25 = sld [smem:[%s6064_s0 + %s5200_s22]]   ;;  %s5203_s4 = smov 8  }
   0x7   :  { %6088 = sst [smem:[#allocation84_spill]] %s5296_s5  ;;  %s5204_s10 = smov 9  }
   0x8   :  { %s5326_s29 = sld [smem:[%s6064_s0 + %s5201_s26]]   ;;  %s5205_s15 = smov 10  }
   0x9   :  { %6089 = sst [smem:[#allocation85_spill]] %s5306_s13  ;;  %s5206_s20 = smov 11  }
   0xa   :  { %s5331_s3 = sld [smem:[%s6064_s0 + %s5202_s30]]   ;;  %s5207_s26 = smov 12  }
   0xb   :  { %6090 = sst [smem:[#allocation86_spill]] %s5316_s21  ;;  %s5208_s1 = smov 13  }
   0xc   :  { %6091 = sst [smem:[#allocation87_spill]] %s5321_s25  ;;  %s5209_s7 = smov 14  }
   0xd   :  { %s5336_s8 = sld [smem:[%s6064_s0 + %s5203_s4]]   ;;  %s5211_s22 = smov 16  }
   0xe   :  { %6092 = sst [smem:[#allocation88_spill]] %s5326_s29  ;;  %s5212_s28 = smov 17  }
   0xf   :  { %s5341_s14 = sld [smem:[%s6064_s0 + %s5204_s10]]  }
  0x10   :  { %s5346_s19 = sld [smem:[%s6064_s0 + %s5205_s15]]   ;;  %s5210_s15 = smov 15  }
  0x11   :  { %s5351_s24 = sld [smem:[%s6064_s0 + %s5206_s20]]  }
  0x12   :  { %s5356_s30 = sld [smem:[%s6064_s0 + %s5207_s26]]  }
  0x13   :  { %6093 = sst [smem:[#allocation89_spill]] %s5336_s8 }
  0x14   :  { %s5361_s6 = sld [smem:[%s6064_s0 + %s5208_s1]]  }
  0x15   :  { %6094 = sst [smem:[#allocation90_spill]] %s5341_s14 }
  0x16   :  { %6095 = sst [smem:[#allocation91_spill]] %s5346_s19 }
  0x17   :  { %s5366_s12 = sld [smem:[%s6064_s0 + %s5209_s7]]   ;;  %s5213_s7 = smov 18  }
  0x18   :  { %6096 = sst [smem:[#allocation92_spill]] %s5356_s30 }
  0x19   :  { %s5371_s20 = sld [smem:[%s6064_s0 + %s5210_s15]]   ;;  %s5214_s15 = smov 19  }
  0x1a   :  { %s5376_s27 = sld [smem:[%s6064_s0 + %s5211_s22]]   ;;  %s5215_s22 = smov 20  }
  0x1b   :  { %s5381_s4 = sld [smem:[%s6064_s0 + %s5212_s28]]   ;;  %s5216_s28 = smov 21  }
  0x1c   :  { %s5386_s8 = sld [smem:[%s6064_s0 + %s5213_s7]]   ;;  %s5217_s7 = smov 22  }
  0x1d   :  { %6097 = sst [smem:[#allocation93_spill]] %s5366_s12 }
  0x1e   :  { %s5391_s19 = sld [smem:[%s6064_s0 + %s5214_s15]]   ;;  %s5218_s15 = smov 23  }
  0x1f   :  { %s5396_s29 = sld [smem:[%s6064_s0 + %s5215_s22]]   ;;  %s5219_s22 = smov 24  }
  0x20   :  { %6098 = sst [smem:[#allocation94_spill]] %s5376_s27 }
  0x21   :  { %s5401_s21 = sld [smem:[%s6064_s0 + %s5216_s28]]   ;;  %s5220_s28 = smov 25  }
  0x22   :  { %6099 = sst [smem:[#allocation95_spill]] %s5386_s8 }
  0x23   :  { %s5406_s8 = sld [smem:[%s6064_s0 + %s5217_s7]]   ;;  %s5221_s7 = smov 26  }
  0x24   :  { %s5411_s27 = sld [smem:[%s6064_s0 + %s5218_s15]]   ;;  %s5222_s15 = smov 27  }
  0x25   :  { %6100 = sst [smem:[#allocation96_spill]] %s5396_s29 }
  0x26   :  { %s5416_s29 = sld [smem:[%s6064_s0 + %s5219_s22]]   ;;  %s5223_s22 = smov 28  }
  0x27   :  { %s5421_s12 = sld [smem:[%s6064_s0 + %s5220_s28]]   ;;  %s5224_s28 = smov 29  }
  0x28   :  { %s5431_s30 = sld [smem:[%s6064_s0 + %s5222_s15]]   ;;  %s5226_s15 = smov 31  }
  0x29   :  { %6101 = sst [smem:[#allocation97_spill]] %s5406_s8 }
  0x2a   :  { %s5426_s8 = sld [smem:[%s6064_s0 + %s5221_s7]]   ;;  %s5225_s7 = smov 30  }
  0x2b   :  { %s5441_s14 = sld [smem:[%s6064_s0 + %s5224_s28]]   ;;  %s5228_s28 = smov 33  }
  0x2c   :  { %6102 = sst [smem:[#allocation98_spill]] %s5416_s29 }
  0x2d   :  { %s5436_s29 = sld [smem:[%s6064_s0 + %s5223_s22]]   ;;  %s5227_s22 = smov 32  }
  0x2e   :  { %s5451_s25 = sld [smem:[%s6064_s0 + %s5226_s15]]   ;;  %s5230_s15 = smov 35  }
  0x2f   :  { %s5461_s13 = sld [smem:[%s6064_s0 + %s5228_s28]]   ;;  %s5232_s28 = smov 37  }
  0x30   :  { %6103 = sst [smem:[#allocation99_spill]] %s5426_s8 }
  0x31   :  { %s5446_s8 = sld [smem:[%s6064_s0 + %s5225_s7]]   ;;  %s5229_s7 = smov 34  }
  0x32   :  { %s5471_s5 = sld [smem:[%s6064_s0 + %s5230_s15]]   ;;  %s5234_s15 = smov 39  }
  0x33   :  { %6104 = sst [smem:[#allocation100_spill]] %s5436_s29 }
  0x34   :  { %s5456_s29 = sld [smem:[%s6064_s0 + %s5227_s22]]   ;;  %s5231_s22 = smov 36  }
  0x35   :  { %6107 = sst [smem:[#allocation103_spill]] %s5461_s13 }
  0x36   :  { %s5481_s13 = sld [smem:[%s6064_s0 + %s5232_s28]]   ;;  %s5236_s28 = smov 41  }
  0x37   :  { %6105 = sst [smem:[#allocation101_spill]] %s5446_s8 }
  0x38   :  { %s5466_s8 = sld [smem:[%s6064_s0 + %s5229_s7]]   ;;  %s5233_s7 = smov 38  }
  0x39   :  { %6109 = sst [smem:[#allocation105_spill]] %s5471_s5 }
  0x3a   :  { %6106 = sst [smem:[#allocation102_spill]] %s5456_s29 }
  0x3b   :  { %s5476_s29 = sld [smem:[%s6064_s0 + %s5231_s22]]   ;;  %s5235_s22 = smov 40  }
  0x3c   :  { %6111 = sst [smem:[#allocation107_spill]] %s5481_s13 }
  0x3d   :  { %s5491_s5 = sld [smem:[%s6064_s0 + %s5234_s15]]   ;;  %s5238_s15 = smov 43  }
  0x3e   :  { %6108 = sst [smem:[#allocation104_spill]] %s5466_s8 }
  0x3f   :  { %s5486_s8 = sld [smem:[%s6064_s0 + %s5233_s7]]   ;;  %s5237_s7 = smov 42  }
  0x40   :  { %s5501_s13 = sld [smem:[%s6064_s0 + %s5236_s28]]   ;;  %s5240_s28 = smov 45  }
  0x41   :  { %6110 = sst [smem:[#allocation106_spill]] %s5476_s29 }
  0x42   :  { %s5496_s29 = sld [smem:[%s6064_s0 + %s5235_s22]]   ;;  %s5239_s22 = smov 44  }
  0x43   :  { %6113 = sst [smem:[#allocation109_spill]] %s5491_s5 }
  0x44   :  { %s5511_s5 = sld [smem:[%s6064_s0 + %s5238_s15]]   ;;  %s5242_s15 = smov 47  }
  0x45   :  { %6112 = sst [smem:[#allocation108_spill]] %s5486_s8 }
  0x46   :  { %6115 = sst [smem:[#allocation111_spill]] %s5501_s13 }
  0x47   :  { %s5506_s8 = sld [smem:[%s6064_s0 + %s5237_s7]]   ;;  %s5241_s7 = smov 46  }
  0x48   :  { %6114 = sst [smem:[#allocation110_spill]] %s5496_s29 }
  0x49   :  { %s5516_s29 = sld [smem:[%s6064_s0 + %s5239_s22]]  }
  0x4a   :  { %6117 = sst [smem:[#allocation113_spill]] %s5511_s5 }
  0x4b   :  { %s5521_s13 = sld [smem:[%s6064_s0 + %s5240_s28]]  }
  0x4c   :  { %s5531_s5 = sld [smem:[%s6064_s0 + %s5242_s15]]  }
  0x4d   :  { %6116 = sst [smem:[#allocation112_spill]] %s5506_s8 }
  0x4e   :  { %s5526_s8 = sld [smem:[%s6064_s0 + %s5241_s7]]  }
  0x4f   :  { %101 = vsyncpa [#allocation3], 0 }
  0x50   :  { %102 = vsyncpa [#allocation6], 0 }
  0x51   :  { %103 = vsyncpa [#allocation9], 0 }
  0x52   :  { %104 = vsyncpa [#allocation12], 0 }
  0x53   :  { %105 = vsyncpa [#allocation15], 0 }
  0x54   :  { %106 = vsyncpa [#allocation18], 0 }
  0x55   :  { %107 = vsyncpa [#allocation21], 0 }
  0x56   :  { %108 = vsyncpa [#allocation24], 0 }
  0x57   :  { %109 = vsyncpa [#allocation27], 0 }
  0x58   :  { %110 = vsyncpa [#allocation30], 0 }
  0x59   :  { %111 = vsyncpa [#allocation33], 0 }
  0x5a   :  { %112 = vsyncpa [#allocation36], 0 }
  0x5b   :  { %113 = vsyncpa [#allocation39], 0 }
  0x5c   :  { %114 = vsyncpa [#allocation42], 0 }
  0x5d   :  { %115 = vsyncpa [#allocation45], 0 }
  0x5e   :  { %116 = vsyncpa [#allocation48], 0 }
  0x5f   :  { %117 = vsyncpa [#allocation51], 0 }
  0x60   :  { %118 = vsyncpa [#allocation4], 0 }
  0x61   :  { %119 = vsyncpa [#allocation55], 0 }
  0x62   :  { %120 = vsyncpa [#allocation58], 0 }
  0x63   :  { %121 = vsyncpa [#allocation61], 0  ;;  %s5243_s0 = smov [#allocation5]   ;;  %s5244_s23 = smov [#allocation8]  }
  0x64   :  { %s138_s22 = sshll.u32 %s5243_s0, 4  ;;  %s157_s26 = sshll.u32 %s5244_s23, 4  ;;  %s139_s22 = int_to_ptr.vmem [resolvable:$true] %s138_s22  ;;  %s5533_s26 = int_to_ptr.vmem [resolvable:$true] %s157_s26 }
  0x65   :  { %s4274_s28 = scalar_lea.hbm %s5301_s9, 128 }
  0x66   :  { %p4275_p0 = scmp.ne.s32.totalorder %s5301_s9, %s4274_s28  ;;  %p4278_p1 = scmp.lt.u32.totalorder %s4274_s28, %s5301_s9 }
  0x68   :  { %p4280_p2 = pnand %p4278_p1, %p4275_p0 }
  0x6a   :  { %4283 = shalt.err (!%p4280_p2)
}
  0x6b   :  { %s4284_s1 = scalar_lea.vmem %s139_s22, 128  ;;  %p4289_p4 = scmp.lt.s32.totalorder %s139_s22, %s139_s22 }
  0x6c   :  { %p4285_p3 = scmp.ne.s32.totalorder %s139_s22, %s4284_s1  ;;  %p4290_p5 = scmp.lt.s32.totalorder %s4284_s1, %s4284_s1 }
  0x6e   :  { %p4291_p6 = por %p4290_p5, %p4289_p4 }
  0x70   :  { %p4292_p7 = pnand %p4291_p6, %p4285_p3 }
  0x72   :  { %4295 = shalt.err (!%p4292_p7)
}
  0x73   :  { %141 = dma.hbm_to_vmem [thread:$0]  %s5301_s9, 128, %s139_s22, [#allocation6]  }
  0x74   :  { %s4296_s2 = scalar_lea.hbm %s5311_s17, 2048 }
  0x75   :  { %p4297_p8 = scmp.ne.s32.totalorder %s5311_s17, %s4296_s2  ;;  %p4300_p9 = scmp.lt.u32.totalorder %s4296_s2, %s5311_s17 }
  0x77   :  { %p4302_p10 = pnand %p4300_p9, %p4297_p8 }
  0x79   :  { %4305 = shalt.err (!%p4302_p10)
}
  0x7a   :  { %s4306_s7 = scalar_lea.vmem %s5533_s26, 2048  ;;  %p4311_p12 = scmp.lt.s32.totalorder %s5533_s26, %s5533_s26 }
  0x7b   :  { %p4307_p11 = scmp.ne.s32.totalorder %s5533_s26, %s4306_s7  ;;  %p4312_p13 = scmp.lt.s32.totalorder %s4306_s7, %s4306_s7 }
  0x7d   :  { %p4313_p0 = por %p4312_p13, %p4311_p12 }
  0x7f   :  { %p4314_p1 = pnand %p4313_p0, %p4307_p11 }
  0x81   :  { %4317 = shalt.err (!%p4314_p1)
}
  0x82   :  { %s5245_s10 = smov 128   ;;  %s5246_s9 = smov 8  }
  0x83   :  { %163 = dma.hbm_to_vmem [thread:$0]  %s5311_s17, 2048, %s5533_s26, [#allocation9], %s5245_s10, %s5245_s10, %s5246_s9  }
  0x84   :  { %s5247_s11 = smov [#allocation11]   ;;  %s5248_s16 = smov [#allocation14]  }
  0x85   :  { %s185_s15 = sshll.u32 %s5247_s11, 4  ;;  %s213_s18 = sshll.u32 %s5248_s16, 4  ;;  %s186_s15 = int_to_ptr.vmem [resolvable:$true] %s185_s15  ;;  %s5551_s18 = int_to_ptr.vmem [resolvable:$true] %s213_s18 }
  0x86   :  { %s4318_s0 = scalar_lea.hbm %s5331_s3, 2048 }
  0x87   :  { %p4319_p2 = scmp.ne.s32.totalorder %s5331_s3, %s4318_s0  ;;  %p4322_p3 = scmp.lt.u32.totalorder %s4318_s0, %s5331_s3 }
  0x89   :  { %p4324_p4 = pnand %p4322_p3, %p4319_p2 }
  0x8b   :  { %4327 = shalt.err (!%p4324_p4)
}
  0x8c   :  { %s4328_s22 = scalar_lea.vmem %s186_s15, 2048  ;;  %p4333_p6 = scmp.lt.s32.totalorder %s186_s15, %s186_s15 }
  0x8d   :  { %p4329_p5 = scmp.ne.s32.totalorder %s186_s15, %s4328_s22  ;;  %p4334_p7 = scmp.lt.s32.totalorder %s4328_s22, %s4328_s22 }
  0x8f   :  { %p4335_p8 = por %p4334_p7, %p4333_p6 }
  0x91   :  { %p4336_p9 = pnand %p4335_p8, %p4329_p5 }
  0x93   :  { %4339 = shalt.err (!%p4336_p9)
}
  0x94   :  { %191 = dma.hbm_to_vmem [thread:$0]  %s5331_s3, 2048, %s186_s15, [#allocation12], %s5245_s10, %s5245_s10, %s5246_s9  }
  0x95   :  { %s4340_s17 = scalar_lea.hbm %s5351_s24, 2048 }
  0x96   :  { %p4341_p10 = scmp.ne.s32.totalorder %s5351_s24, %s4340_s17  ;;  %p4344_p11 = scmp.lt.u32.totalorder %s4340_s17, %s5351_s24 }
  0x98   :  { %p4346_p12 = pnand %p4344_p11, %p4341_p10 }
  0x9a   :  { %4349 = shalt.err (!%p4346_p12)
}
  0x9b   :  { %s4350_s23 = scalar_lea.vmem %s5551_s18, 2048  ;;  %p4355_p0 = scmp.lt.s32.totalorder %s5551_s18, %s5551_s18 }
  0x9c   :  { %p4351_p13 = scmp.ne.s32.totalorder %s5551_s18, %s4350_s23  ;;  %p4356_p1 = scmp.lt.s32.totalorder %s4350_s23, %s4350_s23 }
  0x9e   :  { %p4357_p2 = por %p4356_p1, %p4355_p0 }
  0xa0   :  { %p4358_p3 = pnand %p4357_p2, %p4351_p13 }
  0xa2   :  { %4361 = shalt.err (!%p4358_p3)
}
  0xa3   :  { %219 = dma.hbm_to_vmem [thread:$0]  %s5351_s24, 2048, %s5551_s18, [#allocation15], %s5245_s10, %s5245_s10, %s5246_s9  }
  0xa4   :  { %s5249_s3 = smov [#allocation17]   ;;  %s5250_s28 = smov [#allocation20]  }
  0xa5   :  { %s235_s26 = sshll.u32 %s5249_s3, 4  ;;  %s257_s1 = sshll.u32 %s5250_s28, 4  ;;  %s236_s26 = int_to_ptr.vmem [resolvable:$true] %s235_s26  ;;  %s5572_s1 = int_to_ptr.vmem [resolvable:$true] %s257_s1 }
  0xa6   :  { %s4362_s2 = scalar_lea.hbm %s5361_s6, 2048 }
  0xa7   :  { %p4363_p4 = scmp.ne.s32.totalorder %s5361_s6, %s4362_s2  ;;  %p4366_p5 = scmp.lt.u32.totalorder %s4362_s2, %s5361_s6 }
  0xa9   :  { %p4368_p6 = pnand %p4366_p5, %p4363_p4 }
  0xab   :  { %4371 = shalt.err (!%p4368_p6)
}
  0xac   :  { %s4372_s7 = scalar_lea.vmem %s236_s26, 2048  ;;  %p4377_p8 = scmp.lt.s32.totalorder %s236_s26, %s236_s26 }
  0xad   :  { %p4373_p7 = scmp.ne.s32.totalorder %s236_s26, %s4372_s7  ;;  %p4378_p9 = scmp.lt.s32.totalorder %s4372_s7, %s4372_s7 }
  0xaf   :  { %p4379_p10 = por %p4378_p9, %p4377_p8 }
  0xb1   :  { %p4380_p11 = pnand %p4379_p10, %p4373_p7 }
  0xb3   :  { %4383 = shalt.err (!%p4380_p11)
}
  0xb4   :  { %241 = dma.hbm_to_vmem [thread:$0]  %s5361_s6, 2048, %s236_s26, [#allocation18], %s5245_s10, %s5245_s10, %s5246_s9  }
  0xb5   :  { %s4384_s24 = scalar_lea.hbm %s5371_s20, 2048 }
  0xb6   :  { %p4385_p12 = scmp.ne.s32.totalorder %s5371_s20, %s4384_s24  ;;  %p4388_p13 = scmp.lt.u32.totalorder %s4384_s24, %s5371_s20 }
  0xb8   :  { %p4390_p0 = pnand %p4388_p13, %p4385_p12 }
  0xba   :  { %4393 = shalt.err (!%p4390_p0)
}
  0xbb   :  { %s4394_s11 = scalar_lea.vmem %s5572_s1, 2048  ;;  %p4399_p2 = scmp.lt.s32.totalorder %s5572_s1, %s5572_s1 }
  0xbc   :  { %p4395_p1 = scmp.ne.s32.totalorder %s5572_s1, %s4394_s11  ;;  %p4400_p3 = scmp.lt.s32.totalorder %s4394_s11, %s4394_s11 }
  0xbe   :  { %p4401_p4 = por %p4400_p3, %p4399_p2 }
  0xc0   :  { %p4402_p5 = pnand %p4401_p4, %p4395_p1 }
  0xc2   :  { %4405 = shalt.err (!%p4402_p5)
}
  0xc3   :  { %263 = dma.hbm_to_vmem [thread:$0]  %s5371_s20, 2048, %s5572_s1, [#allocation21], %s5245_s10, %s5245_s10, %s5246_s9  }
  0xc4   :  { %s5251_s6 = smov [#allocation23]   ;;  %s5252_s16 = smov [#allocation26]  }
  0xc5   :  { %s279_s15 = sshll.u32 %s5251_s6, 4  ;;  %s301_s18 = sshll.u32 %s5252_s16, 4  ;;  %s280_s15 = int_to_ptr.vmem [resolvable:$true] %s279_s15  ;;  %s5593_s18 = int_to_ptr.vmem [resolvable:$true] %s301_s18 }
  0xc6   :  { %s4406_s0 = scalar_lea.hbm %s5381_s4, 2048 }
  0xc7   :  { %p4407_p6 = scmp.ne.s32.totalorder %s5381_s4, %s4406_s0  ;;  %p4410_p7 = scmp.lt.u32.totalorder %s4406_s0, %s5381_s4 }
  0xc9   :  { %p4412_p8 = pnand %p4410_p7, %p4407_p6 }
  0xcb   :  { %4415 = shalt.err (!%p4412_p8)
}
  0xcc   :  { %s4416_s22 = scalar_lea.vmem %s280_s15, 2048  ;;  %p4421_p10 = scmp.lt.s32.totalorder %s280_s15, %s280_s15 }
  0xcd   :  { %p4417_p9 = scmp.ne.s32.totalorder %s280_s15, %s4416_s22  ;;  %p4422_p11 = scmp.lt.s32.totalorder %s4416_s22, %s4416_s22 }
  0xcf   :  { %p4423_p12 = por %p4422_p11, %p4421_p10 }
  0xd1   :  { %p4424_p13 = pnand %p4423_p12, %p4417_p9 }
  0xd3   :  { %4427 = shalt.err (!%p4424_p13)
}
  0xd4   :  { %285 = dma.hbm_to_vmem [thread:$0]  %s5381_s4, 2048, %s280_s15, [#allocation24], %s5245_s10, %s5245_s10, %s5246_s9  }
  0xd5   :  { %s4428_s20 = scalar_lea.hbm %s5391_s19, 2048 }
  0xd6   :  { %p4429_p0 = scmp.ne.s32.totalorder %s5391_s19, %s4428_s20  ;;  %p4432_p1 = scmp.lt.u32.totalorder %s4428_s20, %s5391_s19 }
  0xd8   :  { %p4434_p2 = pnand %p4432_p1, %p4429_p0 }
  0xda   :  { %4437 = shalt.err (!%p4434_p2)
}
  0xdb   :  { %s4438_s17 = scalar_lea.vmem %s5593_s18, 2048  ;;  %p4443_p4 = scmp.lt.s32.totalorder %s5593_s18, %s5593_s18 }
  0xdc   :  { %p4439_p3 = scmp.ne.s32.totalorder %s5593_s18, %s4438_s17  ;;  %p4444_p5 = scmp.lt.s32.totalorder %s4438_s17, %s4438_s17 }
  0xde   :  { %p4445_p6 = por %p4444_p5, %p4443_p4 }
  0xe0   :  { %p4446_p7 = pnand %p4445_p6, %p4439_p3 }
  0xe2   :  { %4449 = shalt.err (!%p4446_p7)
}
  0xe3   :  { %307 = dma.hbm_to_vmem [thread:$0]  %s5391_s19, 2048, %s5593_s18, [#allocation27], %s5245_s10, %s5245_s10, %s5246_s9  }
  0xe4   :  { %s5253_s4 = smov [#allocation29]   ;;  %s5254_s3 = smov [#allocation32]  }
  0xe5   :  { %s323_s23 = sshll.u32 %s5253_s4, 4  ;;  %s347_s26 = sshll.u32 %s5254_s3, 4  ;;  %s324_s23 = int_to_ptr.vmem [resolvable:$true] %s323_s23  ;;  %s5614_s26 = int_to_ptr.vmem [resolvable:$true] %s347_s26 }
  0xe6   :  { %s4450_s28 = scalar_lea.hbm %s5401_s21, 2048 }
  0xe7   :  { %p4451_p8 = scmp.ne.s32.totalorder %s5401_s21, %s4450_s28  ;;  %p4454_p9 = scmp.lt.u32.totalorder %s4450_s28, %s5401_s21 }
  0xe9   :  { %p4456_p10 = pnand %p4454_p9, %p4451_p8 }
  0xeb   :  { %4459 = shalt.err (!%p4456_p10)
}
  0xec   :  { %s4460_s1 = scalar_lea.vmem %s324_s23, 2048  ;;  %p4465_p12 = scmp.lt.s32.totalorder %s324_s23, %s324_s23 }
  0xed   :  { %p4461_p11 = scmp.ne.s32.totalorder %s324_s23, %s4460_s1  ;;  %p4466_p13 = scmp.lt.s32.totalorder %s4460_s1, %s4460_s1 }
  0xef   :  { %p4467_p0 = por %p4466_p13, %p4465_p12 }
  0xf1   :  { %p4468_p1 = pnand %p4467_p0, %p4461_p11 }
  0xf3   :  { %4471 = shalt.err (!%p4468_p1)
}
  0xf4   :  { %329 = dma.hbm_to_vmem [thread:$0]  %s5401_s21, 2048, %s324_s23, [#allocation30], %s5245_s10, %s5245_s10, %s5246_s9  }
  0xf5   :  { %s4472_s19 = scalar_lea.hbm %s5411_s27, 2048 }
  0xf6   :  { %p4473_p2 = scmp.ne.s32.totalorder %s5411_s27, %s4472_s19  ;;  %p4476_p3 = scmp.lt.u32.totalorder %s4472_s19, %s5411_s27 }
  0xf8   :  { %p4478_p4 = pnand %p4476_p3, %p4473_p2 }
  0xfa   :  { %4481 = shalt.err (!%p4478_p4)
}
  0xfb   :  { %s4482_s2 = scalar_lea.vmem %s5614_s26, 2048  ;;  %p4487_p6 = scmp.lt.s32.totalorder %s5614_s26, %s5614_s26 }
  0xfc   :  { %p4483_p5 = scmp.ne.s32.totalorder %s5614_s26, %s4482_s2  ;;  %p4488_p7 = scmp.lt.s32.totalorder %s4482_s2, %s4482_s2 }
  0xfe   :  { %p4489_p8 = por %p4488_p7, %p4487_p6 }
 0x100   :  { %p4490_p9 = pnand %p4489_p8, %p4483_p5 }
 0x102   :  { %4493 = shalt.err (!%p4490_p9)
}
 0x103   :  { %353 = dma.hbm_to_vmem [thread:$0]  %s5411_s27, 2048, %s5614_s26, [#allocation33], %s5245_s10, %s5245_s10, %s5246_s9  }
 0x104   :  { %s5255_s21 = smov [#allocation35]   ;;  %s5256_s24 = smov [#allocation38]  }
 0x105   :  { %s369_s7 = sshll.u32 %s5255_s21, 4  ;;  %s391_s11 = sshll.u32 %s5256_s24, 4  ;;  %s370_s7 = int_to_ptr.vmem [resolvable:$true] %s369_s7  ;;  %s5635_s11 = int_to_ptr.vmem [resolvable:$true] %s391_s11 }
 0x106   :  { %s4494_s6 = scalar_lea.hbm %s5421_s12, 2048 }
 0x107   :  { %p4495_p10 = scmp.ne.s32.totalorder %s5421_s12, %s4494_s6  ;;  %p4498_p11 = scmp.lt.u32.totalorder %s4494_s6, %s5421_s12 }
 0x109   :  { %p4500_p12 = pnand %p4498_p11, %p4495_p10 }
 0x10b   :  { %4503 = shalt.err (!%p4500_p12)
}
 0x10c   :  { %s4504_s15 = scalar_lea.vmem %s370_s7, 2048  ;;  %p4509_p0 = scmp.lt.s32.totalorder %s370_s7, %s370_s7 }
 0x10d   :  { %p4505_p13 = scmp.ne.s32.totalorder %s370_s7, %s4504_s15  ;;  %p4510_p1 = scmp.lt.s32.totalorder %s4504_s15, %s4504_s15 }
 0x10f   :  { %p4511_p2 = por %p4510_p1, %p4509_p0 }
 0x111   :  { %p4512_p3 = pnand %p4511_p2, %p4505_p13 }
 0x113   :  { %4515 = shalt.err (!%p4512_p3)
}
 0x114   :  { %375 = dma.hbm_to_vmem [thread:$0]  %s5421_s12, 2048, %s370_s7, [#allocation36], %s5245_s10, %s5245_s10, %s5246_s9  }
 0x115   :  { %s4516_s27 = scalar_lea.hbm %s5431_s30, 2048 }
 0x116   :  { %p4517_p4 = scmp.ne.s32.totalorder %s5431_s30, %s4516_s27  ;;  %p4520_p5 = scmp.lt.u32.totalorder %s4516_s27, %s5431_s30 }
 0x118   :  { %p4522_p6 = pnand %p4520_p5, %p4517_p4 }
 0x11a   :  { %4525 = shalt.err (!%p4522_p6)
}
 0x11b   :  { %s4526_s16 = scalar_lea.vmem %s5635_s11, 2048  ;;  %p4531_p8 = scmp.lt.s32.totalorder %s5635_s11, %s5635_s11 }
 0x11c   :  { %p4527_p7 = scmp.ne.s32.totalorder %s5635_s11, %s4526_s16  ;;  %p4532_p9 = scmp.lt.s32.totalorder %s4526_s16, %s4526_s16 }
 0x11e   :  { %p4533_p10 = por %p4532_p9, %p4531_p8 }
 0x120   :  { %p4534_p11 = pnand %p4533_p10, %p4527_p7 }
 0x122   :  { %4537 = shalt.err (!%p4534_p11)
}
 0x123   :  { %397 = dma.hbm_to_vmem [thread:$0]  %s5431_s30, 2048, %s5635_s11, [#allocation39], %s5245_s10, %s5245_s10, %s5246_s9  }
 0x124   :  { %s5257_s12 = smov [#allocation41]   ;;  %s5258_s0 = smov [#allocation44]  }
 0x125   :  { %s413_s18 = sshll.u32 %s5257_s12, 4  ;;  %s435_s22 = sshll.u32 %s5258_s0, 4  ;;  %s414_s18 = int_to_ptr.vmem [resolvable:$true] %s413_s18  ;;  %s5656_s22 = int_to_ptr.vmem [resolvable:$true] %s435_s22 }
 0x126   :  { %s4538_s20 = scalar_lea.hbm %s5441_s14, 2048 }
 0x127   :  { %p4539_p12 = scmp.ne.s32.totalorder %s5441_s14, %s4538_s20  ;;  %p4542_p13 = scmp.lt.u32.totalorder %s4538_s20, %s5441_s14 }
 0x129   :  { %p4544_p0 = pnand %p4542_p13, %p4539_p12 }
 0x12b   :  { %4547 = shalt.err (!%p4544_p0)
}
 0x12c   :  { %s4548_s17 = scalar_lea.vmem %s414_s18, 2048  ;;  %p4553_p2 = scmp.lt.s32.totalorder %s414_s18, %s414_s18 }
 0x12d   :  { %p4549_p1 = scmp.ne.s32.totalorder %s414_s18, %s4548_s17  ;;  %p4554_p3 = scmp.lt.s32.totalorder %s4548_s17, %s4548_s17 }
 0x12f   :  { %p4555_p4 = por %p4554_p3, %p4553_p2 }
 0x131   :  { %p4556_p5 = pnand %p4555_p4, %p4549_p1 }
 0x133   :  { %4559 = shalt.err (!%p4556_p5)
}
 0x134   :  { %419 = dma.hbm_to_vmem [thread:$0]  %s5441_s14, 2048, %s414_s18, [#allocation42], %s5245_s10, %s5245_s10, %s5246_s9  }
 0x135   :  { %s4560_s30 = scalar_lea.hbm %s5451_s25, 2048 }
 0x136   :  { %p4561_p6 = scmp.ne.s32.totalorder %s5451_s25, %s4560_s30  ;;  %p4564_p7 = scmp.lt.u32.totalorder %s4560_s30, %s5451_s25 }
 0x138   :  { %p4566_p8 = pnand %p4564_p7, %p4561_p6 }
 0x13a   :  { %4569 = shalt.err (!%p4566_p8)
}
 0x13b   :  { %s4570_s4 = scalar_lea.vmem %s5656_s22, 2048  ;;  %p4575_p10 = scmp.lt.s32.totalorder %s5656_s22, %s5656_s22 }
 0x13c   :  { %p4571_p9 = scmp.ne.s32.totalorder %s5656_s22, %s4570_s4  ;;  %p4576_p11 = scmp.lt.s32.totalorder %s4570_s4, %s4570_s4 }
 0x13e   :  { %p4577_p12 = por %p4576_p11, %p4575_p10 }
 0x140   :  { %p4578_p13 = pnand %p4577_p12, %p4571_p9 }
 0x142   :  { %4581 = shalt.err (!%p4578_p13)
}
 0x143   :  { %s6118_s14 = sld [smem:[#allocation103_spill]]  ;;  %s5259_s23 = smov [#allocation47]  }
 0x144   :  { %441 = dma.hbm_to_vmem [thread:$0]  %s5451_s25, 2048, %s5656_s22, [#allocation45], %s5245_s10, %s5245_s10, %s5246_s9  }
 0x145   :  { %s457_s3 = sshll.u32 %s5259_s23, 4  ;;  %s5260_s26 = smov [#allocation50]   ;;  %s458_s3 = int_to_ptr.vmem [resolvable:$true] %s457_s3 }
 0x146   :  { %s483_s28 = sshll.u32 %s5260_s26, 4  ;;  %s5677_s28 = int_to_ptr.vmem [resolvable:$true] %s483_s28 }
 0x149   :  { %s4582_s1 = scalar_lea.hbm %s6118_s14, 2048 }
 0x14a   :  { %p4583_p0 = scmp.ne.s32.totalorder %s6118_s14, %s4582_s1  ;;  %p4586_p1 = scmp.lt.u32.totalorder %s4582_s1, %s6118_s14 }
 0x14c   :  { %p4588_p2 = pnand %p4586_p1, %p4583_p0 }
 0x14e   :  { %4591 = shalt.err (!%p4588_p2)
}
 0x14f   :  { %s4592_s19 = scalar_lea.vmem %s458_s3, 2048  ;;  %p4597_p4 = scmp.lt.s32.totalorder %s458_s3, %s458_s3 }
 0x150   :  { %p4593_p3 = scmp.ne.s32.totalorder %s458_s3, %s4592_s19  ;;  %p4598_p5 = scmp.lt.s32.totalorder %s4592_s19, %s4592_s19 }
 0x152   :  { %p4599_p6 = por %p4598_p5, %p4597_p4 }
 0x154   :  { %p4600_p7 = pnand %p4599_p6, %p4593_p3 }
 0x156   :  { %4603 = shalt.err (!%p4600_p7)
}
 0x157   :  { %s6119_s25 = sld [smem:[#allocation107_spill]] }
 0x158   :  { %463 = dma.hbm_to_vmem [thread:$0]  %s6118_s14, 2048, %s458_s3, [#allocation48], %s5245_s10, %s5245_s10, %s5246_s9  }
 0x15d   :  { %s4604_s2 = scalar_lea.hbm %s6119_s25, 2048 }
 0x15e   :  { %p4605_p8 = scmp.ne.s32.totalorder %s6119_s25, %s4604_s2  ;;  %p4608_p9 = scmp.lt.u32.totalorder %s4604_s2, %s6119_s25 }
 0x160   :  { %p4610_p10 = pnand %p4608_p9, %p4605_p8 }
 0x162   :  { %4613 = shalt.err (!%p4610_p10)
}
 0x163   :  { %s4614_s21 = scalar_lea.vmem %s5677_s28, 2048  ;;  %p4619_p12 = scmp.lt.s32.totalorder %s5677_s28, %s5677_s28 }
 0x164   :  { %p4615_p11 = scmp.ne.s32.totalorder %s5677_s28, %s4614_s21  ;;  %p4620_p13 = scmp.lt.s32.totalorder %s4614_s21, %s4614_s21 }
 0x166   :  { %p4621_p0 = por %p4620_p13, %p4619_p12 }
 0x168   :  { %p4622_p1 = pnand %p4621_p0, %p4615_p11 }
 0x16a   :  { %4625 = shalt.err (!%p4622_p1)
}
 0x16b   :  { %s6120_s7 = sld [smem:[#allocation84_spill]]  ;;  %s5261_s24 = smov [#allocation2]  }
 0x16c   :  { %489 = dma.hbm_to_vmem [thread:$0]  %s6119_s25, 2048, %s5677_s28, [#allocation51], %s5245_s10, %s5245_s10, %s5246_s9  }
 0x16d   :  { %s128_s11 = sshll.u32 %s5261_s24, 4  ;;  %s5262_s6 = smov [#allocation7]   ;;  %s129_s11 = int_to_ptr.vmem [resolvable:$true] %s128_s11 }
 0x16e   :  { %s148_s15 = sshll.u32 %s5262_s6, 4  ;;  %s149_s15 = int_to_ptr.vmem [resolvable:$true] %s148_s15 }
 0x171   :  { %s4626_s27 = scalar_lea.hbm %s6120_s7, 128 }
 0x172   :  { %p4627_p2 = scmp.ne.s32.totalorder %s6120_s7, %s4626_s27  ;;  %p4630_p3 = scmp.lt.u32.totalorder %s4626_s27, %s6120_s7 }
 0x174   :  { %p4632_p4 = pnand %p4630_p3, %p4627_p2 }
 0x176   :  { %4635 = shalt.err (!%p4632_p4)
}
 0x177   :  { %s4636_s16 = scalar_lea.vmem %s129_s11, 128  ;;  %p4641_p6 = scmp.lt.s32.totalorder %s129_s11, %s129_s11 }
 0x178   :  { %p4637_p5 = scmp.ne.s32.totalorder %s129_s11, %s4636_s16  ;;  %p4642_p7 = scmp.lt.s32.totalorder %s4636_s16, %s4636_s16 }
 0x17a   :  { %p4643_p8 = por %p4642_p7, %p4641_p6 }
 0x17c   :  { %p4644_p9 = pnand %p4643_p8, %p4637_p5 }
 0x17e   :  { %4647 = shalt.err (!%p4644_p9)
}
 0x17f   :  { %s6121_s12 = sld [smem:[#allocation85_spill]] }
 0x180   :  { %131 = dma.hbm_to_vmem [thread:$0]  %s6120_s7, 128, %s129_s11, [#allocation3]  }
 0x185   :  { %s4648_s18 = scalar_lea.hbm %s6121_s12, 128 }
 0x186   :  { %p4649_p10 = scmp.ne.s32.totalorder %s6121_s12, %s4648_s18  ;;  %p4652_p11 = scmp.lt.u32.totalorder %s4648_s18, %s6121_s12 }
 0x188   :  { %p4654_p12 = pnand %p4652_p11, %p4649_p10 }
 0x18a   :  { %4657 = shalt.err (!%p4654_p12)
}
 0x18b   :  { %s4658_s0 = scalar_lea.vmem %s149_s15, 128  ;;  %p4663_p0 = scmp.lt.s32.totalorder %s149_s15, %s149_s15 }
 0x18c   :  { %p4659_p13 = scmp.ne.s32.totalorder %s149_s15, %s4658_s0  ;;  %p4664_p1 = scmp.lt.s32.totalorder %s4658_s0, %s4658_s0 }
 0x18e   :  { %p4665_p2 = por %p4664_p1, %p4663_p0 }
 0x190   :  { %p4666_p3 = pnand %p4665_p2, %p4659_p13 }
 0x192   :  { %4669 = shalt.err (!%p4666_p3)
}
 0x193   :  { %s6122_s22 = sld [smem:[#allocation87_spill]]  ;;  %s5263_s20 = smov [#allocation10]  }
 0x194   :  { %151 = dma.hbm_to_vmem [thread:$0]  %s6121_s12, 128, %s149_s15, [#allocation6]  }
 0x195   :  { %s171_s17 = sshll.u32 %s5263_s20, 4  ;;  %s5264_s30 = smov [#allocation13]   ;;  %s172_s17 = int_to_ptr.vmem [resolvable:$true] %s171_s17 }
 0x196   :  { %s199_s4 = sshll.u32 %s5264_s30, 4  ;;  %s5706_s4 = int_to_ptr.vmem [resolvable:$true] %s199_s4 }
 0x199   :  { %s4670_s14 = scalar_lea.hbm %s6122_s22, 2048 }
 0x19a   :  { %p4671_p4 = scmp.ne.s32.totalorder %s6122_s22, %s4670_s14  ;;  %p4674_p5 = scmp.lt.u32.totalorder %s4670_s14, %s6122_s22 }
 0x19c   :  { %p4676_p6 = pnand %p4674_p5, %p4671_p4 }
 0x19e   :  { %4679 = shalt.err (!%p4676_p6)
}
 0x19f   :  { %s4680_s23 = scalar_lea.vmem %s172_s17, 2048  ;;  %p4685_p8 = scmp.lt.s32.totalorder %s172_s17, %s172_s17 }
 0x1a0   :  { %p4681_p7 = scmp.ne.s32.totalorder %s172_s17, %s4680_s23  ;;  %p4686_p9 = scmp.lt.s32.totalorder %s4680_s23, %s4680_s23 }
 0x1a2   :  { %p4687_p10 = por %p4686_p9, %p4685_p8 }
 0x1a4   :  { %p4688_p11 = pnand %p4687_p10, %p4681_p7 }
 0x1a6   :  { %4691 = shalt.err (!%p4688_p11)
}
 0x1a7   :  { %s6123_s3 = sld [smem:[#allocation90_spill]] }
 0x1a8   :  { %177 = dma.hbm_to_vmem [thread:$0]  %s6122_s22, 2048, %s172_s17, [#allocation9], %s5245_s10, %s5245_s10, %s5246_s9  }
 0x1ad   :  { %s4692_s26 = scalar_lea.hbm %s6123_s3, 2048 }
 0x1ae   :  { %p4693_p12 = scmp.ne.s32.totalorder %s6123_s3, %s4692_s26  ;;  %p4696_p13 = scmp.lt.u32.totalorder %s4692_s26, %s6123_s3 }
 0x1b0   :  { %p4698_p0 = pnand %p4696_p13, %p4693_p12 }
 0x1b2   :  { %4701 = shalt.err (!%p4698_p0)
}
 0x1b3   :  { %s4702_s28 = scalar_lea.vmem %s5706_s4, 2048  ;;  %p4707_p2 = scmp.lt.s32.totalorder %s5706_s4, %s5706_s4 }
 0x1b4   :  { %p4703_p1 = scmp.ne.s32.totalorder %s5706_s4, %s4702_s28  ;;  %p4708_p3 = scmp.lt.s32.totalorder %s4702_s28, %s4702_s28 }
 0x1b6   :  { %p4709_p4 = por %p4708_p3, %p4707_p2 }
 0x1b8   :  { %p4710_p5 = pnand %p4709_p4, %p4703_p1 }
 0x1ba   :  { %4713 = shalt.err (!%p4710_p5)
}
 0x1bb   :  { %s6124_s1 = sld [smem:[#allocation92_spill]]  ;;  %s5265_s19 = smov [#allocation16]  }
 0x1bc   :  { %205 = dma.hbm_to_vmem [thread:$0]  %s6123_s3, 2048, %s5706_s4, [#allocation12], %s5245_s10, %s5245_s10, %s5246_s9  }
 0x1bd   :  { %s226_s25 = sshll.u32 %s5265_s19, 4  ;;  %s5266_s2 = smov [#allocation19]   ;;  %s227_s25 = int_to_ptr.vmem [resolvable:$true] %s226_s25 }
 0x1be   :  { %s248_s21 = sshll.u32 %s5266_s2, 4  ;;  %s249_s21 = int_to_ptr.vmem [resolvable:$true] %s248_s21 }
 0x1c1   :  { %s4714_s7 = scalar_lea.hbm %s6124_s1, 16 }
 0x1c2   :  { %p4715_p6 = scmp.ne.s32.totalorder %s6124_s1, %s4714_s7  ;;  %p4718_p7 = scmp.lt.u32.totalorder %s4714_s7, %s6124_s1 }
 0x1c4   :  { %p4720_p8 = pnand %p4718_p7, %p4715_p6 }
 0x1c6   :  { %4723 = shalt.err (!%p4720_p8)
}
 0x1c7   :  { %s4724_s24 = scalar_lea.vmem %s227_s25, 16  ;;  %s4728_s11 = scalar_lea.vmem %s227_s25, 32 }
 0x1c8   :  { %p4725_p9 = scmp.ne.s32.totalorder %s227_s25, %s4724_s24  ;;  %p4729_p10 = scmp.lt.s32.totalorder %s227_s25, %s227_s25 }
 0x1c9   :  { %p4730_p11 = scmp.lt.s32.totalorder %s4728_s11, %s4724_s24 }
 0x1cb   :  { %p4731_p12 = por %p4730_p11, %p4729_p10 }
 0x1cd   :  { %p4732_p13 = pnand %p4731_p12, %p4725_p9 }
 0x1cf   :  { %4735 = shalt.err (!%p4732_p13)
}
 0x1d0   :  { %s6125_s6 = sld [smem:[#allocation93_spill]] }
 0x1d1   :  { %229 = dma.hbm_to_vmem [thread:$0]  %s6124_s1, 16, %s227_s25, [#allocation15]  }
 0x1d6   :  { %s4736_s15 = scalar_lea.hbm %s6125_s6, 16 }
 0x1d7   :  { %p4737_p0 = scmp.ne.s32.totalorder %s6125_s6, %s4736_s15  ;;  %p4740_p1 = scmp.lt.u32.totalorder %s4736_s15, %s6125_s6 }
 0x1d9   :  { %p4742_p2 = pnand %p4740_p1, %p4737_p0 }
 0x1db   :  { %4745 = shalt.err (!%p4742_p2)
}
 0x1dc   :  { %s4746_s27 = scalar_lea.vmem %s249_s21, 16  ;;  %s4750_s16 = scalar_lea.vmem %s249_s21, 32 }
 0x1dd   :  { %p4747_p3 = scmp.ne.s32.totalorder %s249_s21, %s4746_s27  ;;  %p4751_p4 = scmp.lt.s32.totalorder %s249_s21, %s249_s21 }
 0x1de   :  { %p4752_p5 = scmp.lt.s32.totalorder %s4750_s16, %s4746_s27 }
 0x1e0   :  { %p4753_p6 = por %p4752_p5, %p4751_p4 }
 0x1e2   :  { %p4754_p7 = pnand %p4753_p6, %p4747_p3 }
 0x1e4   :  { %4757 = shalt.err (!%p4754_p7)
}
 0x1e5   :  { %s6126_s12 = sld [smem:[#allocation94_spill]]  ;;  %s5267_s18 = smov [#allocation22]  }
 0x1e6   :  { %251 = dma.hbm_to_vmem [thread:$0]  %s6125_s6, 16, %s249_s21, [#allocation18]  }
 0x1e7   :  { %s270_s0 = sshll.u32 %s5267_s18, 4  ;;  %s5268_s22 = smov [#allocation25]   ;;  %s271_s0 = int_to_ptr.vmem [resolvable:$true] %s270_s0 }
 0x1e8   :  { %s292_s20 = sshll.u32 %s5268_s22, 4  ;;  %s293_s20 = int_to_ptr.vmem [resolvable:$true] %s292_s20 }
 0x1eb   :  { %s4758_s17 = scalar_lea.hbm %s6126_s12, 16 }
 0x1ec   :  { %p4759_p8 = scmp.ne.s32.totalorder %s6126_s12, %s4758_s17  ;;  %p4762_p9 = scmp.lt.u32.totalorder %s4758_s17, %s6126_s12 }
 0x1ee   :  { %p4764_p10 = pnand %p4762_p9, %p4759_p8 }
 0x1f0   :  { %4767 = shalt.err (!%p4764_p10)
}
 0x1f1   :  { %s4768_s30 = scalar_lea.vmem %s271_s0, 16  ;;  %s4772_s4 = scalar_lea.vmem %s271_s0, 32 }
 0x1f2   :  { %p4769_p11 = scmp.ne.s32.totalorder %s271_s0, %s4768_s30  ;;  %p4773_p12 = scmp.lt.s32.totalorder %s271_s0, %s271_s0 }
 0x1f3   :  { %p4774_p13 = scmp.lt.s32.totalorder %s4772_s4, %s4768_s30 }
 0x1f5   :  { %p4775_p0 = por %p4774_p13, %p4773_p12 }
 0x1f7   :  { %p4776_p1 = pnand %p4775_p0, %p4769_p11 }
 0x1f9   :  { %4779 = shalt.err (!%p4776_p1)
}
 0x1fa   :  { %s6127_s14 = sld [smem:[#allocation95_spill]] }
 0x1fb   :  { %273 = dma.hbm_to_vmem [thread:$0]  %s6126_s12, 16, %s271_s0, [#allocation21]  }
 0x200   :  { %s4780_s23 = scalar_lea.hbm %s6127_s14, 16 }
 0x201   :  { %p4781_p2 = scmp.ne.s32.totalorder %s6127_s14, %s4780_s23  ;;  %p4784_p3 = scmp.lt.u32.totalorder %s4780_s23, %s6127_s14 }
 0x203   :  { %p4786_p4 = pnand %p4784_p3, %p4781_p2 }
 0x205   :  { %4789 = shalt.err (!%p4786_p4)
}
 0x206   :  { %s4790_s3 = scalar_lea.vmem %s293_s20, 16  ;;  %s4794_s26 = scalar_lea.vmem %s293_s20, 32 }
 0x207   :  { %p4791_p5 = scmp.ne.s32.totalorder %s293_s20, %s4790_s3  ;;  %p4795_p6 = scmp.lt.s32.totalorder %s293_s20, %s293_s20 }
 0x208   :  { %p4796_p7 = scmp.lt.s32.totalorder %s4794_s26, %s4790_s3 }
 0x20a   :  { %p4797_p8 = por %p4796_p7, %p4795_p6 }
 0x20c   :  { %p4798_p9 = pnand %p4797_p8, %p4791_p5 }
 0x20e   :  { %4801 = shalt.err (!%p4798_p9)
}
 0x20f   :  { %s6128_s28 = sld [smem:[#allocation96_spill]]  ;;  %s5269_s1 = smov [#allocation28]  }
 0x210   :  { %295 = dma.hbm_to_vmem [thread:$0]  %s6127_s14, 16, %s293_s20, [#allocation24]  }
 0x211   :  { %s314_s19 = sshll.u32 %s5269_s1, 4  ;;  %s5270_s25 = smov [#allocation31]   ;;  %s315_s19 = int_to_ptr.vmem [resolvable:$true] %s314_s19 }
 0x212   :  { %s335_s2 = sshll.u32 %s5270_s25, 4  ;;  %s5743_s2 = int_to_ptr.vmem [resolvable:$true] %s335_s2 }
 0x215   :  { %s4802_s21 = scalar_lea.hbm %s6128_s28, 16 }
 0x216   :  { %p4803_p10 = scmp.ne.s32.totalorder %s6128_s28, %s4802_s21  ;;  %p4806_p11 = scmp.lt.u32.totalorder %s4802_s21, %s6128_s28 }
 0x218   :  { %p4808_p12 = pnand %p4806_p11, %p4803_p10 }
 0x21a   :  { %4811 = shalt.err (!%p4808_p12)
}
 0x21b   :  { %s4812_s7 = scalar_lea.vmem %s315_s19, 16  ;;  %s4816_s24 = scalar_lea.vmem %s315_s19, 32 }
 0x21c   :  { %p4813_p13 = scmp.ne.s32.totalorder %s315_s19, %s4812_s7  ;;  %p4817_p0 = scmp.lt.s32.totalorder %s315_s19, %s315_s19 }
 0x21d   :  { %p4818_p1 = scmp.lt.s32.totalorder %s4816_s24, %s4812_s7 }
 0x21f   :  { %p4819_p2 = por %p4818_p1, %p4817_p0 }
 0x221   :  { %p4820_p3 = pnand %p4819_p2, %p4813_p13 }
 0x223   :  { %4823 = shalt.err (!%p4820_p3)
}
 0x224   :  { %s6129_s11 = sld [smem:[#allocation97_spill]] }
 0x225   :  { %317 = dma.hbm_to_vmem [thread:$0]  %s6128_s28, 16, %s315_s19, [#allocation27]  }
 0x22a   :  { %s4824_s6 = scalar_lea.hbm %s6129_s11, 2048 }
 0x22b   :  { %p4825_p4 = scmp.ne.s32.totalorder %s6129_s11, %s4824_s6  ;;  %p4828_p5 = scmp.lt.u32.totalorder %s4824_s6, %s6129_s11 }
 0x22d   :  { %p4830_p6 = pnand %p4828_p5, %p4825_p4 }
 0x22f   :  { %4833 = shalt.err (!%p4830_p6)
}
 0x230   :  { %s4834_s15 = scalar_lea.vmem %s5743_s2, 2048  ;;  %p4839_p8 = scmp.lt.s32.totalorder %s5743_s2, %s5743_s2 }
 0x231   :  { %p4835_p7 = scmp.ne.s32.totalorder %s5743_s2, %s4834_s15  ;;  %p4840_p9 = scmp.lt.s32.totalorder %s4834_s15, %s4834_s15 }
 0x233   :  { %p4841_p10 = por %p4840_p9, %p4839_p8 }
 0x235   :  { %p4842_p11 = pnand %p4841_p10, %p4835_p7 }
 0x237   :  { %4845 = shalt.err (!%p4842_p11)
}
 0x238   :  { %s6130_s27 = sld [smem:[#allocation98_spill]]  ;;  %s5271_s16 = smov [#allocation34]  }
 0x239   :  { %341 = dma.hbm_to_vmem [thread:$0]  %s6129_s11, 2048, %s5743_s2, [#allocation30], %s5245_s10, %s5245_s10, %s5246_s9  }
 0x23a   :  { %s360_s12 = sshll.u32 %s5271_s16, 4  ;;  %s5272_s18 = smov [#allocation37]   ;;  %s361_s12 = int_to_ptr.vmem [resolvable:$true] %s360_s12 }
 0x23b   :  { %s382_s0 = sshll.u32 %s5272_s18, 4  ;;  %s383_s0 = int_to_ptr.vmem [resolvable:$true] %s382_s0 }
 0x23e   :  { %s4846_s22 = scalar_lea.hbm %s6130_s27, 16 }
 0x23f   :  { %p4847_p12 = scmp.ne.s32.totalorder %s6130_s27, %s4846_s22  ;;  %p4850_p13 = scmp.lt.u32.totalorder %s4846_s22, %s6130_s27 }
 0x241   :  { %p4852_p0 = pnand %p4850_p13, %p4847_p12 }
 0x243   :  { %4855 = shalt.err (!%p4852_p0)
}
 0x244   :  { %s4856_s20 = scalar_lea.vmem %s361_s12, 16  ;;  %s4860_s17 = scalar_lea.vmem %s361_s12, 32 }
 0x245   :  { %p4857_p1 = scmp.ne.s32.totalorder %s361_s12, %s4856_s20  ;;  %p4861_p2 = scmp.lt.s32.totalorder %s361_s12, %s361_s12 }
 0x246   :  { %p4862_p3 = scmp.lt.s32.totalorder %s4860_s17, %s4856_s20 }
 0x248   :  { %p4863_p4 = por %p4862_p3, %p4861_p2 }
 0x24a   :  { %p4864_p5 = pnand %p4863_p4, %p4857_p1 }
 0x24c   :  { %4867 = shalt.err (!%p4864_p5)
}
 0x24d   :  { %s6131_s30 = sld [smem:[#allocation99_spill]] }
 0x24e   :  { %363 = dma.hbm_to_vmem [thread:$0]  %s6130_s27, 16, %s361_s12, [#allocation33]  }
 0x253   :  { %s4868_s4 = scalar_lea.hbm %s6131_s30, 16 }
 0x254   :  { %p4869_p6 = scmp.ne.s32.totalorder %s6131_s30, %s4868_s4  ;;  %p4872_p7 = scmp.lt.u32.totalorder %s4868_s4, %s6131_s30 }
 0x256   :  { %p4874_p8 = pnand %p4872_p7, %p4869_p6 }
 0x258   :  { %4877 = shalt.err (!%p4874_p8)
}
 0x259   :  { %s4878_s14 = scalar_lea.vmem %s383_s0, 16  ;;  %s4882_s23 = scalar_lea.vmem %s383_s0, 32 }
 0x25a   :  { %p4879_p9 = scmp.ne.s32.totalorder %s383_s0, %s4878_s14  ;;  %p4883_p10 = scmp.lt.s32.totalorder %s383_s0, %s383_s0 }
 0x25b   :  { %p4884_p11 = scmp.lt.s32.totalorder %s4882_s23, %s4878_s14 }
 0x25d   :  { %p4885_p12 = por %p4884_p11, %p4883_p10 }
 0x25f   :  { %p4886_p13 = pnand %p4885_p12, %p4879_p9 }
 0x261   :  { %4889 = shalt.err (!%p4886_p13)
}
 0x262   :  { %s6132_s3 = sld [smem:[#allocation100_spill]]  ;;  %s5273_s26 = smov [#allocation40]  }
 0x263   :  { %385 = dma.hbm_to_vmem [thread:$0]  %s6131_s30, 16, %s383_s0, [#allocation36]  }
 0x264   :  { %s404_s28 = sshll.u32 %s5273_s26, 4  ;;  %s5274_s1 = smov [#allocation43]   ;;  %s405_s28 = int_to_ptr.vmem [resolvable:$true] %s404_s28 }
 0x265   :  { %s426_s19 = sshll.u32 %s5274_s1, 4  ;;  %s427_s19 = int_to_ptr.vmem [resolvable:$true] %s426_s19 }
 0x268   :  { %s4890_s25 = scalar_lea.hbm %s6132_s3, 16 }
 0x269   :  { %p4891_p0 = scmp.ne.s32.totalorder %s6132_s3, %s4890_s25  ;;  %p4894_p1 = scmp.lt.u32.totalorder %s4890_s25, %s6132_s3 }
 0x26b   :  { %p4896_p2 = pnand %p4894_p1, %p4891_p0 }
 0x26d   :  { %4899 = shalt.err (!%p4896_p2)
}
 0x26e   :  { %s4900_s2 = scalar_lea.vmem %s405_s28, 16  ;;  %s4904_s21 = scalar_lea.vmem %s405_s28, 32 }
 0x26f   :  { %p4901_p3 = scmp.ne.s32.totalorder %s405_s28, %s4900_s2  ;;  %p4905_p4 = scmp.lt.s32.totalorder %s405_s28, %s405_s28 }
 0x270   :  { %p4906_p5 = scmp.lt.s32.totalorder %s4904_s21, %s4900_s2 }
 0x272   :  { %p4907_p6 = por %p4906_p5, %p4905_p4 }
 0x274   :  { %p4908_p7 = pnand %p4907_p6, %p4901_p3 }
 0x276   :  { %4911 = shalt.err (!%p4908_p7)
}
 0x277   :  { %s6133_s7 = sld [smem:[#allocation101_spill]] }
 0x278   :  { %407 = dma.hbm_to_vmem [thread:$0]  %s6132_s3, 16, %s405_s28, [#allocation39]  }
 0x27d   :  { %s4912_s24 = scalar_lea.hbm %s6133_s7, 16 }
 0x27e   :  { %p4913_p8 = scmp.ne.s32.totalorder %s6133_s7, %s4912_s24  ;;  %p4916_p9 = scmp.lt.u32.totalorder %s4912_s24, %s6133_s7 }
 0x280   :  { %p4918_p10 = pnand %p4916_p9, %p4913_p8 }
 0x282   :  { %4921 = shalt.err (!%p4918_p10)
}
 0x283   :  { %s4922_s11 = scalar_lea.vmem %s427_s19, 16  ;;  %s4926_s6 = scalar_lea.vmem %s427_s19, 32 }
 0x284   :  { %p4923_p11 = scmp.ne.s32.totalorder %s427_s19, %s4922_s11  ;;  %p4927_p12 = scmp.lt.s32.totalorder %s427_s19, %s427_s19 }
 0x285   :  { %p4928_p13 = scmp.lt.s32.totalorder %s4926_s6, %s4922_s11 }
 0x287   :  { %p4929_p0 = por %p4928_p13, %p4927_p12 }
 0x289   :  { %p4930_p1 = pnand %p4929_p0, %p4923_p11 }
 0x28b   :  { %4933 = shalt.err (!%p4930_p1)
}
 0x28c   :  { %s6134_s15 = sld [smem:[#allocation102_spill]]  ;;  %s5275_s27 = smov [#allocation46]  }
 0x28d   :  { %429 = dma.hbm_to_vmem [thread:$0]  %s6133_s7, 16, %s427_s19, [#allocation42]  }
 0x28e   :  { %s448_s16 = sshll.u32 %s5275_s27, 4  ;;  %s5276_s12 = smov [#allocation49]   ;;  %s449_s16 = int_to_ptr.vmem [resolvable:$true] %s448_s16 }
 0x28f   :  { %s470_s18 = sshll.u32 %s5276_s12, 4  ;;  %s471_s18 = int_to_ptr.vmem [resolvable:$true] %s470_s18 }
 0x292   :  { %s4934_s0 = scalar_lea.hbm %s6134_s15, 16 }
 0x293   :  { %p4935_p2 = scmp.ne.s32.totalorder %s6134_s15, %s4934_s0  ;;  %p4938_p3 = scmp.lt.u32.totalorder %s4934_s0, %s6134_s15 }
 0x295   :  { %p4940_p4 = pnand %p4938_p3, %p4935_p2 }
 0x297   :  { %4943 = shalt.err (!%p4940_p4)
}
 0x298   :  { %s4944_s22 = scalar_lea.vmem %s449_s16, 16  ;;  %s4948_s20 = scalar_lea.vmem %s449_s16, 32 }
 0x299   :  { %p4945_p5 = scmp.ne.s32.totalorder %s449_s16, %s4944_s22  ;;  %p4949_p6 = scmp.lt.s32.totalorder %s449_s16, %s449_s16 }
 0x29a   :  { %p4950_p7 = scmp.lt.s32.totalorder %s4948_s20, %s4944_s22 }
 0x29c   :  { %p4951_p8 = por %p4950_p7, %p4949_p6 }
 0x29e   :  { %p4952_p9 = pnand %p4951_p8, %p4945_p5 }
 0x2a0   :  { %4955 = shalt.err (!%p4952_p9)
}
 0x2a1   :  { %s6135_s17 = sld [smem:[#allocation104_spill]] }
 0x2a2   :  { %451 = dma.hbm_to_vmem [thread:$0]  %s6134_s15, 16, %s449_s16, [#allocation45]  }
 0x2a7   :  { %s4956_s30 = scalar_lea.hbm %s6135_s17, 16 }
 0x2a8   :  { %p4957_p10 = scmp.ne.s32.totalorder %s6135_s17, %s4956_s30  ;;  %p4960_p11 = scmp.lt.u32.totalorder %s4956_s30, %s6135_s17 }
 0x2aa   :  { %p4962_p12 = pnand %p4960_p11, %p4957_p10 }
 0x2ac   :  { %4965 = shalt.err (!%p4962_p12)
}
 0x2ad   :  { %s4966_s4 = scalar_lea.vmem %s471_s18, 16  ;;  %s4970_s14 = scalar_lea.vmem %s471_s18, 32 }
 0x2ae   :  { %p4967_p13 = scmp.ne.s32.totalorder %s471_s18, %s4966_s4  ;;  %p4971_p0 = scmp.lt.s32.totalorder %s471_s18, %s471_s18 }
 0x2af   :  { %p4972_p1 = scmp.lt.s32.totalorder %s4970_s14, %s4966_s4 }
 0x2b1   :  { %p4973_p2 = por %p4972_p1, %p4971_p0 }
 0x2b3   :  { %p4974_p3 = pnand %p4973_p2, %p4967_p13 }
 0x2b5   :  { %4977 = shalt.err (!%p4974_p3)
}
 0x2b6   :  { %s6136_s23 = sld [smem:[#allocation109_spill]]  ;;  %s5277_s3 = smov [#allocation52]  }
 0x2b7   :  { %473 = dma.hbm_to_vmem [thread:$0]  %s6135_s17, 16, %s471_s18, [#allocation48]  }
 0x2b8   :  { %s497_s26 = sshll.u32 %s5277_s3, 4  ;;  %s498_s26 = int_to_ptr.vmem [resolvable:$true] %s497_s26 }
 0x2bc   :  { %s4978_s28 = scalar_lea.hbm %s6136_s23, 2048 }
 0x2bd   :  { %p4979_p4 = scmp.ne.s32.totalorder %s6136_s23, %s4978_s28  ;;  %p4982_p5 = scmp.lt.u32.totalorder %s4978_s28, %s6136_s23 }
 0x2bf   :  { %p4984_p6 = pnand %p4982_p5, %p4979_p4 }
 0x2c1   :  { %4987 = shalt.err (!%p4984_p6)
}
 0x2c2   :  { %s4988_s1 = scalar_lea.vmem %s498_s26, 2048  ;;  %p4993_p8 = scmp.lt.s32.totalorder %s498_s26, %s498_s26 }
 0x2c3   :  { %p4989_p7 = scmp.ne.s32.totalorder %s498_s26, %s4988_s1  ;;  %p4994_p9 = scmp.lt.s32.totalorder %s4988_s1, %s4988_s1 }
 0x2c5   :  { %p4995_p10 = por %p4994_p9, %p4993_p8 }
 0x2c7   :  { %p4996_p11 = pnand %p4995_p10, %p4989_p7 }
 0x2c9   :  { %4999 = shalt.err (!%p4996_p11)
}
 0x2ca   :  { %503 = dma.hbm_to_vmem [thread:$0]  %s6136_s23, 2048, %s498_s26, [#allocation51], %s5245_s10, %s5245_s10, %s5246_s9  }
 0x2cb   :  { %5154 = dma.done.wait [#allocation3], 128  }
 0x2cc   :  { %5155 = vsyncadd [#allocation3], 4294967168 }
 0x2cd   :  { %5156 = dma.done.wait [#allocation6], 256  }
 0x2ce   :  { %5157 = vsyncadd [#allocation6], 4294967040 }
 0x2cf   :  { %5158 = dma.done.wait [#allocation9], 4096  }
 0x2d0   :  { %5159 = vsyncadd [#allocation9], 4294963200 }
 0x2d1   :  { %5160 = dma.done.wait [#allocation12], 4096  }
 0x2d2   :  { %5161 = vsyncadd [#allocation12], 4294963200 }
 0x2d3   :  { %5162 = dma.done.wait [#allocation15], 2064  }
 0x2d4   :  { %5163 = vsyncadd [#allocation15], 4294965232 }
 0x2d5   :  { %5164 = dma.done.wait [#allocation18], 2064  }
 0x2d6   :  { %5165 = vsyncadd [#allocation18], 4294965232 }
 0x2d7   :  { %5166 = dma.done.wait [#allocation21], 2064  }
 0x2d8   :  { %5167 = vsyncadd [#allocation21], 4294965232 }
 0x2d9   :  { %5168 = dma.done.wait [#allocation24], 2064  }
 0x2da   :  { %5169 = vsyncadd [#allocation24], 4294965232 }
 0x2db   :  { %5170 = dma.done.wait [#allocation27], 2064  }
 0x2dc   :  { %5171 = vsyncadd [#allocation27], 4294965232 }
 0x2dd   :  { %5172 = dma.done.wait [#allocation30], 4096  }
 0x2de   :  { %5173 = vsyncadd [#allocation30], 4294963200 }
 0x2df   :  { %5174 = dma.done.wait [#allocation33], 2064  }
 0x2e0   :  { %5175 = vsyncadd [#allocation33], 4294965232 }
 0x2e1   :  { %5176 = dma.done.wait [#allocation36], 2064  }
 0x2e2   :  { %5177 = vsyncadd [#allocation36], 4294965232 }
 0x2e3   :  { %5178 = dma.done.wait [#allocation39], 2064  }
 0x2e4   :  { %5179 = vsyncadd [#allocation39], 4294965232 }
 0x2e5   :  { %5180 = dma.done.wait [#allocation42], 2064  }
 0x2e6   :  { %5181 = vsyncadd [#allocation42], 4294965232 }
 0x2e7   :  { %5182 = dma.done.wait [#allocation45], 2064  }
 0x2e8   :  { %5183 = vsyncadd [#allocation45], 4294965232 }
 0x2e9   :  { %5184 = dma.done.wait [#allocation48], 2064  }
 0x2ea   :  { %5185 = vsyncadd [#allocation48], 4294965232 }
 0x2eb   :  { %5186 = dma.done.wait [#allocation51], 4096  }
 0x2ec   :  { %5187 = vsyncadd [#allocation51], 4294963200  ;;  %v5278_v0 = vmov 0.0|0.0   ;;  %vm5279_vm0 = vmmov 0   ;;  %v5280_v1 = vmov 0.0   ;;  %v608_v2 = vld [vmem:[#allocation8] sm:$0xff] }
 0x2ed   :  { %3698 = vmatprep.subr.bf16.mxu0 %v5278_v0  ;;  %3030 = vmatprep.mubr.msk.f32.mxu0 %vm5279_vm0, %v5280_v1  ;;  %v609_v3 = vld [vmem:[#allocation8 + $0x8] sm:$0xff]  ;;  %v610_v4 = vld [vmem:[#allocation8 + $0x10] sm:$0xff]  ;;  %v611_v6 = vld [vmem:[#allocation8 + $0x18] sm:$0xff]  ;;  %s6137_s10 = sld [smem:[#allocation86_spill]]  ;;  %s6138_s9 = sld [smem:[#allocation88_spill]] }
 0x2ee   :  { %3722 = vmatprep.subr.bf16.mxu1 %v5278_v0  ;;  %3065 = vmatprep.mubr.msk.f32.mxu1 %vm5279_vm0, %v5280_v1  ;;  %v3699_v5 = vpack.c.bf16 %v609_v3, %v608_v2  ;;  %v3702_v7 = vpack.c.bf16 %v611_v6, %v610_v4  ;;  %v612_v8 = vld [vmem:[#allocation8 + $0x20] sm:$0xff]  ;;  %v613_v9 = vld [vmem:[#allocation8 + $0x28] sm:$0xff]  ;;  %v704_v12 = vld [vmem:[#allocation10 + $0x10] sm:$0xff]  ;;  %s6139_s19 = sld [smem:[#allocation91_spill]]  ;;  %s6140_s25 = sld [smem:[#allocation89_spill]] }
 0x2ef   :  { %v702_v10 = vld [vmem:[#allocation10] sm:$0xff]  ;;  %v703_v11 = vld [vmem:[#allocation10 + $0x8] sm:$0xff]  ;;  %v705_v13 = vld [vmem:[#allocation10 + $0x18] sm:$0xff]  ;;  %v3705_v14 = vpack.c.bf16 %v613_v9, %v612_v8  ;;  %s6141_s2 = sld [smem:[#allocation105_spill]]  ;;  %s6142_s21 = sld [smem:[#allocation108_spill]] }
 0x2f0   :  { %3700 = vmatpush3.bf16.msra.mxu0 %v3699_v5  ;;  %v3723_v15 = vpack.c.bf16 %v703_v11, %v702_v10  ;;  %v614_v16 = vld [vmem:[#allocation8 + $0x30] sm:$0xff]  ;;  %v615_v17 = vld [vmem:[#allocation8 + $0x38] sm:$0xff]  ;;  %v3726_v18 = vpack.c.bf16 %v705_v13, %v704_v12  ;;  %v706_v19 = vld [vmem:[#allocation10 + $0x20] sm:$0xff]  ;;  %s5281_s7 = smov [#allocation54]  }
 0x2f1   :  { %3701 = vmatprep.subr.bf16.mxu0 %v5278_v0  ;;  %v707_v20 = vld [vmem:[#allocation10 + $0x28] sm:$0xff]  ;;  %v3708_v21 = vpack.c.bf16 %v615_v17, %v614_v16  ;;  %v616_v22 = vld [vmem:[#allocation8 + $0x40] sm:$0xff]  ;;  %v708_v25 = vld [vmem:[#allocation10 + $0x30] sm:$0xff]  ;;  %s2496_s24 = sshll.u32 %s5281_s7, 4  ;;  %s2497_s24 = int_to_ptr.vmem [resolvable:$true] %s2496_s24 }
 0x2f2   :  { %3724 = vmatpush3.bf16.msra.mxu1 %v3723_v15  ;;  %v617_v23 = vld [vmem:[#allocation8 + $0x48] sm:$0xff]  ;;  %v3729_v24 = vpack.c.bf16 %v707_v20, %v706_v19  ;;  %v709_v26 = vld [vmem:[#allocation10 + $0x38] sm:$0xff]  ;;  %v618_v28 = vld [vmem:[#allocation8 + $0x50] sm:$0xff]  ;;  %s5000_s11 = scalar_lea.vmem %s2497_s24, 128  ;;  %p5005_p13 = scmp.lt.s32.totalorder %s2497_s24, %s2497_s24 }
 0x2f3   :  { %3725 = vmatprep.subr.bf16.mxu1 %v5278_v0  ;;  %v3711_v27 = vpack.c.bf16 %v617_v23, %v616_v22  ;;  %v619_v29 = vld [vmem:[#allocation8 + $0x58] sm:$0xff]  ;;  %v3732_v30 = vpack.c.bf16 %v709_v26, %v708_v25  ;;  %v710_v31 = vld [vmem:[#allocation10 + $0x40] sm:$0xff]  ;;  %v711_v32 = vld [vmem:[#allocation10 + $0x48] sm:$0xff]  ;;  %p5001_p12 = scmp.ne.s32.totalorder %s2497_s24, %s5000_s11  ;;  %p5006_p0 = scmp.lt.s32.totalorder %s5000_s11, %s5000_s11 }
 0x2f4   :  { %3703 = vmatpush3.bf16.msra.mxu0 %v3702_v7  ;;  %v3714_v33 = vpack.c.bf16 %v619_v29, %v618_v28  ;;  %v620_v34 = vld [vmem:[#allocation8 + $0x60] sm:$0xff]  ;;  %v621_v35 = vld [vmem:[#allocation8 + $0x68] sm:$0xff]  ;;  %v3735_v36 = vpack.c.bf16 %v711_v32, %v710_v31  ;;  %v712_v37 = vld [vmem:[#allocation10 + $0x50] sm:$0xff] }
 0x2f5   :  { %3704 = vmatprep.subr.bf16.mxu0 %v5278_v0  ;;  %v713_v38 = vld [vmem:[#allocation10 + $0x58] sm:$0xff]  ;;  %v3717_v39 = vpack.c.bf16 %v621_v35, %v620_v34  ;;  %v622_v40 = vld [vmem:[#allocation8 + $0x70] sm:$0xff]  ;;  %v714_v43 = vld [vmem:[#allocation10 + $0x60] sm:$0xff]  ;;  %p5007_p1 = por %p5006_p0, %p5005_p13 }
 0x2f6   :  { %3727 = vmatpush3.bf16.msra.mxu1 %v3726_v18  ;;  %v623_v41 = vld [vmem:[#allocation8 + $0x78] sm:$0xff]  ;;  %v3738_v42 = vpack.c.bf16 %v713_v38, %v712_v37  ;;  %v715_v44 = vld [vmem:[#allocation10 + $0x68] sm:$0xff]  ;;  %v716_v48 = vld [vmem:[#allocation10 + $0x70] sm:$0xff] }
 0x2f7   :  { %3728 = vmatprep.subr.bf16.mxu1 %v5278_v0  ;;  %v3720_v45 = vpack.c.bf16 %v623_v41, %v622_v40  ;;  %v3741_v46 = vpack.c.bf16 %v715_v44, %v714_v43  ;;  %v605_v47 = vld [vmem:[#allocation2] sm:$0xff]  ;;  %v717_v49 = vld [vmem:[#allocation10 + $0x78] sm:$0xff]  ;;  %v796_v51 = vld [vmem:[#allocation11] sm:$0xff]  ;;  %p5008_p2 = pnand %p5007_p1, %p5001_p12 }
 0x2f8   :  { %3706 = vmatpush3.bf16.msra.mxu0 %v3705_v14  ;;  %v3744_v50 = vpack.c.bf16 %v717_v49, %v716_v48  ;;  %v797_v52 = vld [vmem:[#allocation11 + $0x8] sm:$0xff]  ;;  %v798_v53 = vld [vmem:[#allocation11 + $0x10] sm:$0xff]  ;;  %v799_v55 = vld [vmem:[#allocation11 + $0x18] sm:$0xff] }
 0x2f9   :  { %3707 = vmatprep.subr.bf16.mxu0 %v5278_v0  ;;  %v3747_v54 = vpack.c.bf16 %v797_v52, %v796_v51  ;;  %v3750_v56 = vpack.c.bf16 %v799_v55, %v798_v53  ;;  %v800_v57 = vld [vmem:[#allocation11 + $0x20] sm:$0xff]  ;;  %v801_v58 = vld [vmem:[#allocation11 + $0x28] sm:$0xff]  ;;  %v802_v60 = vld [vmem:[#allocation11 + $0x30] sm:$0xff] }
 0x2fa   :  { %3730 = vmatpush3.bf16.msra.mxu1 %v3729_v24  ;;  %v3753_v59 = vpack.c.bf16 %v801_v58, %v800_v57  ;;  %v803_v61 = vld [vmem:[#allocation11 + $0x38] sm:$0xff]  ;;  %v804_v63 = vld [vmem:[#allocation11 + $0x40] sm:$0xff]  ;;  %v805_v2 = vld [vmem:[#allocation11 + $0x48] sm:$0xff] }
 0x2fb   :  { %3731 = vmatprep.subr.bf16.mxu1 %v5278_v0  ;;  %v3756_v62 = vpack.c.bf16 %v803_v61, %v802_v60  ;;  %v3759_v3 = vpack.c.bf16 %v805_v2, %v804_v63  ;;  %v806_v4 = vld [vmem:[#allocation11 + $0x50] sm:$0xff]  ;;  %v807_v5 = vld [vmem:[#allocation11 + $0x58] sm:$0xff]  ;;  %v808_v7 = vld [vmem:[#allocation11 + $0x60] sm:$0xff] }
 0x2fc   :  { %3709 = vmatpush3.bf16.msra.mxu0 %v3708_v21  ;;  %v3762_v6 = vpack.c.bf16 %v807_v5, %v806_v4  ;;  %v809_v8 = vld [vmem:[#allocation11 + $0x68] sm:$0xff]  ;;  %v890_v11 = vld [vmem:[#allocation13] sm:$0xff]  ;;  %v892_v18 = vld [vmem:[#allocation13 + $0x10] sm:$0xff] }
 0x2fd   :  { %3710 = vmatprep.subr.bf16.mxu0 %v5278_v0  ;;  %v3765_v9 = vpack.c.bf16 %v809_v8, %v808_v7  ;;  %v2639_v10 = vld [vmem:[%s6137_s10] ss:$0 sm:$0xff]  ;;  %v893_v19 = vld [vmem:[#allocation13 + $0x18] sm:$0xff]  ;;  %v894_v21 = vld [vmem:[#allocation13 + $0x20] sm:$0xff] }
 0x2fe   :  { %3733 = vmatpush3.bf16.msra.mxu1 %v3732_v30  ;;  %v891_v12 = vld [vmem:[#allocation13 + $0x8] sm:$0xff]  ;;  %v3774_v20 = vpack.c.bf16 %v893_v19, %v892_v18  ;;  %v896_v24 = vld [vmem:[#allocation13 + $0x30] sm:$0xff]  ;;  %v897_v25 = vld [vmem:[#allocation13 + $0x38] sm:$0xff] }
 0x2ff   :  { %3734 = vmatprep.subr.bf16.mxu1 %v5278_v0  ;;  %v3771_v16 = vpack.c.bf16 %v891_v12, %v890_v11  ;;  %v895_v22 = vld [vmem:[#allocation13 + $0x28] sm:$0xff]  ;;  %v3780_v26 = vpack.c.bf16 %v897_v25, %v896_v24  ;;  %v900_v30 = vld [vmem:[#allocation13 + $0x50] sm:$0xff]  ;;  %v901_v31 = vld [vmem:[#allocation13 + $0x58] sm:$0xff] }
 0x300   :  { %3712 = vmatpush3.bf16.msra.mxu0 %v3711_v27  ;;  %v3777_v23 = vpack.c.bf16 %v895_v22, %v894_v21  ;;  %v898_v27 = vld [vmem:[#allocation13 + $0x40] sm:$0xff]  ;;  %v899_v28 = vld [vmem:[#allocation13 + $0x48] sm:$0xff]  ;;  %v3786_v32 = vpack.c.bf16 %v901_v31, %v900_v30  ;;  %v905_v37 = vld [vmem:[#allocation13 + $0x78] sm:$0xff] }
 0x301   :  { %3713 = vmatprep.subr.bf16.mxu0 %v5278_v0  ;;  %v3783_v29 = vpack.c.bf16 %v899_v28, %v898_v27  ;;  %v903_v34 = vld [vmem:[#allocation13 + $0x68] sm:$0xff]  ;;  %v810_v40 = vld [vmem:[#allocation11 + $0x70] sm:$0xff]  ;;  %v811_v41 = vld [vmem:[#allocation11 + $0x78] sm:$0xff] }
 0x302   :  { %3736 = vmatpush3.bf16.msra.mxu1 %v3735_v36  ;;  %v904_v36 = vld [vmem:[#allocation13 + $0x70] sm:$0xff]  ;;  %v2640_v43 = vld [vmem:[%s6138_s9] ss:$0 sm:$0xff]  ;;  %v984_v44 = vld [vmem:[#allocation14] sm:$0xff] }
 0x303   :  { %3737 = vmatprep.subr.bf16.mxu1 %v5278_v0  ;;  %v3792_v38 = vpack.c.bf16 %v905_v37, %v904_v36  ;;  %v986_v51 = vld [vmem:[#allocation14 + $0x10] sm:$0xff]  ;;  %v987_v52 = vld [vmem:[#allocation14 + $0x18] sm:$0xff]  ;;  %v989_v55 = vld [vmem:[#allocation14 + $0x28] sm:$0xff] }
 0x304   :  { %3715 = vmatpush3.bf16.msra.mxu0 %v3714_v33  ;;  %v902_v33 = vld [vmem:[#allocation13 + $0x60] sm:$0xff]  ;;  %v3798_v53 = vpack.c.bf16 %v987_v52, %v986_v51  ;;  %v990_v57 = vld [vmem:[#allocation14 + $0x30] sm:$0xff]  ;;  %v991_v58 = vld [vmem:[#allocation14 + $0x38] sm:$0xff] }
 0x305   :  { %3716 = vmatprep.subr.bf16.mxu0 %v5278_v0  ;;  %v3789_v35 = vpack.c.bf16 %v903_v34, %v902_v33  ;;  %v992_v60 = vld [vmem:[#allocation14 + $0x40] sm:$0xff]  ;;  %v993_v61 = vld [vmem:[#allocation14 + $0x48] sm:$0xff]  ;;  %v994_v63 = vld [vmem:[#allocation14 + $0x50] sm:$0xff] }
 0x306   :  { %3739 = vmatpush3.bf16.msra.mxu1 %v3738_v42  ;;  %v3768_v42 = vpack.c.bf16 %v811_v41, %v810_v40  ;;  %v995_v2 = vld [vmem:[#allocation14 + $0x58] sm:$0xff]  ;;  %v996_v4 = vld [vmem:[#allocation14 + $0x60] sm:$0xff]  ;;  %v997_v5 = vld [vmem:[#allocation14 + $0x68] sm:$0xff] }
 0x307   :  { %3740 = vmatprep.subr.bf16.mxu1 %v5278_v0  ;;  %v998_v7 = vld [vmem:[#allocation14 + $0x70] sm:$0xff]  ;;  %v999_v8 = vld [vmem:[#allocation14 + $0x78] sm:$0xff]  ;;  %v1172_v11 = vld [vmem:[#allocation20] sm:$0xff] }
 0x308   :  { %3718 = vmatpush3.bf16.msra.mxu0 %v3717_v39  ;;  %v606_v39 = vld [vmem:[#allocation5] sm:$0xff]  ;;  %v1176_v22 = vld [vmem:[#allocation20 + $0x20] sm:$0xff]  ;;  %v607_v40 = vld [vmem:[#allocation7] sm:$0xff] }
 0x309   :  { %3719 = vmatprep.subr.bf16.mxu0 %v5278_v0  ;;  %v1173_v12 = vld [vmem:[#allocation20 + $0x8] sm:$0xff]  ;;  %v1174_v19 = vld [vmem:[#allocation20 + $0x10] sm:$0xff]  ;;  %v1180_v28 = vld [vmem:[#allocation20 + $0x40] sm:$0xff] }
 0x30a   :  { %3742 = vmatpush3.bf16.msra.mxu1 %v3741_v46  ;;  %v1178_v25 = vld [vmem:[#allocation20 + $0x30] sm:$0xff]  ;;  %v1184_v34 = vld [vmem:[#allocation20 + $0x60] sm:$0xff] }
 0x30b   :  { %3743 = vmatprep.subr.bf16.mxu1 %v5278_v0  ;;  %v1182_v31 = vld [vmem:[#allocation20 + $0x50] sm:$0xff]  ;;  %v1078_v41 = vld [vmem:[#allocation17] sm:$0xff] }
 0x30c   :  { %3721 = vmatpush3.bf16.msra.mxu0 %v3720_v45  ;;  %v985_v45 = vld [vmem:[#allocation14 + $0x8] sm:$0xff]  ;;  %v1186_v37 = vld [vmem:[#allocation20 + $0x70] sm:$0xff] }
 0x30d   :  { %3746 = vmatprep.subr.bf16.mxu0 %v5278_v0  ;;  %v3795_v49 = vpack.c.bf16 %v985_v45, %v984_v44  ;;  %v1080_v44 = vld [vmem:[#allocation17 + $0x10] sm:$0xff]  ;;  %v1081_v45 = vld [vmem:[#allocation17 + $0x18] sm:$0xff] }
 0x30e   :  { %3745 = vmatpush3.bf16.msra.mxu1 %v3744_v50  ;;  %v1085_v51 = vld [vmem:[#allocation17 + $0x38] sm:$0xff] }
 0x30f   :  { %3031 = vmatmul.mubr.f32.vlgmr.msra.gmra.mrb[0].mxu0 %v605_v47  ;;  %3770 = vmatprep.subr.bf16.mxu1 %v5278_v0 }
 0x310   :  { %3100 = vmatprep.mubr.msk.f32.mxu0 %vm5279_vm0, %v5280_v1  ;;  %3748 = vmatpush3.bf16.msra.mxu0 %v3747_v54  ;;  %v988_v54 = vld [vmem:[#allocation14 + $0x20] sm:$0xff] }
 0x311   :  { %3749 = vmatprep.subr.bf16.mxu0 %v5278_v0 }
 0x314   :  { %3751 = vmatpush3.bf16.msra.mxu0 %v3750_v56  ;;  %v3801_v56 = vpack.c.bf16 %v989_v55, %v988_v54  ;;  %v1087_v54 = vld [vmem:[#allocation17 + $0x48] sm:$0xff] }
 0x315   :  { %3752 = vmatprep.subr.bf16.mxu0 %v5278_v0 }
 0x318   :  { %3754 = vmatpush3.bf16.msra.mxu0 %v3753_v59  ;;  %v3804_v59 = vpack.c.bf16 %v991_v58, %v990_v57  ;;  %v1089_v57 = vld [vmem:[#allocation17 + $0x58] sm:$0xff] }
 0x319   :  { %3755 = vmatprep.subr.bf16.mxu0 %v5278_v0 }
 0x31c   :  { %3757 = vmatpush3.bf16.msra.mxu0 %v3756_v62  ;;  %v3807_v62 = vpack.c.bf16 %v993_v61, %v992_v60  ;;  %v1091_v60 = vld [vmem:[#allocation17 + $0x68] sm:$0xff] }
 0x31d   :  { %3758 = vmatprep.subr.bf16.mxu0 %v5278_v0 }
 0x320   :  { %3760 = vmatpush3.bf16.msra.mxu0 %v3759_v3  ;;  %v3810_v3 = vpack.c.bf16 %v995_v2, %v994_v63  ;;  %v1093_v63 = vld [vmem:[#allocation17 + $0x78] sm:$0xff] }
 0x321   :  { %3761 = vmatprep.subr.bf16.mxu0 %v5278_v0 }
 0x324   :  { %3763 = vmatpush3.bf16.msra.mxu0 %v3762_v6  ;;  %v3813_v6 = vpack.c.bf16 %v997_v5, %v996_v4 }
 0x325   :  { %3764 = vmatprep.subr.bf16.mxu0 %v5278_v0 }
 0x328   :  { %3766 = vmatpush3.bf16.msra.mxu0 %v3765_v9  ;;  %v2642_v9 = vld [vmem:[%s6139_s19] ss:$0 sm:$0xff] }
 0x329   :  { %3767 = vmatprep.subr.bf16.mxu0 %v5278_v0 }
 0x32c   :  { %3769 = vmatpush3.bf16.msra.mxu0 %v3768_v42  ;;  %v1079_v42 = vld [vmem:[#allocation17 + $0x8] sm:$0xff] }
 0x32d   :  { %3794 = vmatprep.subr.bf16.mxu0 %v5278_v0 }
 0x3e2   :  { %v697_v13 = vpop.f32.mrb[0].mxu0 }
 0x3e3   :  { %v698_v14 = vadd.f32 %v2639_v10, %v697_v13  ;;  %v3032_v15 = vpop.f32.mrb[1].mxu0  ;;  %v3816_v10 = vpack.c.bf16 %v999_v8, %v998_v7  ;;  %v2643_v7 = vld [vmem:[#allocation16] ss:$0 sm:$0xff]  ;;  %v1266_v8 = vld [vmem:[#allocation23] sm:$0xff] }
 0x3e5   :  { %v5824_v17 = vmax.f32 %v698_v14, 0.0 }
 0x3e7   :  { %3066 = vmatmul.mubr.f32.vlgmr.msra.gmra.mrb[0].mxu1 %v5824_v17 }
 0x3e8   :  { %3772 = vmatpush3.bf16.msra.mxu1 %v3771_v16  ;;  %3135 = vmatprep.mubr.msk.f32.mxu1 %vm5279_vm0, %v5280_v1  ;;  %v3843_v16 = vpack.c.bf16 %v1173_v12, %v1172_v11 }
 0x3e9   :  { %3773 = vmatprep.subr.bf16.mxu1 %v5278_v0 }
 0x3ec   :  { %3775 = vmatpush3.bf16.msra.mxu1 %v3774_v20  ;;  %v1175_v20 = vld [vmem:[#allocation20 + $0x18] sm:$0xff] }
 0x3ed   :  { %3776 = vmatprep.subr.bf16.mxu1 %v5278_v0  ;;  %v3846_v21 = vpack.c.bf16 %v1175_v20, %v1174_v19  ;;  %v1270_v20 = vld [vmem:[#allocation23 + $0x20] sm:$0xff] }
 0x3f0   :  { %3778 = vmatpush3.bf16.msra.mxu1 %v3777_v23  ;;  %v1177_v23 = vld [vmem:[#allocation20 + $0x28] sm:$0xff] }
 0x3f1   :  { %3779 = vmatprep.subr.bf16.mxu1 %v5278_v0  ;;  %v3849_v24 = vpack.c.bf16 %v1177_v23, %v1176_v22  ;;  %v1272_v23 = vld [vmem:[#allocation23 + $0x30] sm:$0xff] }
 0x3f4   :  { %3781 = vmatpush3.bf16.msra.mxu1 %v3780_v26  ;;  %v1179_v26 = vld [vmem:[#allocation20 + $0x38] sm:$0xff] }
 0x3f5   :  { %3782 = vmatprep.subr.bf16.mxu1 %v5278_v0  ;;  %v3852_v27 = vpack.c.bf16 %v1179_v26, %v1178_v25  ;;  %v1274_v26 = vld [vmem:[#allocation23 + $0x40] sm:$0xff] }
 0x3f8   :  { %3784 = vmatpush3.bf16.msra.mxu1 %v3783_v29  ;;  %v1181_v29 = vld [vmem:[#allocation20 + $0x48] sm:$0xff] }
 0x3f9   :  { %3785 = vmatprep.subr.bf16.mxu1 %v5278_v0  ;;  %v3855_v30 = vpack.c.bf16 %v1181_v29, %v1180_v28  ;;  %v1276_v29 = vld [vmem:[#allocation23 + $0x50] sm:$0xff] }
 0x3fc   :  { %3787 = vmatpush3.bf16.msra.mxu1 %v3786_v32  ;;  %v1183_v32 = vld [vmem:[#allocation20 + $0x58] sm:$0xff] }
 0x3fd   :  { %3788 = vmatprep.subr.bf16.mxu1 %v5278_v0  ;;  %v3858_v33 = vpack.c.bf16 %v1183_v32, %v1182_v31  ;;  %v1278_v32 = vld [vmem:[#allocation23 + $0x60] sm:$0xff] }
 0x400   :  { %3790 = vmatpush3.bf16.msra.mxu1 %v3789_v35  ;;  %v1185_v35 = vld [vmem:[#allocation20 + $0x68] sm:$0xff] }
 0x401   :  { %3791 = vmatprep.subr.bf16.mxu1 %v5278_v0  ;;  %v3861_v36 = vpack.c.bf16 %v1185_v35, %v1184_v34  ;;  %v1280_v35 = vld [vmem:[#allocation23 + $0x70] sm:$0xff] }
 0x404   :  { %3793 = vmatpush3.bf16.msra.mxu1 %v3792_v38  ;;  %v1187_v38 = vld [vmem:[#allocation20 + $0x78] sm:$0xff] }
 0x405   :  { %3818 = vmatprep.subr.bf16.mxu1 %v5278_v0 }
 0x407   :  { %3136 = vmatmul.mubr.f32.vlgmr.msra.gmra.mrb[2].mxu1 %v606_v39  ;;  %v3864_v39 = vpack.c.bf16 %v1187_v38, %v1186_v37  ;;  %v2645_v37 = vld [vmem:[#allocation22] ss:$0 sm:$0xff] }
 0x408   :  { %3205 = vmatprep.mubr.msk.f32.mxu1 %vm5279_vm0, %v5280_v1 }
 0x4ba   :  { %v791_v46 = vpop.f32.mrb[0].mxu1 }
 0x4bb   :  { %v792_v47 = vadd.f32 %v2640_v43, %v791_v46  ;;  %v3067_v48 = vpop.f32.mrb[1].mxu1  ;;  %v3819_v43 = vpack.c.bf16 %v1079_v42, %v1078_v41  ;;  %v3822_v46 = vpack.c.bf16 %v1081_v45, %v1080_v44 }
 0x4bc   :  { %v1083_v48 = vld [vmem:[#allocation17 + $0x28] sm:$0xff] }
 0x4bd   :  { %v795_v50 = vmax.f32 %v792_v47, 0.0  ;;  %3820 = vmatpush3.bf16.msra.mxu1 %v3819_v43  ;;  %v1082_v47 = vld [vmem:[#allocation17 + $0x20] sm:$0xff] }
 0x4be   :  { %3821 = vmatprep.subr.bf16.mxu1 %v5278_v0 }
 0x4bf   :  { %3101 = vmatmul.mubr.f32.vlgmr.msra.gmra.mrb[2].mxu0 %v795_v50  ;;  %v1084_v50 = vld [vmem:[#allocation17 + $0x30] sm:$0xff] }
 0x4c0   :  { %3796 = vmatpush3.bf16.msra.mxu0 %v3795_v49  ;;  %3170 = vmatprep.mubr.msk.f32.mxu0 %vm5279_vm0, %v5280_v1  ;;  %v3825_v49 = vpack.c.bf16 %v1083_v48, %v1082_v47  ;;  %v3828_v52 = vpack.c.bf16 %v1085_v51, %v1084_v50  ;;  %v1473_v47 = vld [vmem:[#allocation31 + $0x18] sm:$0xff]  ;;  %v1475_v50 = vld [vmem:[#allocation31 + $0x28] sm:$0xff] }
 0x4c1   :  { %3797 = vmatprep.subr.bf16.mxu0 %v5278_v0  ;;  %3823 = vmatpush3.bf16.msra.mxu1 %v3822_v46  ;;  %v1472_v46 = vld [vmem:[#allocation31 + $0x10] sm:$0xff] }
 0x4c2   :  { %3824 = vmatprep.subr.bf16.mxu1 %v5278_v0  ;;  %v3918_v48 = vpack.c.bf16 %v1473_v47, %v1472_v46  ;;  %v1370_v47 = vld [vmem:[#allocation26 + $0x50] sm:$0xff] }
 0x4c4   :  { %3799 = vmatpush3.bf16.msra.mxu0 %v3798_v53  ;;  %v1086_v53 = vld [vmem:[#allocation17 + $0x40] sm:$0xff] }
 0x4c5   :  { %3800 = vmatprep.subr.bf16.mxu0 %v5278_v0  ;;  %3826 = vmatpush3.bf16.msra.mxu1 %v3825_v49  ;;  %v3831_v55 = vpack.c.bf16 %v1087_v54, %v1086_v53  ;;  %v1474_v49 = vld [vmem:[#allocation31 + $0x20] sm:$0xff]  ;;  %v1477_v53 = vld [vmem:[#allocation31 + $0x38] sm:$0xff] }
 0x4c6   :  { %3827 = vmatprep.subr.bf16.mxu1 %v5278_v0  ;;  %v3921_v51 = vpack.c.bf16 %v1475_v50, %v1474_v49  ;;  %v1372_v50 = vld [vmem:[#allocation26 + $0x60] sm:$0xff] }
 0x4c8   :  { %3802 = vmatpush3.bf16.msra.mxu0 %v3801_v56  ;;  %v1088_v56 = vld [vmem:[#allocation17 + $0x50] sm:$0xff] }
 0x4c9   :  { %3803 = vmatprep.subr.bf16.mxu0 %v5278_v0  ;;  %3829 = vmatpush3.bf16.msra.mxu1 %v3828_v52  ;;  %v3834_v58 = vpack.c.bf16 %v1089_v57, %v1088_v56  ;;  %v1476_v52 = vld [vmem:[#allocation31 + $0x30] sm:$0xff]  ;;  %v1479_v56 = vld [vmem:[#allocation31 + $0x48] sm:$0xff] }
 0x4ca   :  { %3830 = vmatprep.subr.bf16.mxu1 %v5278_v0  ;;  %v3924_v54 = vpack.c.bf16 %v1477_v53, %v1476_v52  ;;  %v1374_v53 = vld [vmem:[#allocation26 + $0x70] sm:$0xff] }
 0x4cc   :  { %3805 = vmatpush3.bf16.msra.mxu0 %v3804_v59  ;;  %v1090_v59 = vld [vmem:[#allocation17 + $0x60] sm:$0xff] }
 0x4cd   :  { %3806 = vmatprep.subr.bf16.mxu0 %v5278_v0  ;;  %3832 = vmatpush3.bf16.msra.mxu1 %v3831_v55  ;;  %v3837_v61 = vpack.c.bf16 %v1091_v60, %v1090_v59  ;;  %v1478_v55 = vld [vmem:[#allocation31 + $0x40] sm:$0xff]  ;;  %v1481_v59 = vld [vmem:[#allocation31 + $0x58] sm:$0xff] }
 0x4ce   :  { %3833 = vmatprep.subr.bf16.mxu1 %v5278_v0  ;;  %v3927_v57 = vpack.c.bf16 %v1479_v56, %v1478_v55  ;;  %v2644_v56 = vld [vmem:[#allocation19] ss:$0 sm:$0xff] }
 0x4d0   :  { %3808 = vmatpush3.bf16.msra.mxu0 %v3807_v62  ;;  %v1092_v62 = vld [vmem:[#allocation17 + $0x70] sm:$0xff] }
 0x4d1   :  { %3809 = vmatprep.subr.bf16.mxu0 %v5278_v0  ;;  %3835 = vmatpush3.bf16.msra.mxu1 %v3834_v58  ;;  %v3840_v2 = vpack.c.bf16 %v1093_v63, %v1092_v62  ;;  %v1480_v58 = vld [vmem:[#allocation31 + $0x50] sm:$0xff]  ;;  %v1483_v62 = vld [vmem:[#allocation31 + $0x68] sm:$0xff] }
 0x4d2   :  { %3836 = vmatprep.subr.bf16.mxu1 %v5278_v0  ;;  %v3930_v60 = vpack.c.bf16 %v1481_v59, %v1480_v58 }
 0x4d4   :  { %3811 = vmatpush3.bf16.msra.mxu0 %v3810_v3  ;;  %v2641_v3 = vld [vmem:[%s6140_s25] ss:$0 sm:$0xff] }
 0x4d5   :  { %3812 = vmatprep.subr.bf16.mxu0 %v5278_v0  ;;  %3838 = vmatpush3.bf16.msra.mxu1 %v3837_v61  ;;  %v1482_v61 = vld [vmem:[#allocation31 + $0x60] sm:$0xff] }
 0x4d6   :  { %3839 = vmatprep.subr.bf16.mxu1 %v5278_v0  ;;  %v3933_v63 = vpack.c.bf16 %v1483_v62, %v1482_v61  ;;  %v1454_v61 = vld [vmem:[#allocation29] sm:$0xff]  ;;  %v1455_v62 = vld [vmem:[#allocation29 + $0x8] sm:$0xff] }
 0x4d8   :  { %3814 = vmatpush3.bf16.msra.mxu0 %v3813_v6 }
 0x4d9   :  { %3815 = vmatprep.subr.bf16.mxu0 %v5278_v0  ;;  %3841 = vmatpush3.bf16.msra.mxu1 %v3840_v2  ;;  %v1484_v2 = vld [vmem:[#allocation31 + $0x70] sm:$0xff] }
 0x4da   :  { %v979_v13 = vpop.f32.mrb[2].mxu1  ;;  %3866 = vmatprep.subr.bf16.mxu1 %v5278_v0 }
 0x4db   :  { %v980_v14 = vadd.f32 %v2642_v9, %v979_v13  ;;  %v3137_v15 = vpop.f32.mrb[3].mxu1  ;;  %v1267_v9 = vld [vmem:[#allocation23 + $0x8] sm:$0xff] }
 0x4dc   :  { %3817 = vmatpush3.bf16.msra.mxu0 %v3816_v10  ;;  %v3867_v13 = vpack.c.bf16 %v1267_v9, %v1266_v8  ;;  %v1268_v15 = vld [vmem:[#allocation23 + $0x10] sm:$0xff]  ;;  %v1629_v9 = vld [vmem:[#allocation32 + $0x18] sm:$0xff] }
 0x4dd   :  { %v5851_v18 = vmax.f32 %v980_v14, 0.0  ;;  %3842 = vmatprep.subr.bf16.mxu0 %v5278_v0  ;;  %v1628_v8 = vld [vmem:[#allocation32 + $0x10] sm:$0xff] }
 0x4df   :  { %3171 = vmatmul.mubr.f32.vlgmr.msra.gmra.mrb[4].mxu0 %v5851_v18 }
 0x4e0   :  { %3844 = vmatpush3.bf16.msra.mxu0 %v3843_v16  ;;  %3240 = vmatprep.mubr.msk.f32.mxu0 %vm5279_vm0, %v5280_v1  ;;  %v1269_v16 = vld [vmem:[#allocation23 + $0x18] sm:$0xff] }
 0x4e1   :  { %3845 = vmatprep.subr.bf16.mxu0 %v5278_v0  ;;  %v3870_v19 = vpack.c.bf16 %v1269_v16, %v1268_v15  ;;  %v1633_v15 = vld [vmem:[#allocation32 + $0x38] sm:$0xff] }
 0x4e4   :  { %3847 = vmatpush3.bf16.msra.mxu0 %v3846_v21  ;;  %v1271_v21 = vld [vmem:[#allocation23 + $0x28] sm:$0xff] }
 0x4e5   :  { %3848 = vmatprep.subr.bf16.mxu0 %v5278_v0  ;;  %v3873_v22 = vpack.c.bf16 %v1271_v21, %v1270_v20  ;;  %v1635_v20 = vld [vmem:[#allocation32 + $0x48] sm:$0xff] }
 0x4e8   :  { %3850 = vmatpush3.bf16.msra.mxu0 %v3849_v24  ;;  %v1273_v24 = vld [vmem:[#allocation23 + $0x38] sm:$0xff] }
 0x4e9   :  { %3851 = vmatprep.subr.bf16.mxu0 %v5278_v0  ;;  %v3876_v25 = vpack.c.bf16 %v1273_v24, %v1272_v23  ;;  %v1637_v23 = vld [vmem:[#allocation32 + $0x58] sm:$0xff] }
 0x4ec   :  { %3853 = vmatpush3.bf16.msra.mxu0 %v3852_v27  ;;  %v1275_v27 = vld [vmem:[#allocation23 + $0x48] sm:$0xff] }
 0x4ed   :  { %3854 = vmatprep.subr.bf16.mxu0 %v5278_v0  ;;  %v3879_v28 = vpack.c.bf16 %v1275_v27, %v1274_v26  ;;  %v1639_v26 = vld [vmem:[#allocation32 + $0x68] sm:$0xff] }
 0x4f0   :  { %3856 = vmatpush3.bf16.msra.mxu0 %v3855_v30  ;;  %v1277_v30 = vld [vmem:[#allocation23 + $0x58] sm:$0xff] }
 0x4f1   :  { %3857 = vmatprep.subr.bf16.mxu0 %v5278_v0  ;;  %v3882_v31 = vpack.c.bf16 %v1277_v30, %v1276_v29  ;;  %v1641_v29 = vld [vmem:[#allocation32 + $0x78] sm:$0xff] }
 0x4f2   :  { %v1360_v30 = vld [vmem:[#allocation26] sm:$0xff] }
 0x4f4   :  { %3859 = vmatpush3.bf16.msra.mxu0 %v3858_v33  ;;  %v1279_v33 = vld [vmem:[#allocation23 + $0x68] sm:$0xff] }
 0x4f5   :  { %3860 = vmatprep.subr.bf16.mxu0 %v5278_v0  ;;  %v3885_v34 = vpack.c.bf16 %v1279_v33, %v1278_v32  ;;  %v1362_v32 = vld [vmem:[#allocation26 + $0x10] sm:$0xff] }
 0x4f8   :  { %3862 = vmatpush3.bf16.msra.mxu0 %v3861_v36  ;;  %v1281_v36 = vld [vmem:[#allocation23 + $0x78] sm:$0xff] }
 0x4f9   :  { %3863 = vmatprep.subr.bf16.mxu0 %v5278_v0  ;;  %v3888_v38 = vpack.c.bf16 %v1281_v36, %v1280_v35 }
 0x4fc   :  { %3865 = vmatpush3.bf16.msra.mxu0 %v3864_v39  ;;  %v1470_v39 = vld [vmem:[#allocation31] sm:$0xff] }
 0x4fd   :  { %3890 = vmatprep.subr.bf16.mxu0 %v5278_v0 }
 0x4ff   :  { %3241 = vmatmul.mubr.f32.vlgmr.msra.gmra.mrb[6].mxu0 %v607_v40  ;;  %v1471_v40 = vld [vmem:[#allocation31 + $0x8] sm:$0xff] }
 0x500   :  { %3310 = vmatprep.mubr.msk.f32.mxu0 %vm5279_vm0, %v5280_v1  ;;  %v3915_v44 = vpack.c.bf16 %v1471_v40, %v1470_v39  ;;  %v1366_v40 = vld [vmem:[#allocation26 + $0x30] sm:$0xff] }
 0x592   :  { %v885_v4 = vpop.f32.mrb[2].mxu0 }
 0x593   :  { %v886_v5 = vadd.f32 %v2641_v3, %v885_v4  ;;  %v3102_v6 = vpop.f32.mrb[3].mxu0  ;;  %v1485_v3 = vld [vmem:[#allocation31 + $0x78] sm:$0xff] }
 0x594   :  { %v3936_v4 = vpack.c.bf16 %v1485_v3, %v1484_v2  ;;  %v1627_v6 = vld [vmem:[#allocation32 + $0x8] sm:$0xff] }
 0x595   :  { %889 = vst [vmem:[#allocation53] sm:$0xff] %v886_v5  ;;  %v1626_v5 = vld [vmem:[#allocation32] sm:$0xff] }
 0x5b2   :  { %v1073_v10 = vpop.f32.mrb[4].mxu0 }
 0x5b3   :  { %v1074_v11 = vadd.f32 %v2643_v7, %v1073_v10  ;;  %v3172_v12 = vpop.f32.mrb[5].mxu0  ;;  %v3963_v7 = vpack.c.bf16 %v1627_v6, %v1626_v5  ;;  %v3966_v10 = vpack.c.bf16 %v1629_v9, %v1628_v8  ;;  %v1456_v6 = vld [vmem:[#allocation29 + $0x10] sm:$0xff]  ;;  %v1458_v9 = vld [vmem:[#allocation29 + $0x20] sm:$0xff] }
 0x5b4   :  { %v1631_v12 = vld [vmem:[#allocation32 + $0x28] sm:$0xff] }
 0x5b5   :  { %v1077_v14 = vmax.f32 %v1074_v11, 0.0  ;;  %v1630_v11 = vld [vmem:[#allocation32 + $0x20] sm:$0xff] }
 0x5b7   :  { %3206 = vmatmul.mubr.f32.vlgmr.msra.gmra.mrb[4].mxu1 %v1077_v14  ;;  %v1632_v14 = vld [vmem:[#allocation32 + $0x30] sm:$0xff] }
 0x5b8   :  { %3868 = vmatpush3.bf16.msra.mxu1 %v3867_v13  ;;  %3275 = vmatprep.mubr.msk.f32.mxu1 %vm5279_vm0, %v5280_v1  ;;  %v3969_v13 = vpack.c.bf16 %v1631_v12, %v1630_v11  ;;  %v3972_v16 = vpack.c.bf16 %v1633_v15, %v1632_v14  ;;  %v1460_v12 = vld [vmem:[#allocation29 + $0x30] sm:$0xff]  ;;  %v1462_v15 = vld [vmem:[#allocation29 + $0x40] sm:$0xff] }
 0x5b9   :  { %3869 = vmatprep.subr.bf16.mxu1 %v5278_v0 }
 0x5bc   :  { %3871 = vmatpush3.bf16.msra.mxu1 %v3870_v19  ;;  %v1634_v19 = vld [vmem:[#allocation32 + $0x40] sm:$0xff] }
 0x5bd   :  { %3872 = vmatprep.subr.bf16.mxu1 %v5278_v0  ;;  %v3975_v21 = vpack.c.bf16 %v1635_v20, %v1634_v19  ;;  %v1464_v20 = vld [vmem:[#allocation29 + $0x50] sm:$0xff] }
 0x5c0   :  { %3874 = vmatpush3.bf16.msra.mxu1 %v3873_v22  ;;  %v1636_v22 = vld [vmem:[#allocation32 + $0x50] sm:$0xff] }
 0x5c1   :  { %3875 = vmatprep.subr.bf16.mxu1 %v5278_v0  ;;  %v3978_v24 = vpack.c.bf16 %v1637_v23, %v1636_v22  ;;  %v1466_v23 = vld [vmem:[#allocation29 + $0x60] sm:$0xff] }
 0x5c4   :  { %3877 = vmatpush3.bf16.msra.mxu1 %v3876_v25  ;;  %v1638_v25 = vld [vmem:[#allocation32 + $0x60] sm:$0xff] }
 0x5c5   :  { %3878 = vmatprep.subr.bf16.mxu1 %v5278_v0  ;;  %v3981_v27 = vpack.c.bf16 %v1639_v26, %v1638_v25  ;;  %v1468_v26 = vld [vmem:[#allocation29 + $0x70] sm:$0xff] }
 0x5c8   :  { %3880 = vmatpush3.bf16.msra.mxu1 %v3879_v28  ;;  %v1640_v28 = vld [vmem:[#allocation32 + $0x70] sm:$0xff] }
 0x5c9   :  { %3881 = vmatprep.subr.bf16.mxu1 %v5278_v0  ;;  %v3984_v35 = vpack.c.bf16 %v1641_v29, %v1640_v28 }
 0x5cc   :  { %3883 = vmatpush3.bf16.msra.mxu1 %v3882_v31  ;;  %v1361_v31 = vld [vmem:[#allocation26 + $0x8] sm:$0xff] }
 0x5cd   :  { %3884 = vmatprep.subr.bf16.mxu1 %v5278_v0  ;;  %v3891_v33 = vpack.c.bf16 %v1361_v31, %v1360_v30 }
 0x5cf   :  { %3892 = vmatpush3.bf16.msra.mxu0 %v3891_v33  ;;  %v1721_v33 = vld [vmem:[#allocation35] sm:$0xff] }
 0x5d0   :  { %3886 = vmatpush3.bf16.msra.mxu1 %v3885_v34  ;;  %v1363_v34 = vld [vmem:[#allocation26 + $0x18] sm:$0xff]  ;;  %3893 = vmatprep.subr.bf16.mxu0 %v5278_v0 }
 0x5d1   :  { %3887 = vmatprep.subr.bf16.mxu1 %v5278_v0  ;;  %v3894_v36 = vpack.c.bf16 %v1363_v34, %v1362_v32  ;;  %v1722_v34 = vld [vmem:[#allocation35 + $0x8] sm:$0xff] }
 0x5d2   :  { %v1261_v41 = vpop.f32.mrb[6].mxu0 }
 0x5d3   :  { %v1262_v42 = vadd.f32 %v2645_v37, %v1261_v41  ;;  %v3242_v43 = vpop.f32.mrb[7].mxu0  ;;  %v1364_v37 = vld [vmem:[#allocation26 + $0x20] sm:$0xff]  ;;  %3895 = vmatpush3.bf16.msra.mxu0 %v3894_v36  ;;  %v1367_v41 = vld [vmem:[#allocation26 + $0x38] sm:$0xff]  ;;  %v3987_v36 = vpack.c.bf16 %v1722_v34, %v1721_v33 }
 0x5d4   :  { %3889 = vmatpush3.bf16.msra.mxu1 %v3888_v38  ;;  %v1365_v38 = vld [vmem:[#allocation26 + $0x28] sm:$0xff]  ;;  %3896 = vmatprep.subr.bf16.mxu0 %v5278_v0  ;;  %v1368_v43 = vld [vmem:[#allocation26 + $0x40] sm:$0xff]  ;;  %v1918_v34 = vld [vmem:[#allocation41 + $0x10] sm:$0xff] }
 0x5d5   :  { %v5885_v45 = vmax.f32 %v1262_v42, 0.0  ;;  %3914 = vmatprep.subr.bf16.mxu1 %v5278_v0  ;;  %v3897_v39 = vpack.c.bf16 %v1365_v38, %v1364_v37  ;;  %v3900_v42 = vpack.c.bf16 %v1367_v41, %v1366_v40  ;;  %v1724_v37 = vld [vmem:[#allocation35 + $0x18] sm:$0xff]  ;;  %v1726_v40 = vld [vmem:[#allocation35 + $0x28] sm:$0xff] }
 0x5d7   :  { %3276 = vmatmul.mubr.f32.vlgmr.msra.gmra.mrb[6].mxu1 %v5885_v45  ;;  %3898 = vmatpush3.bf16.msra.mxu0 %v3897_v39  ;;  %v1725_v39 = vld [vmem:[#allocation35 + $0x20] sm:$0xff] }
 0x5d8   :  { %3916 = vmatpush3.bf16.msra.mxu1 %v3915_v44  ;;  %3345 = vmatprep.mubr.msk.f32.mxu1 %vm5279_vm0, %v5280_v1  ;;  %v1369_v44 = vld [vmem:[#allocation26 + $0x48] sm:$0xff]  ;;  %v3993_v41 = vpack.c.bf16 %v1726_v40, %v1725_v39  ;;  %v1923_v39 = vld [vmem:[#allocation41 + $0x38] sm:$0xff] }
 0x5d9   :  { %3917 = vmatprep.subr.bf16.mxu1 %v5278_v0  ;;  %3899 = vmatprep.subr.bf16.mxu0 %v5278_v0  ;;  %v3903_v46 = vpack.c.bf16 %v1369_v44, %v1368_v43  ;;  %v1728_v43 = vld [vmem:[#allocation35 + $0x38] sm:$0xff] }
 0x5db   :  { %3901 = vmatpush3.bf16.msra.mxu0 %v3900_v42  ;;  %v1727_v42 = vld [vmem:[#allocation35 + $0x30] sm:$0xff] }
 0x5dc   :  { %3919 = vmatpush3.bf16.msra.mxu1 %v3918_v48  ;;  %3902 = vmatprep.subr.bf16.mxu0 %v5278_v0  ;;  %v1371_v48 = vld [vmem:[#allocation26 + $0x58] sm:$0xff]  ;;  %v3996_v44 = vpack.c.bf16 %v1728_v43, %v1727_v42  ;;  %v1925_v42 = vld [vmem:[#allocation41 + $0x48] sm:$0xff] }
 0x5dd   :  { %3920 = vmatprep.subr.bf16.mxu1 %v5278_v0  ;;  %v3906_v49 = vpack.c.bf16 %v1371_v48, %v1370_v47  ;;  %v1730_v47 = vld [vmem:[#allocation35 + $0x48] sm:$0xff] }
 0x5df   :  { %3904 = vmatpush3.bf16.msra.mxu0 %v3903_v46  ;;  %v1729_v46 = vld [vmem:[#allocation35 + $0x40] sm:$0xff] }
 0x5e0   :  { %3922 = vmatpush3.bf16.msra.mxu1 %v3921_v51  ;;  %3905 = vmatprep.subr.bf16.mxu0 %v5278_v0  ;;  %v1373_v51 = vld [vmem:[#allocation26 + $0x68] sm:$0xff]  ;;  %v3999_v48 = vpack.c.bf16 %v1730_v47, %v1729_v46  ;;  %v1927_v46 = vld [vmem:[#allocation41 + $0x58] sm:$0xff] }
 0x5e1   :  { %3923 = vmatprep.subr.bf16.mxu1 %v5278_v0  ;;  %v3909_v52 = vpack.c.bf16 %v1373_v51, %v1372_v50  ;;  %v1732_v50 = vld [vmem:[#allocation35 + $0x58] sm:$0xff] }
 0x5e3   :  { %3907 = vmatpush3.bf16.msra.mxu0 %v3906_v49  ;;  %v1731_v49 = vld [vmem:[#allocation35 + $0x50] sm:$0xff] }
 0x5e4   :  { %3925 = vmatpush3.bf16.msra.mxu1 %v3924_v54  ;;  %3908 = vmatprep.subr.bf16.mxu0 %v5278_v0  ;;  %v1375_v54 = vld [vmem:[#allocation26 + $0x78] sm:$0xff]  ;;  %v4002_v51 = vpack.c.bf16 %v1732_v50, %v1731_v49  ;;  %v1929_v49 = vld [vmem:[#allocation41 + $0x68] sm:$0xff] }
 0x5e5   :  { %3926 = vmatprep.subr.bf16.mxu1 %v5278_v0  ;;  %v3912_v55 = vpack.c.bf16 %v1375_v54, %v1374_v53  ;;  %v1734_v53 = vld [vmem:[#allocation35 + $0x68] sm:$0xff] }
 0x5e7   :  { %3910 = vmatpush3.bf16.msra.mxu0 %v3909_v52  ;;  %v1733_v52 = vld [vmem:[#allocation35 + $0x60] sm:$0xff] }
 0x5e8   :  { %3928 = vmatpush3.bf16.msra.mxu1 %v3927_v57  ;;  %3911 = vmatprep.subr.bf16.mxu0 %v5278_v0  ;;  %v4005_v54 = vpack.c.bf16 %v1734_v53, %v1733_v52  ;;  %v1931_v52 = vld [vmem:[#allocation41 + $0x78] sm:$0xff] }
 0x5e9   :  { %3929 = vmatprep.subr.bf16.mxu1 %v5278_v0 }
 0x5eb   :  { %3913 = vmatpush3.bf16.msra.mxu0 %v3912_v55  ;;  %v1735_v55 = vld [vmem:[#allocation35 + $0x70] sm:$0xff] }
 0x5ec   :  { %3931 = vmatpush3.bf16.msra.mxu1 %v3930_v60  ;;  %3938 = vmatprep.subr.bf16.mxu0 %v5278_v0  ;;  %v2646_v60 = vld [vmem:[#allocation25] ss:$0 sm:$0xff] }
 0x5ed   :  { %3932 = vmatprep.subr.bf16.mxu1 %v5278_v0 }
 0x5f0   :  { %3934 = vmatpush3.bf16.msra.mxu1 %v3933_v63 }
 0x5f1   :  { %3935 = vmatprep.subr.bf16.mxu1 %v5278_v0 }
 0x5f4   :  { %3937 = vmatpush3.bf16.msra.mxu1 %v3936_v4  ;;  %v3939_v4 = vpack.c.bf16 %v1455_v62, %v1454_v61  ;;  %v1814_v62 = vld [vmem:[#allocation38] sm:$0xff] }
 0x5f5   :  { %3962 = vmatprep.subr.bf16.mxu1 %v5278_v0 }
 0x5f7   :  { %3346 = vmatmul.mubr.f32.vlgmr.msra.gmra.mrb[8].mxu1 %v5851_v18 }
 0x5f8   :  { %3964 = vmatpush3.bf16.msra.mxu1 %v3963_v7  ;;  %3415 = vmatprep.mubr.msk.f32.mxu1 %vm5279_vm0, %v5280_v1  ;;  %v1457_v7 = vld [vmem:[#allocation29 + $0x18] sm:$0xff] }
 0x5f9   :  { %3965 = vmatprep.subr.bf16.mxu1 %v5278_v0  ;;  %v3942_v8 = vpack.c.bf16 %v1457_v7, %v1456_v6  ;;  %v1818_v6 = vld [vmem:[#allocation38 + $0x20] sm:$0xff]  ;;  %v1819_v7 = vld [vmem:[#allocation38 + $0x28] sm:$0xff] }
 0x5fc   :  { %3967 = vmatpush3.bf16.msra.mxu1 %v3966_v10  ;;  %v1459_v10 = vld [vmem:[#allocation29 + $0x28] sm:$0xff] }
 0x5fd   :  { %3968 = vmatprep.subr.bf16.mxu1 %v5278_v0  ;;  %v3945_v11 = vpack.c.bf16 %v1459_v10, %v1458_v9  ;;  %v1820_v9 = vld [vmem:[#allocation38 + $0x30] sm:$0xff]  ;;  %v1821_v10 = vld [vmem:[#allocation38 + $0x38] sm:$0xff] }
 0x600   :  { %3970 = vmatpush3.bf16.msra.mxu1 %v3969_v13  ;;  %v1461_v13 = vld [vmem:[#allocation29 + $0x38] sm:$0xff] }
 0x601   :  { %3971 = vmatprep.subr.bf16.mxu1 %v5278_v0  ;;  %v3948_v14 = vpack.c.bf16 %v1461_v13, %v1460_v12  ;;  %v1822_v12 = vld [vmem:[#allocation38 + $0x40] sm:$0xff]  ;;  %v1823_v13 = vld [vmem:[#allocation38 + $0x48] sm:$0xff] }
 0x604   :  { %3973 = vmatpush3.bf16.msra.mxu1 %v3972_v16  ;;  %v1463_v16 = vld [vmem:[#allocation29 + $0x48] sm:$0xff] }
 0x605   :  { %3974 = vmatprep.subr.bf16.mxu1 %v5278_v0  ;;  %v3951_v19 = vpack.c.bf16 %v1463_v16, %v1462_v15  ;;  %v1824_v15 = vld [vmem:[#allocation38 + $0x50] sm:$0xff]  ;;  %v1825_v16 = vld [vmem:[#allocation38 + $0x58] sm:$0xff] }
 0x608   :  { %3976 = vmatpush3.bf16.msra.mxu1 %v3975_v21  ;;  %v1465_v21 = vld [vmem:[#allocation29 + $0x58] sm:$0xff] }
 0x609   :  { %3977 = vmatprep.subr.bf16.mxu1 %v5278_v0  ;;  %v3954_v22 = vpack.c.bf16 %v1465_v21, %v1464_v20  ;;  %v1826_v20 = vld [vmem:[#allocation38 + $0x60] sm:$0xff]  ;;  %v1827_v21 = vld [vmem:[#allocation38 + $0x68] sm:$0xff] }
 0x60c   :  { %3979 = vmatpush3.bf16.msra.mxu1 %v3978_v24  ;;  %v1467_v24 = vld [vmem:[#allocation29 + $0x68] sm:$0xff] }
 0x60d   :  { %3980 = vmatprep.subr.bf16.mxu1 %v5278_v0  ;;  %v3957_v25 = vpack.c.bf16 %v1467_v24, %v1466_v23 }
 0x610   :  { %3982 = vmatpush3.bf16.msra.mxu1 %v3981_v27  ;;  %v1469_v27 = vld [vmem:[#allocation29 + $0x78] sm:$0xff] }
 0x611   :  { %3983 = vmatprep.subr.bf16.mxu1 %v5278_v0  ;;  %v3960_v28 = vpack.c.bf16 %v1469_v27, %v1468_v26  ;;  %v1916_v26 = vld [vmem:[#allocation41] sm:$0xff]  ;;  %v1917_v27 = vld [vmem:[#allocation41 + $0x8] sm:$0xff] }
 0x614   :  { %3985 = vmatpush3.bf16.msra.mxu1 %v3984_v35  ;;  %v1723_v35 = vld [vmem:[#allocation35 + $0x10] sm:$0xff] }
 0x615   :  { %4010 = vmatprep.subr.bf16.mxu1 %v5278_v0  ;;  %v3990_v38 = vpack.c.bf16 %v1724_v37, %v1723_v35  ;;  %v1919_v35 = vld [vmem:[#allocation41 + $0x18] sm:$0xff]  ;;  %v1921_v37 = vld [vmem:[#allocation41 + $0x28] sm:$0xff] }
 0x617   :  { %3416 = vmatmul.mubr.f32.vlgmr.msra.gmra.mrb[10].mxu1 %v5885_v45 }
 0x618   :  { %3485 = vmatprep.mubr.msk.f32.mxu1 %vm5279_vm0, %v5280_v1 }
 0x68a   :  { %v1167_v57 = vpop.f32.mrb[4].mxu1 }
 0x68b   :  { %v1168_v58 = vadd.f32 %v2644_v56, %v1167_v57  ;;  %v3207_v59 = vpop.f32.mrb[5].mxu1  ;;  %v1736_v56 = vld [vmem:[#allocation35 + $0x78] sm:$0xff] }
 0x68c   :  { %v4008_v57 = vpack.c.bf16 %v1736_v56, %v1735_v55  ;;  %v2105_v55 = vld [vmem:[#allocation47 + $0x8] sm:$0xff] }
 0x68d   :  { %1171 = vst [vmem:[#allocation54] sm:$0xff] %v1168_v58  ;;  %v2647_v58 = vld [vmem:[#allocation28] ss:$0 sm:$0xff] }
 0x6aa   :  { %v1355_v63 = vpop.f32.mrb[6].mxu1 }
 0x6ab   :  { %v1356_v2 = vadd.f32 %v2646_v60, %v1355_v63  ;;  %v3277_v3 = vpop.f32.mrb[7].mxu1  ;;  %v1815_v63 = vld [vmem:[#allocation38 + $0x8] sm:$0xff] }
 0x6ac   :  { %v4011_v3 = vpack.c.bf16 %v1815_v63, %v1814_v62  ;;  %v2110_v63 = vld [vmem:[#allocation47 + $0x30] sm:$0xff] }
 0x6ad   :  { %v1359_v5 = vmax.f32 %v1356_v2, 0.0  ;;  %v1816_v2 = vld [vmem:[#allocation38 + $0x10] sm:$0xff] }
 0x6ae   :  { %4012 = vmatpush3.bf16.msra.mxu1 %v4011_v3 }
 0x6af   :  { %3311 = vmatmul.mubr.f32.vlgmr.msra.gmra.mrb[8].mxu0 %v1359_v5  ;;  %4013 = vmatprep.subr.bf16.mxu1 %v5278_v0 }
 0x6b0   :  { %3940 = vmatpush3.bf16.msra.mxu0 %v3939_v4  ;;  %3380 = vmatprep.mubr.msk.f32.mxu0 %vm5279_vm0, %v5280_v1  ;;  %v1817_v4 = vld [vmem:[#allocation38 + $0x18] sm:$0xff] }
 0x6b1   :  { %3941 = vmatprep.subr.bf16.mxu0 %v5278_v0  ;;  %v4014_v5 = vpack.c.bf16 %v1817_v4, %v1816_v2  ;;  %v2111_v2 = vld [vmem:[#allocation47 + $0x38] sm:$0xff]  ;;  %v2113_v4 = vld [vmem:[#allocation47 + $0x48] sm:$0xff] }
 0x6b2   :  { %v4092_v3 = vpack.c.bf16 %v2111_v2, %v2110_v63  ;;  %v2021_v63 = vld [vmem:[#allocation44 + $0x58] sm:$0xff] }
 0x6b3   :  { %4015 = vmatpush3.bf16.msra.mxu1 %v4014_v5 }
 0x6b4   :  { %3943 = vmatpush3.bf16.msra.mxu0 %v3942_v8  ;;  %v4017_v8 = vpack.c.bf16 %v1819_v7, %v1818_v6  ;;  %4016 = vmatprep.subr.bf16.mxu1 %v5278_v0  ;;  %v2114_v6 = vld [vmem:[#allocation47 + $0x50] sm:$0xff]  ;;  %v2115_v7 = vld [vmem:[#allocation47 + $0x58] sm:$0xff] }
 0x6b5   :  { %3944 = vmatprep.subr.bf16.mxu0 %v5278_v0 }
 0x6b7   :  { %4018 = vmatpush3.bf16.msra.mxu1 %v4017_v8  ;;  %v4098_v8 = vpack.c.bf16 %v2115_v7, %v2114_v6  ;;  %v2025_v6 = vld [vmem:[#allocation44 + $0x78] sm:$0xff] }
 0x6b8   :  { %3946 = vmatpush3.bf16.msra.mxu0 %v3945_v11  ;;  %v4020_v11 = vpack.c.bf16 %v1821_v10, %v1820_v9  ;;  %4019 = vmatprep.subr.bf16.mxu1 %v5278_v0  ;;  %v2116_v9 = vld [vmem:[#allocation47 + $0x60] sm:$0xff]  ;;  %v2117_v10 = vld [vmem:[#allocation47 + $0x68] sm:$0xff] }
 0x6b9   :  { %3947 = vmatprep.subr.bf16.mxu0 %v5278_v0 }
 0x6bb   :  { %4021 = vmatpush3.bf16.msra.mxu1 %v4020_v11  ;;  %v4101_v11 = vpack.c.bf16 %v2117_v10, %v2116_v9  ;;  %v2198_v9 = vld [vmem:[%s6141_s2] sm:$0xff]  ;;  %v2199_v10 = vld [vmem:[%s6141_s2 + $0x8] sm:$0xff] }
 0x6bc   :  { %3949 = vmatpush3.bf16.msra.mxu0 %v3948_v14  ;;  %v4023_v14 = vpack.c.bf16 %v1823_v13, %v1822_v12  ;;  %4022 = vmatprep.subr.bf16.mxu1 %v5278_v0  ;;  %v2118_v12 = vld [vmem:[#allocation47 + $0x70] sm:$0xff]  ;;  %v2119_v13 = vld [vmem:[#allocation47 + $0x78] sm:$0xff] }
 0x6bd   :  { %3950 = vmatprep.subr.bf16.mxu0 %v5278_v0 }
 0x6bf   :  { %4024 = vmatpush3.bf16.msra.mxu1 %v4023_v14  ;;  %v4104_v14 = vpack.c.bf16 %v2119_v13, %v2118_v12 }
 0x6c0   :  { %3952 = vmatpush3.bf16.msra.mxu0 %v3951_v19  ;;  %v4026_v19 = vpack.c.bf16 %v1825_v16, %v1824_v15  ;;  %4025 = vmatprep.subr.bf16.mxu1 %v5278_v0  ;;  %v2292_v15 = vld [vmem:[#allocation50] sm:$0xff]  ;;  %v2293_v16 = vld [vmem:[#allocation50 + $0x8] sm:$0xff] }
 0x6c1   :  { %3953 = vmatprep.subr.bf16.mxu0 %v5278_v0 }
 0x6c3   :  { %4027 = vmatpush3.bf16.msra.mxu1 %v4026_v19  ;;  %v4131_v19 = vpack.c.bf16 %v2293_v16, %v2292_v15  ;;  %v2200_v16 = vld [vmem:[%s6141_s2 + $0x10] sm:$0xff] }
 0x6c4   :  { %3955 = vmatpush3.bf16.msra.mxu0 %v3954_v22  ;;  %v4029_v22 = vpack.c.bf16 %v1827_v21, %v1826_v20  ;;  %4028 = vmatprep.subr.bf16.mxu1 %v5278_v0  ;;  %v2294_v20 = vld [vmem:[#allocation50 + $0x10] sm:$0xff]  ;;  %v2295_v21 = vld [vmem:[#allocation50 + $0x18] sm:$0xff] }
 0x6c5   :  { %3956 = vmatprep.subr.bf16.mxu0 %v5278_v0 }
 0x6c7   :  { %4030 = vmatpush3.bf16.msra.mxu1 %v4029_v22  ;;  %v4134_v22 = vpack.c.bf16 %v2295_v21, %v2294_v20  ;;  %v2202_v21 = vld [vmem:[%s6141_s2 + $0x20] sm:$0xff] }
 0x6c8   :  { %3958 = vmatpush3.bf16.msra.mxu0 %v3957_v25  ;;  %4031 = vmatprep.subr.bf16.mxu1 %v5278_v0 }
 0x6c9   :  { %3959 = vmatprep.subr.bf16.mxu0 %v5278_v0 }
 0x6ca   :  { %v5930_v29 = vpop.f32.mrb[8].mxu1 }
 0x6cb   :  { %v3347_v30 = vpop.f32.mrb[9].mxu1 }
 0x6cc   :  { %3961 = vmatpush3.bf16.msra.mxu0 %v3960_v28  ;;  %v2648_v28 = vld [vmem:[#allocation34] ss:$0 sm:$0xff] }
 0x6cd   :  { %3986 = vmatprep.subr.bf16.mxu0 %v5278_v0 }
 0x6cf   :  { %3381 = vmatmul.mubr.f32.vlgmr.msra.gmra.mrb[10].mxu0 %v5824_v17 }
 0x6d0   :  { %3450 = vmatprep.mubr.msk.f32.mxu0 %vm5279_vm0, %v5280_v1  ;;  %3988 = vmatpush3.bf16.msra.mxu0 %v3987_v36  ;;  %v4038_v36 = vpack.c.bf16 %v1919_v35, %v1918_v34  ;;  %v2303_v34 = vld [vmem:[#allocation50 + $0x58] sm:$0xff] }
 0x6d1   :  { %3989 = vmatprep.subr.bf16.mxu0 %v5278_v0 }
 0x6d4   :  { %3991 = vmatpush3.bf16.msra.mxu0 %v3990_v38 }
 0x6d5   :  { %3992 = vmatprep.subr.bf16.mxu0 %v5278_v0 }
 0x6d8   :  { %3994 = vmatpush3.bf16.msra.mxu0 %v3993_v41  ;;  %v1924_v41 = vld [vmem:[#allocation41 + $0x40] sm:$0xff] }
 0x6d9   :  { %3995 = vmatprep.subr.bf16.mxu0 %v5278_v0  ;;  %v4047_v43 = vpack.c.bf16 %v1925_v42, %v1924_v41  ;;  %v2307_v41 = vld [vmem:[#allocation50 + $0x78] sm:$0xff] }
 0x6dc   :  { %3997 = vmatpush3.bf16.msra.mxu0 %v3996_v44  ;;  %v1926_v44 = vld [vmem:[#allocation41 + $0x50] sm:$0xff] }
 0x6dd   :  { %3998 = vmatprep.subr.bf16.mxu0 %v5278_v0  ;;  %v4050_v47 = vpack.c.bf16 %v1927_v46, %v1926_v44  ;;  %v2011_v44 = vld [vmem:[#allocation44 + $0x8] sm:$0xff]  ;;  %v2649_v46 = vld [vmem:[#allocation37] ss:$0 sm:$0xff] }
 0x6e0   :  { %4000 = vmatpush3.bf16.msra.mxu0 %v3999_v48  ;;  %v1928_v48 = vld [vmem:[#allocation41 + $0x60] sm:$0xff] }
 0x6e1   :  { %4001 = vmatprep.subr.bf16.mxu0 %v5278_v0  ;;  %v4053_v50 = vpack.c.bf16 %v1929_v49, %v1928_v48 }
 0x6e4   :  { %4003 = vmatpush3.bf16.msra.mxu0 %v4002_v51  ;;  %v1930_v51 = vld [vmem:[#allocation41 + $0x70] sm:$0xff] }
 0x6e5   :  { %4004 = vmatprep.subr.bf16.mxu0 %v5278_v0  ;;  %v4056_v53 = vpack.c.bf16 %v1931_v52, %v1930_v51  ;;  %v2012_v51 = vld [vmem:[#allocation44 + $0x10] sm:$0xff]  ;;  %v2013_v52 = vld [vmem:[#allocation44 + $0x18] sm:$0xff] }
 0x6e8   :  { %4006 = vmatpush3.bf16.msra.mxu0 %v4005_v54  ;;  %v2104_v54 = vld [vmem:[#allocation47] sm:$0xff] }
 0x6e9   :  { %4007 = vmatprep.subr.bf16.mxu0 %v5278_v0  ;;  %v4083_v56 = vpack.c.bf16 %v2105_v55, %v2104_v54  ;;  %v2014_v54 = vld [vmem:[#allocation44 + $0x20] sm:$0xff]  ;;  %v2015_v55 = vld [vmem:[#allocation44 + $0x28] sm:$0xff] }
 0x6ea   :  { %v5936_v31 = vpop.f32.mrb[10].mxu1 }
 0x6eb   :  { %v3417_v32 = vpop.f32.mrb[11].mxu1 }
 0x6ec   :  { %4009 = vmatpush3.bf16.msra.mxu0 %v4008_v57  ;;  %v4035_v32 = vpack.c.bf16 %v1917_v27, %v1916_v26  ;;  %v2106_v57 = vld [vmem:[#allocation47 + $0x10] sm:$0xff]  ;;  %v2299_v27 = vld [vmem:[#allocation50 + $0x38] sm:$0xff] }
 0x6ed   :  { %4034 = vmatprep.subr.bf16.mxu0 %v5278_v0  ;;  %v2298_v26 = vld [vmem:[#allocation50 + $0x30] sm:$0xff] }
 0x782   :  { %v1449_v59 = vpop.f32.mrb[8].mxu0 }
 0x783   :  { %v1450_v60 = vadd.f32 %v2647_v58, %v1449_v59  ;;  %v3312_v61 = vpop.f32.mrb[9].mxu0  ;;  %v2107_v58 = vld [vmem:[#allocation47 + $0x18] sm:$0xff] }
 0x784   :  { %v4086_v59 = vpack.c.bf16 %v2107_v58, %v2106_v57  ;;  %v2109_v61 = vld [vmem:[#allocation47 + $0x28] sm:$0xff]  ;;  %v2017_v57 = vld [vmem:[#allocation44 + $0x38] sm:$0xff] }
 0x785   :  { %1453 = vst [vmem:[#allocation56] sm:$0xff] %v1450_v60  ;;  %v2108_v60 = vld [vmem:[#allocation47 + $0x20] sm:$0xff] }
 0x786   :  { %v4089_v62 = vpack.c.bf16 %v2109_v61, %v2108_v60  ;;  %v2019_v60 = vld [vmem:[#allocation44 + $0x48] sm:$0xff] }
 0x7a2   :  { %v1622_v23 = vpop.f32.mrb[10].mxu0 }
 0x7a3   :  { %v1623_v24 = vadd.f32 %v1622_v23, %v5930_v29  ;;  %v3382_v25 = vpop.f32.mrb[11].mxu0  ;;  %v1920_v29 = vld [vmem:[#allocation41 + $0x20] sm:$0xff] }
 0x7a4   :  { %v4041_v38 = vpack.c.bf16 %v1921_v37, %v1920_v29  ;;  %v2296_v23 = vld [vmem:[#allocation50 + $0x20] sm:$0xff]  ;;  %v1829_v29 = vld [vmem:[#allocation38 + $0x78] sm:$0xff] }
 0x7a5   :  { %v1712_v30 = vadd.f32 %v5936_v31, %v1623_v24  ;;  %v1922_v31 = vld [vmem:[#allocation41 + $0x30] sm:$0xff]  ;;  %v2304_v37 = vld [vmem:[#allocation50 + $0x60] sm:$0xff] }
 0x7a6   :  { %v4044_v40 = vpack.c.bf16 %v1923_v39, %v1922_v31  ;;  %v2297_v24 = vld [vmem:[#allocation50 + $0x28] sm:$0xff] }
 0x7a7   :  { %v1720_v33 = vadd.f32 %v2648_v28, %v1712_v30  ;;  %v4137_v25 = vpack.c.bf16 %v2297_v24, %v2296_v23  ;;  %v4140_v28 = vpack.c.bf16 %v2299_v27, %v2298_v26  ;;  %v2301_v30 = vld [vmem:[#allocation50 + $0x48] sm:$0xff]  ;;  %v2206_v27 = vld [vmem:[%s6141_s2 + $0x40] sm:$0xff] }
 0x7a8   :  { %v2204_v24 = vld [vmem:[%s6141_s2 + $0x30] sm:$0xff] }
 0x7a9   :  { %3451 = vmatmul.mubr.f32.vlgmr.msra.gmra.mrb[12].mxu0 %v1720_v33  ;;  %v2302_v33 = vld [vmem:[#allocation50 + $0x50] sm:$0xff] }
 0x7aa   :  { %4036 = vmatpush3.bf16.msra.mxu0 %v4035_v32  ;;  %3520 = vmatprep.mubr.msk.f32.mxu0 %vm5279_vm0, %v5280_v1  ;;  %v4146_v35 = vpack.c.bf16 %v2303_v34, %v2302_v33  ;;  %v2210_v34 = vld [vmem:[%s6141_s2 + $0x60] sm:$0xff] }
 0x7ab   :  { %4037 = vmatprep.subr.bf16.mxu0 %v5278_v0 }
 0x7ae   :  { %4039 = vmatpush3.bf16.msra.mxu0 %v4038_v36  ;;  %v1828_v36 = vld [vmem:[#allocation38 + $0x70] sm:$0xff] }
 0x7af   :  { %4040 = vmatprep.subr.bf16.mxu0 %v5278_v0  ;;  %v4032_v31 = vpack.c.bf16 %v1829_v29, %v1828_v36  ;;  %v2212_v29 = vld [vmem:[%s6141_s2 + $0x70] sm:$0xff] }
 0x7b1   :  { %4033 = vmatpush3.bf16.msra.mxu1 %v4032_v31 }
 0x7b2   :  { %4042 = vmatpush3.bf16.msra.mxu0 %v4041_v38  ;;  %v2305_v38 = vld [vmem:[#allocation50 + $0x68] sm:$0xff]  ;;  %4058 = vmatprep.subr.bf16.mxu1 %v5278_v0 }
 0x7b3   :  { %4043 = vmatprep.subr.bf16.mxu0 %v5278_v0  ;;  %v4149_v39 = vpack.c.bf16 %v2305_v38, %v2304_v37  ;;  %v2213_v37 = vld [vmem:[%s6141_s2 + $0x78] sm:$0xff]  ;;  %v2654_v38 = vld [vmem:[#allocation49] ss:$0 sm:$0xff] }
 0x7b4   :  { %v4128_v31 = vpack.c.bf16 %v2213_v37, %v2212_v29 }
 0x7b6   :  { %4045 = vmatpush3.bf16.msra.mxu0 %v4044_v40  ;;  %v2306_v40 = vld [vmem:[#allocation50 + $0x70] sm:$0xff] }
 0x7b7   :  { %4046 = vmatprep.subr.bf16.mxu0 %v5278_v0  ;;  %v4152_v42 = vpack.c.bf16 %v2307_v41, %v2306_v40  ;;  %v2387_v40 = vld [vmem:[#allocation52 + $0x8] sm:$0xff] }
 0x7ba   :  { %4048 = vmatpush3.bf16.msra.mxu0 %v4047_v43  ;;  %v2010_v43 = vld [vmem:[#allocation44] sm:$0xff] }
 0x7bb   :  { %4049 = vmatprep.subr.bf16.mxu0 %v5278_v0  ;;  %v4059_v48 = vpack.c.bf16 %v2011_v44, %v2010_v43 }
 0x7be   :  { %4051 = vmatpush3.bf16.msra.mxu0 %v4050_v47 }
 0x7bf   :  { %4052 = vmatprep.subr.bf16.mxu0 %v5278_v0 }
 0x7c2   :  { %4054 = vmatpush3.bf16.msra.mxu0 %v4053_v50 }
 0x7c3   :  { %4055 = vmatprep.subr.bf16.mxu0 %v5278_v0 }
 0x7c6   :  { %4057 = vmatpush3.bf16.msra.mxu0 %v4056_v53  ;;  %v4062_v53 = vpack.c.bf16 %v2013_v52, %v2012_v51  ;;  %v2391_v51 = vld [vmem:[#allocation52 + $0x28] sm:$0xff] }
 0x7c7   :  { %4082 = vmatprep.subr.bf16.mxu0 %v5278_v0 }
 0x7c9   :  { %3521 = vmatmul.mubr.f32.vlgmr.msra.gmra.mrb[14].mxu0 %v5824_v17  ;;  %v2112_v17 = vld [vmem:[#allocation47 + $0x40] sm:$0xff] }
 0x7ca   :  { %4084 = vmatpush3.bf16.msra.mxu0 %v4083_v56  ;;  %3590 = vmatprep.mubr.msk.f32.mxu0 %vm5279_vm0, %v5280_v1  ;;  %v4095_v5 = vpack.c.bf16 %v2113_v4, %v2112_v17  ;;  %v2016_v56 = vld [vmem:[#allocation44 + $0x30] sm:$0xff]  ;;  %v2023_v17 = vld [vmem:[#allocation44 + $0x68] sm:$0xff] }
 0x7cb   :  { %4085 = vmatprep.subr.bf16.mxu0 %v5278_v0  ;;  %v4068_v58 = vpack.c.bf16 %v2017_v57, %v2016_v56  ;;  %v2395_v56 = vld [vmem:[#allocation52 + $0x48] sm:$0xff] }
 0x7ce   :  { %4087 = vmatpush3.bf16.msra.mxu0 %v4086_v59  ;;  %v2018_v59 = vld [vmem:[#allocation44 + $0x40] sm:$0xff] }
 0x7cf   :  { %4088 = vmatprep.subr.bf16.mxu0 %v5278_v0  ;;  %v4071_v61 = vpack.c.bf16 %v2019_v60, %v2018_v59  ;;  %v2398_v60 = vld [vmem:[#allocation52 + $0x60] sm:$0xff] }
 0x7d2   :  { %4090 = vmatpush3.bf16.msra.mxu0 %v4089_v62  ;;  %v2020_v62 = vld [vmem:[#allocation44 + $0x50] sm:$0xff] }
 0x7d3   :  { %4091 = vmatprep.subr.bf16.mxu0 %v5278_v0  ;;  %v4074_v2 = vpack.c.bf16 %v2021_v63, %v2020_v62  ;;  %v2400_v63 = vld [vmem:[#allocation52 + $0x70] sm:$0xff] }
 0x7d6   :  { %4093 = vmatpush3.bf16.msra.mxu0 %v4092_v3  ;;  %v2022_v3 = vld [vmem:[#allocation44 + $0x60] sm:$0xff] }
 0x7d7   :  { %4094 = vmatprep.subr.bf16.mxu0 %v5278_v0  ;;  %v4077_v4 = vpack.c.bf16 %v2023_v17, %v2022_v3  ;;  %v2656_v3 = vld [vmem:[%s6142_s21] ss:$0 sm:$0xff] }
 0x7da   :  { %4096 = vmatpush3.bf16.msra.mxu0 %v4095_v5  ;;  %v2024_v5 = vld [vmem:[#allocation44 + $0x70] sm:$0xff] }
 0x7db   :  { %4097 = vmatprep.subr.bf16.mxu0 %v5278_v0  ;;  %v4080_v7 = vpack.c.bf16 %v2025_v6, %v2024_v5 }
 0x7de   :  { %4099 = vmatpush3.bf16.msra.mxu0 %v4098_v8  ;;  %v2652_v8 = vld [vmem:[#allocation43] ss:$0 sm:$0xff] }
 0x7df   :  { %4100 = vmatprep.subr.bf16.mxu0 %v5278_v0 }
 0x7e2   :  { %4102 = vmatpush3.bf16.msra.mxu0 %v4101_v11 }
 0x7e3   :  { %4103 = vmatprep.subr.bf16.mxu0 %v5278_v0 }
 0x7e6   :  { %4105 = vmatpush3.bf16.msra.mxu0 %v4104_v14  ;;  %v4107_v14 = vpack.c.bf16 %v2199_v10, %v2198_v9 }
 0x7e7   :  { %4130 = vmatprep.subr.bf16.mxu0 %v5278_v0 }
 0x7e9   :  { %3591 = vmatmul.mubr.f32.vlgmr.msra.gmra.mrb[16].mxu0 %v5851_v18  ;;  %v2300_v18 = vld [vmem:[#allocation50 + $0x40] sm:$0xff] }
 0x7ea   :  { %4132 = vmatpush3.bf16.msra.mxu0 %v4131_v19  ;;  %3660 = vmatprep.mubr.msk.f32.mxu0 %vm5279_vm0, %v5280_v1  ;;  %v4143_v32 = vpack.c.bf16 %v2301_v30, %v2300_v18  ;;  %v2201_v19 = vld [vmem:[%s6141_s2 + $0x18] sm:$0xff]  ;;  %v2208_v30 = vld [vmem:[%s6141_s2 + $0x50] sm:$0xff] }
 0x7eb   :  { %4133 = vmatprep.subr.bf16.mxu0 %v5278_v0  ;;  %v4110_v20 = vpack.c.bf16 %v2201_v19, %v2200_v16 }
 0x7ee   :  { %4135 = vmatpush3.bf16.msra.mxu0 %v4134_v22  ;;  %v2203_v22 = vld [vmem:[%s6141_s2 + $0x28] sm:$0xff] }
 0x7ef   :  { %4136 = vmatprep.subr.bf16.mxu0 %v5278_v0  ;;  %v4113_v23 = vpack.c.bf16 %v2203_v22, %v2202_v21 }
 0x7f2   :  { %4138 = vmatpush3.bf16.msra.mxu0 %v4137_v25  ;;  %v2205_v25 = vld [vmem:[%s6141_s2 + $0x38] sm:$0xff] }
 0x7f3   :  { %4139 = vmatprep.subr.bf16.mxu0 %v5278_v0  ;;  %v4116_v26 = vpack.c.bf16 %v2205_v25, %v2204_v24 }
 0x7f6   :  { %4141 = vmatpush3.bf16.msra.mxu0 %v4140_v28  ;;  %v2207_v28 = vld [vmem:[%s6141_s2 + $0x48] sm:$0xff] }
 0x7f7   :  { %4142 = vmatprep.subr.bf16.mxu0 %v5278_v0  ;;  %v4119_v18 = vpack.c.bf16 %v2207_v28, %v2206_v27 }
 0x7fa   :  { %4144 = vmatpush3.bf16.msra.mxu0 %v4143_v32  ;;  %v2209_v32 = vld [vmem:[%s6141_s2 + $0x58] sm:$0xff] }
 0x7fb   :  { %4145 = vmatprep.subr.bf16.mxu0 %v5278_v0  ;;  %v4122_v33 = vpack.c.bf16 %v2209_v32, %v2208_v30 }
 0x7fe   :  { %4147 = vmatpush3.bf16.msra.mxu0 %v4146_v35  ;;  %v2211_v35 = vld [vmem:[%s6141_s2 + $0x68] sm:$0xff] }
 0x7ff   :  { %4148 = vmatprep.subr.bf16.mxu0 %v5278_v0  ;;  %v4125_v36 = vpack.c.bf16 %v2211_v35, %v2210_v34 }
 0x802   :  { %4150 = vmatpush3.bf16.msra.mxu0 %v4149_v39  ;;  %v2386_v39 = vld [vmem:[#allocation52] sm:$0xff] }
 0x803   :  { %4151 = vmatprep.subr.bf16.mxu0 %v5278_v0  ;;  %v4155_v44 = vpack.c.bf16 %v2387_v40, %v2386_v39 }
 0x806   :  { %4153 = vmatpush3.bf16.msra.mxu0 %v4152_v42 }
 0x809   :  { %3661 = vmatmul.mubr.f32.vlgmr.msra.gmra.mrb[18].mxu0 %v5885_v45  ;;  %v4065_v45 = vpack.c.bf16 %v2015_v55, %v2014_v54  ;;  %v2393_v54 = vld [vmem:[#allocation52 + $0x38] sm:$0xff] }
 0x87c   :  { %v1810_v47 = vpop.f32.mrb[12].mxu0 }
 0x87d   :  { %v1811_v49 = vadd.f32 %v2649_v46, %v1810_v47  ;;  %v3452_v50 = vpop.f32.mrb[13].mxu0  ;;  %v2388_v47 = vld [vmem:[#allocation52 + $0x10] sm:$0xff] }
 0x87e   :  { %v2390_v50 = vld [vmem:[#allocation52 + $0x20] sm:$0xff] }
 0x87f   :  { %3486 = vmatmul.mubr.f32.vlgmr.msra.gmra.mrb[12].mxu1 %v1811_v49  ;;  %v4161_v52 = vpack.c.bf16 %v2391_v51, %v2390_v50 }
 0x880   :  { %4060 = vmatpush3.bf16.msra.mxu1 %v4059_v48  ;;  %3555 = vmatprep.mubr.msk.f32.mxu1 %vm5279_vm0, %v5280_v1  ;;  %v2389_v48 = vld [vmem:[#allocation52 + $0x18] sm:$0xff] }
 0x881   :  { %4061 = vmatprep.subr.bf16.mxu1 %v5278_v0  ;;  %v4158_v49 = vpack.c.bf16 %v2389_v48, %v2388_v47 }
 0x884   :  { %4063 = vmatpush3.bf16.msra.mxu1 %v4062_v53  ;;  %v2392_v53 = vld [vmem:[#allocation52 + $0x30] sm:$0xff] }
 0x885   :  { %4064 = vmatprep.subr.bf16.mxu1 %v5278_v0  ;;  %v4164_v55 = vpack.c.bf16 %v2393_v54, %v2392_v53 }
 0x888   :  { %4066 = vmatpush3.bf16.msra.mxu1 %v4065_v45  ;;  %v2394_v45 = vld [vmem:[#allocation52 + $0x40] sm:$0xff] }
 0x889   :  { %4067 = vmatprep.subr.bf16.mxu1 %v5278_v0  ;;  %v4167_v57 = vpack.c.bf16 %v2395_v56, %v2394_v45 }
 0x88c   :  { %4069 = vmatpush3.bf16.msra.mxu1 %v4068_v58  ;;  %v2397_v58 = vld [vmem:[#allocation52 + $0x58] sm:$0xff] }
 0x88d   :  { %4070 = vmatprep.subr.bf16.mxu1 %v5278_v0 }
 0x890   :  { %4072 = vmatpush3.bf16.msra.mxu1 %v4071_v61  ;;  %v2399_v61 = vld [vmem:[#allocation52 + $0x68] sm:$0xff] }
 0x891   :  { %4073 = vmatprep.subr.bf16.mxu1 %v5278_v0  ;;  %v4173_v62 = vpack.c.bf16 %v2399_v61, %v2398_v60 }
 0x894   :  { %4075 = vmatpush3.bf16.msra.mxu1 %v4074_v2  ;;  %v2401_v2 = vld [vmem:[#allocation52 + $0x78] sm:$0xff] }
 0x895   :  { %4076 = vmatprep.subr.bf16.mxu1 %v5278_v0  ;;  %v4176_v17 = vpack.c.bf16 %v2401_v2, %v2400_v63 }
 0x898   :  { %4078 = vmatpush3.bf16.msra.mxu1 %v4077_v4 }
 0x899   :  { %4079 = vmatprep.subr.bf16.mxu1 %v5278_v0 }
 0x89c   :  { %v2005_v11 = vpop.f32.mrb[14].mxu0  ;;  %4081 = vmatpush3.bf16.msra.mxu1 %v4080_v7 }
 0x89d   :  { %v2006_v12 = vadd.f32 %v2652_v8, %v2005_v11  ;;  %v3522_v13 = vpop.f32.mrb[15].mxu0  ;;  %4106 = vmatprep.subr.bf16.mxu1 %v5278_v0 }
 0x89f   :  { %v2009_v15 = vmax.f32 %v2006_v12, 0.0 }
 0x8a1   :  { %3556 = vmatmul.mubr.f32.vlgmr.msra.gmra.mrb[14].mxu1 %v2009_v15 }
 0x8a2   :  { %4108 = vmatpush3.bf16.msra.mxu1 %v4107_v14  ;;  %3625 = vmatprep.mubr.msk.f32.mxu1 %vm5279_vm0, %v5280_v1 }
 0x8a3   :  { %4109 = vmatprep.subr.bf16.mxu1 %v5278_v0 }
 0x8a6   :  { %4111 = vmatpush3.bf16.msra.mxu1 %v4110_v20 }
 0x8a7   :  { %4112 = vmatprep.subr.bf16.mxu1 %v5278_v0 }
 0x8aa   :  { %4114 = vmatpush3.bf16.msra.mxu1 %v4113_v23 }
 0x8ab   :  { %4115 = vmatprep.subr.bf16.mxu1 %v5278_v0 }
 0x8ae   :  { %4117 = vmatpush3.bf16.msra.mxu1 %v4116_v26 }
 0x8af   :  { %4118 = vmatprep.subr.bf16.mxu1 %v5278_v0 }
 0x8b2   :  { %4120 = vmatpush3.bf16.msra.mxu1 %v4119_v18 }
 0x8b3   :  { %4121 = vmatprep.subr.bf16.mxu1 %v5278_v0 }
 0x8b6   :  { %4123 = vmatpush3.bf16.msra.mxu1 %v4122_v33 }
 0x8b7   :  { %4124 = vmatprep.subr.bf16.mxu1 %v5278_v0 }
 0x8ba   :  { %4126 = vmatpush3.bf16.msra.mxu1 %v4125_v36 }
 0x8bb   :  { %4127 = vmatprep.subr.bf16.mxu1 %v5278_v0 }
 0x8bc   :  { %v2193_v41 = vpop.f32.mrb[16].mxu0 }
 0x8bd   :  { %v2194_v42 = vadd.f32 %v2654_v38, %v2193_v41  ;;  %v3592_v43 = vpop.f32.mrb[17].mxu0 }
 0x8be   :  { %4129 = vmatpush3.bf16.msra.mxu1 %v4128_v31 }
 0x8bf   :  { %v2197_v46 = vmax.f32 %v2194_v42, 0.0  ;;  %4154 = vmatprep.subr.bf16.mxu1 %v5278_v0 }
 0x8c1   :  { %3626 = vmatmul.mubr.f32.vlgmr.msra.gmra.mrb[16].mxu1 %v2197_v46 }
 0x8c2   :  { %4156 = vmatpush3.bf16.msra.mxu1 %v4155_v44  ;;  %3695 = vmatprep.mubr.msk.f32.mxu1 %vm5279_vm0, %v5280_v1  ;;  %v2396_v1 = vld [vmem:[#allocation52 + $0x50] sm:$0xff] }
 0x8c3   :  { %4157 = vmatprep.subr.bf16.mxu1 %v5278_v0  ;;  %v4170_v59 = vpack.c.bf16 %v2397_v58, %v2396_v1 }
 0x8c6   :  { %4159 = vmatpush3.bf16.msra.mxu1 %v4158_v49 }
 0x8c7   :  { %4160 = vmatprep.subr.bf16.mxu1 %v5278_v0 }
 0x8ca   :  { %4162 = vmatpush3.bf16.msra.mxu1 %v4161_v52 }
 0x8cb   :  { %4163 = vmatprep.subr.bf16.mxu1 %v5278_v0 }
 0x8ce   :  { %4165 = vmatpush3.bf16.msra.mxu1 %v4164_v55 }
 0x8cf   :  { %4166 = vmatprep.subr.bf16.mxu1 %v5278_v0 }
 0x8d2   :  { %4168 = vmatpush3.bf16.msra.mxu1 %v4167_v57 }
 0x8d3   :  { %4169 = vmatprep.subr.bf16.mxu1 %v5278_v0 }
 0x8d6   :  { %4171 = vmatpush3.bf16.msra.mxu1 %v4170_v59 }
 0x8d7   :  { %4172 = vmatprep.subr.bf16.mxu1 %v5278_v0 }
 0x8da   :  { %4174 = vmatpush3.bf16.msra.mxu1 %v4173_v62 }
 0x8db   :  { %4175 = vmatprep.subr.bf16.mxu1 %v5278_v0 }
 0x8dc   :  { %v2381_v4 = vpop.f32.mrb[18].mxu0 }
 0x8dd   :  { %v2382_v5 = vadd.f32 %v2656_v3, %v2381_v4  ;;  %v3662_v6 = vpop.f32.mrb[19].mxu0 }
 0x8de   :  { %4177 = vmatpush3.bf16.msra.mxu1 %v4176_v17 }
 0x8df   :  { %v2385_v7 = vmax.f32 %v2382_v5, 0.0 }
 0x8e1   :  { %3696 = vmatmul.mubr.f32.vlgmr.msra.gmra.mrb[18].mxu1 %v2385_v7 }
 0x8e2   :  { %5011 = shalt.err (!%p5008_p2)
}
 0x8e3   :  { %s6143_s6 = sld [smem:[#allocation112_spill]] }
 0x8e9   :  { %s5012_s15 = scalar_lea.hbm %s6143_s6, 128 }
 0x8ea   :  { %p5013_p3 = scmp.ne.s32.totalorder %s6143_s6, %s5012_s15  ;;  %p5016_p4 = scmp.lt.u32.totalorder %s5012_s15, %s6143_s6 }
 0x8ec   :  { %p5018_p5 = pnand %p5016_p4, %p5013_p3 }
 0x8ee   :  { %5021 = shalt.err (!%p5018_p5)
}
 0x8ef   :  { %2499 = dma.vmem_to_hbm [thread:$0]  %s2497_s24, 128, %s6143_s6, [#allocation55]  }
 0x8f0   :  { %s5282_s27 = smov [#allocation53]  }
 0x8f1   :  { %s2486_s16 = sshll.u32 %s5282_s27, 4  ;;  %s2487_s16 = int_to_ptr.vmem [resolvable:$true] %s2486_s16 }
 0x8f2   :  { %s5022_s12 = scalar_lea.vmem %s2487_s16, 128  ;;  %p5027_p7 = scmp.lt.s32.totalorder %s2487_s16, %s2487_s16 }
 0x8f3   :  { %p5023_p6 = scmp.ne.s32.totalorder %s2487_s16, %s5022_s12  ;;  %p5028_p8 = scmp.lt.s32.totalorder %s5022_s12, %s5022_s12 }
 0x8f5   :  { %p5029_p9 = por %p5028_p8, %p5027_p7 }
 0x8f7   :  { %p5030_p10 = pnand %p5029_p9, %p5023_p6 }
 0x8f9   :  { %5033 = shalt.err (!%p5030_p10)
}
 0x8fa   :  { %s6144_s18 = sld [smem:[#allocation111_spill]] }
 0x900   :  { %s5034_s0 = scalar_lea.hbm %s6144_s18, 128 }
 0x901   :  { %p5035_p11 = scmp.ne.s32.totalorder %s6144_s18, %s5034_s0  ;;  %p5038_p12 = scmp.lt.u32.totalorder %s5034_s0, %s6144_s18 }
 0x903   :  { %p5040_p13 = pnand %p5038_p12, %p5035_p11 }
 0x905   :  { %5043 = shalt.err (!%p5040_p13)
}
 0x906   :  { %2489 = dma.vmem_to_hbm [thread:$0]  %s2487_s16, 128, %s6144_s18, [#allocation4]  }
 0x907   :  { %s5283_s22 = smov [#allocation56]  }
 0x908   :  { %s2506_s20 = sshll.u32 %s5283_s22, 4  ;;  %s2507_s20 = int_to_ptr.vmem [resolvable:$true] %s2506_s20 }
 0x909   :  { %s5044_s17 = scalar_lea.vmem %s2507_s20, 128  ;;  %p5049_p1 = scmp.lt.s32.totalorder %s2507_s20, %s2507_s20 }
 0x90a   :  { %p5045_p0 = scmp.ne.s32.totalorder %s2507_s20, %s5044_s17  ;;  %p5050_p2 = scmp.lt.s32.totalorder %s5044_s17, %s5044_s17 }
 0x90c   :  { %p5051_p3 = por %p5050_p2, %p5049_p1 }
 0x90e   :  { %p5052_p4 = pnand %p5051_p3, %p5045_p0 }
 0x910   :  { %5055 = shalt.err (!%p5052_p4)
}
 0x911   :  { %s6145_s30 = sld [smem:[#allocation113_spill]] }
 0x917   :  { %s5056_s4 = scalar_lea.hbm %s6145_s30, 128 }
 0x918   :  { %p5057_p5 = scmp.ne.s32.totalorder %s6145_s30, %s5056_s4  ;;  %p5060_p6 = scmp.lt.u32.totalorder %s5056_s4, %s6145_s30 }
 0x91a   :  { %p5062_p7 = pnand %p5060_p6, %p5057_p5 }
 0x91c   :  { %5065 = shalt.err (!%p5062_p7)
}
 0x91d   :  { %2509 = dma.vmem_to_hbm [thread:$0]  %s2507_s20, 128, %s6145_s30, [#allocation55]   ;;  %v2650_v0 = vld [vmem:[#allocation40] ss:$0 sm:$0xff]  ;;  %v2653_v19 = vld [vmem:[#allocation46] ss:$0 sm:$0xff] }
 0x91e   :  { %s5284_s14 = smov [#allocation57]   ;;  %s5285_s3 = smov [#allocation59]  }
 0x91f   :  { %s2516_s23 = sshll.u32 %s5284_s14, 4  ;;  %s2526_s26 = sshll.u32 %s5285_s3, 4  ;;  %s2517_s23 = int_to_ptr.vmem [resolvable:$true] %s2516_s23  ;;  %s2527_s26 = int_to_ptr.vmem [resolvable:$true] %s2526_s26 }
 0x920   :  { %s5066_s28 = scalar_lea.vmem %s2517_s23, 128  ;;  %p5071_p9 = scmp.lt.s32.totalorder %s2517_s23, %s2517_s23 }
 0x921   :  { %p5067_p8 = scmp.ne.s32.totalorder %s2517_s23, %s5066_s28  ;;  %p5072_p10 = scmp.lt.s32.totalorder %s5066_s28, %s5066_s28 }
 0x923   :  { %p5073_p11 = por %p5072_p10, %p5071_p9 }
 0x925   :  { %p5074_p12 = pnand %p5073_p11, %p5067_p8 }
 0x952   :  { %v1903_v8 = vpop.f32.mrb[12].mxu1 }
 0x953   :  { %v1904_v9 = vadd.f32 %v2650_v0, %v1903_v8  ;;  %v3487_v10 = vpop.f32.mrb[13].mxu1 }
 0x955   :  { %v1907_v11 = vsub.f32 0.0, %v1904_v9 }
 0x957   :  { %v1908_v12 = vmul.f32 1.442695, %v1907_v11 }
 0x959   :  { %4270 = vpow2.f32 %v1908_v12 }
 0x963   :  { %v4271_v13 = vpop.eup %4270 }
 0x964   :  { %v1910_v14 = vadd.f32 1.0, %v4271_v13 }
 0x966   :  { %4272 = vrcp.f32 %v1910_v14 }
 0x970   :  { %v4273_v15 = vpop.eup %4272 }
 0x971   :  { %v1913_v16 = vmul.f32 6.0, %v4273_v15 }
 0x973   :  { %v2651_v20 = vadd.f32 -3.0, %v1913_v16 }
 0x974   :  { %v2099_v21 = vpop.f32.mrb[14].mxu1 }
 0x975   :  { %v2100_v22 = vadd.f32 %v2653_v19, %v2099_v21  ;;  %v3557_v23 = vpop.f32.mrb[15].mxu1  ;;  %1915 = vst [vmem:[#allocation57] sm:$0xff] %v2651_v20 }
 0x976   :  { %5077 = shalt.err (!%p5074_p12)
}
 0x977   :  { %s5078_s1 = scalar_lea.hbm %s5516_s29, 128 }
 0x978   :  { %p5079_p13 = scmp.ne.s32.totalorder %s5516_s29, %s5078_s1  ;;  %p5082_p0 = scmp.lt.u32.totalorder %s5078_s1, %s5516_s29 }
 0x97a   :  { %p5084_p1 = pnand %p5082_p0, %p5079_p13 }
 0x97c   :  { %5087 = shalt.err (!%p5084_p1)
}
 0x97d   :  { %2519 = dma.vmem_to_hbm [thread:$0]  %s2517_s23, 128, %s5516_s29, [#allocation58]   ;;  %2103 = vst [vmem:[#allocation59] sm:$0xff] %v2100_v22 }
 0x97e   :  { %s5088_s10 = scalar_lea.vmem %s2527_s26, 128  ;;  %p5093_p3 = scmp.lt.s32.totalorder %s2527_s26, %s2527_s26 }
 0x97f   :  { %p5089_p2 = scmp.ne.s32.totalorder %s2527_s26, %s5088_s10  ;;  %p5094_p4 = scmp.lt.s32.totalorder %s5088_s10, %s5088_s10 }
 0x981   :  { %p5095_p5 = por %p5094_p4, %p5093_p3 }
 0x983   :  { %p5096_p6 = pnand %p5095_p5, %p5089_p2 }
 0x985   :  { %5099 = shalt.err (!%p5096_p6)
}
 0x986   :  { %s5100_s9 = scalar_lea.hbm %s5521_s13, 128 }
 0x987   :  { %p5101_p7 = scmp.ne.s32.totalorder %s5521_s13, %s5100_s9  ;;  %p5104_p8 = scmp.lt.u32.totalorder %s5100_s9, %s5521_s13 }
 0x989   :  { %p5106_p9 = pnand %p5104_p8, %p5101_p7 }
 0x98b   :  { %5109 = shalt.err (!%p5106_p9)
}
 0x98c   :  { %s6146_s19 = sld [smem:[#allocation106_spill]]  ;;  %s5286_s29 = smov [#allocation60]  }
 0x98d   :  { %2529 = dma.vmem_to_hbm [thread:$0]  %s2527_s26, 128, %s5521_s13, [#allocation58]  }
 0x98e   :  { %s2536_s25 = sshll.u32 %s5286_s29, 4  ;;  %s2537_s25 = int_to_ptr.vmem [resolvable:$true] %s2536_s25 }
 0x98f   :  { %s5110_s2 = scalar_lea.vmem %s2537_s25, 128  ;;  %p5115_p11 = scmp.lt.s32.totalorder %s2537_s25, %s2537_s25 }
 0x990   :  { %p5111_p10 = scmp.ne.s32.totalorder %s2537_s25, %s5110_s2  ;;  %p5116_p12 = scmp.lt.s32.totalorder %s5110_s2, %s5110_s2 }
 0x992   :  { %v2655_v24 = vld [vmem:[%s6146_s19] ss:$0 sm:$0xff]  ;;  %p5117_p13 = por %p5116_p12, %p5115_p11 }
 0x994   :  { %v2287_v25 = vpop.f32.mrb[16].mxu1  ;;  %p5118_p0 = pnand %p5117_p13, %p5111_p10 }
 0x995   :  { %v2288_v26 = vadd.f32 %v2655_v24, %v2287_v25  ;;  %v3627_v27 = vpop.f32.mrb[17].mxu1 }
 0x997   :  { %2291 = vst [vmem:[#allocation60] sm:$0xff] %v2288_v26 }
 0x998   :  { %5121 = shalt.err (!%p5118_p0)
}
 0x999   :  { %s5122_s21 = scalar_lea.hbm %s5526_s8, 128 }
 0x99a   :  { %p5123_p1 = scmp.ne.s32.totalorder %s5526_s8, %s5122_s21  ;;  %p5126_p2 = scmp.lt.u32.totalorder %s5122_s21, %s5526_s8 }
 0x99c   :  { %p5128_p3 = pnand %p5126_p2, %p5123_p1 }
 0x99e   :  { %5131 = shalt.err (!%p5128_p3)
}
 0x99f   :  { %s6147_s13 = sld [smem:[#allocation110_spill]]  ;;  %s5287_s7 = smov [#allocation62]  }
 0x9a0   :  { %2539 = dma.vmem_to_hbm [thread:$0]  %s2537_s25, 128, %s5526_s8, [#allocation61]  }
 0x9a1   :  { %s2546_s24 = sshll.u32 %s5287_s7, 4  ;;  %s2547_s24 = int_to_ptr.vmem [resolvable:$true] %s2546_s24 }
 0x9a2   :  { %s5132_s11 = scalar_lea.vmem %s2547_s24, 128  ;;  %p5137_p5 = scmp.lt.s32.totalorder %s2547_s24, %s2547_s24 }
 0x9a3   :  { %p5133_p4 = scmp.ne.s32.totalorder %s2547_s24, %s5132_s11  ;;  %p5138_p6 = scmp.lt.s32.totalorder %s5132_s11, %s5132_s11 }
 0x9a5   :  { %v2657_v28 = vld [vmem:[%s6147_s13] ss:$0 sm:$0xff]  ;;  %p5139_p7 = por %p5138_p6, %p5137_p5 }
 0x9a7   :  { %p5140_p8 = pnand %p5139_p7, %p5133_p4 }
 0x9b4   :  { %v2475_v18 = vpop.f32.mrb[18].mxu1 }
 0x9b5   :  { %v2476_v30 = vadd.f32 %v2657_v28, %v2475_v18  ;;  %v3697_v32 = vpop.f32.mrb[19].mxu1 }
 0x9b7   :  { %2479 = vst [vmem:[#allocation62] sm:$0xff] %v2476_v30 }
 0x9b8   :  { %5143 = shalt.err (!%p5140_p8)
}
 0x9b9   :  { %s5144_s6 = scalar_lea.hbm %s5531_s5, 128 }
 0x9ba   :  { %p5145_p9 = scmp.ne.s32.totalorder %s5531_s5, %s5144_s6  ;;  %p5148_p10 = scmp.lt.u32.totalorder %s5144_s6, %s5531_s5 }
 0x9bc   :  { %p5150_p11 = pnand %p5148_p10, %p5145_p9 }
 0x9be   :  { %5153 = shalt.err (!%p5150_p11)
}
 0x9bf   :  { %2549 = dma.vmem_to_hbm [thread:$0]  %s2547_s24, 128, %s5531_s5, [#allocation61]  }
 0x9c0   :  { %5188 = dma.done.wait [#allocation4], 128  }
 0x9c1   :  { %5189 = vsyncadd [#allocation4], 4294967168 }
 0x9c2   :  { %5190 = dma.done.wait [#allocation55], 256  }
 0x9c3   :  { %5191 = vsyncadd [#allocation55], 4294967040 }
 0x9c4   :  { %5192 = dma.done.wait [#allocation58], 256  }
 0x9c5   :  { %5193 = vsyncadd [#allocation58], 4294967040 }
 0x9c6   :  { %5194 = dma.done.wait [#allocation61], 256  }
 0x9c7   :  { %5195 = vsyncadd [#allocation61], 4294967040 }
 0x9c8   :  { %2571 = vsyncpa [#allocation3], 1 }
 0x9c9   :  { %2572 = vsyncpa [#allocation6], 1 }
 0x9ca   :  { %2573 = vsyncpa [#allocation9], 1 }
 0x9cb   :  { %2574 = vsyncpa [#allocation12], 1 }
 0x9cc   :  { %2575 = vsyncpa [#allocation15], 1 }
 0x9cd   :  { %2576 = vsyncpa [#allocation18], 1 }
 0x9ce   :  { %2577 = vsyncpa [#allocation21], 1 }
 0x9cf   :  { %2578 = vsyncpa [#allocation24], 1 }
 0x9d0   :  { %2579 = vsyncpa [#allocation27], 1 }
 0x9d1   :  { %2580 = vsyncpa [#allocation30], 1 }
 0x9d2   :  { %2581 = vsyncpa [#allocation33], 1 }
 0x9d3   :  { %2582 = vsyncpa [#allocation36], 1 }
 0x9d4   :  { %2583 = vsyncpa [#allocation39], 1 }
 0x9d5   :  { %2584 = vsyncpa [#allocation42], 1 }
 0x9d6   :  { %2585 = vsyncpa [#allocation45], 1 }
 0x9d7   :  { %2586 = vsyncpa [#allocation48], 1 }
 0x9d8   :  { %2587 = vsyncpa [#allocation51], 1 }
 0x9d9   :  { %2588 = vsyncpa [#allocation4], 1 }
 0x9da   :  { %2589 = vsyncpa [#allocation55], 1 }
 0x9db   :  { %2590 = vsyncpa [#allocation58], 1 }
 0x9dc   :  { %2591 = vsyncpa [#allocation61], 1 }

</bundles_post_ra>
